<compile_context>
chip_gen: v6e
topology: v6e:2x2x1
jax: 0.10.0
libtpu: 0.0.40
codegen_flags: <defaults>
</compile_context>

<pallas_src>
import jax
import jax.numpy as jnp
import numpy as np
from jax import lax
from jax.experimental import pallas as pl
from jax.experimental.pallas import tpu as pltpu

EPS = 1e-5


# ------------------------------- Pallas kernel ------------------------------

def _bn_relu(acc, gamma, beta):
    """Training-mode BatchNorm (batch stats over axis 0, biased var, eps=1e-5)
    + affine + ReLU, all in f32."""
    mean = jnp.mean(acc, axis=0, keepdims=True)
    var = jnp.mean(jnp.square(acc - mean), axis=0, keepdims=True)
    y = (acc - mean) * lax.rsqrt(var + EPS) * gamma + beta
    return jnp.maximum(y, 0.0)


def _maxpool2x2(y):
    """2x2 / stride-2 max pool on NHWC, vectorized (no per-pixel loops).

    Only lane-preserving reshapes (channels stay on the lane axis) and
    integer-indexed slices + jnp.maximum are used.
    """
    B, H, W, C = y.shape
    yr = y.reshape(B, H, W // 2, 2, C)                    # pair adjacent columns
    w = jnp.maximum(yr[:, :, :, 0, :], yr[:, :, :, 1, :])  # (B, H, W/2, C)
    wr = w.reshape(B, H // 2, 2, W // 2, C)               # pair adjacent rows
    return jnp.maximum(wr[:, :, 0, :, :], wr[:, :, 1, :, :])  # (B, H/2, W/2, C)


def fused_forward_kernel(x_ref, w1_ref, g1_ref, be1_ref,
                         w2_ref, g2_ref, be2_ref,
                         fc1w_ref, fc1b_ref, fc2w_ref, fc2b_ref,
                         o_ref, xp1_ref, pat1_ref, xp2_ref, pat2_ref):
    """Whole RelationNetwork forward, single kernel, everything in VMEM.

    x_ref:    (B, H, W, Cin) bf16 NHWC input
    w1_ref:   (9*Cin, C1) bf16   conv1 weight, im2col layout (tap-major, ch-minor)
    w2_ref:   (9*C1,  C1) bf16   conv2 weight, same layout
    g*/be*:   (1, C1) f32        BN affine
    fc1w_ref: (H4*W4*C1, HID) f32  fc1 weight, rows pre-permuted to NHWC order
    fc1b_ref: (1, HID) f32, fc2w_ref: (1, HID) f32, fc2b_ref: (1, 1) f32
    o_ref:    (B, 1) f32 output
    xp1_ref:  (B, H+2,  W+2,  Cin) f32  scratch: zero-padded conv1 input
    pat1_ref: (B*H*W,   9*Cin) bf16     scratch: conv1 im2col patches
    xp2_ref:  (B, H/2+2, W/2+2, C1) f32 scratch: pooled1, zero-padded for conv2
    pat2_ref: (B*H2*W2, 9*C1) bf16      scratch: conv2 im2col patches
    """
    B, Hp, Wp, Cin = xp1_ref.shape
    H, W = Hp - 2, Wp - 2
    C1 = w1_ref.shape[-1]
    H2, W2 = H // 2, W // 2
    H4, W4 = H2 // 2, W2 // 2
    HID = fc1w_ref.shape[-1]
    m1 = B * H * W
    m2 = B * H2 * W2

    # ---------- conv1 input: interior copy, border-only zeroing ----------
    xp1_ref[:, 1:H + 1, 1:W + 1, :] = x_ref[...].astype(jnp.float32)
    xp1_ref[:, 0:1, :, :] = jnp.zeros((B, 1, Wp, Cin), jnp.float32)
    xp1_ref[:, H + 1:H + 2, :, :] = jnp.zeros((B, 1, Wp, Cin), jnp.float32)
    xp1_ref[:, :, 0:1, :] = jnp.zeros((B, Hp, 1, Cin), jnp.float32)
    xp1_ref[:, :, W + 1:W + 2, :] = jnp.zeros((B, Hp, 1, Cin), jnp.float32)

    # ---------- conv1: im2col (9 window copies) + ONE MXU matmul ----------
    for dy in range(3):
        for dx in range(3):
            t = dy * 3 + dx
            pat1_ref[:, t * Cin:(t + 1) * Cin] = (
                xp1_ref[:, dy:dy + H, dx:dx + W, :]
                .reshape(m1, Cin).astype(jnp.bfloat16))
    acc1 = jnp.dot(pat1_ref[...], w1_ref[...],
                   preferred_element_type=jnp.float32)        # (m1, C1) f32
    # conv bias omitted on purpose: BN right after makes it a no-op.
    y1 = _bn_relu(acc1, g1_ref[...], be1_ref[...]).reshape(B, H, W, C1)

    # ---- pool1 (2x2/2) vectorized, ONE store into conv2's padded input ----
    p1 = _maxpool2x2(y1)                                      # (B, H2, W2, C1)
    xp2_ref[:, 1:H2 + 1, 1:W2 + 1, :] = p1
    Hp2, Wp2 = H2 + 2, W2 + 2
    xp2_ref[:, 0:1, :, :] = jnp.zeros((B, 1, Wp2, C1), jnp.float32)
    xp2_ref[:, H2 + 1:H2 + 2, :, :] = jnp.zeros((B, 1, Wp2, C1), jnp.float32)
    xp2_ref[:, :, 0:1, :] = jnp.zeros((B, Hp2, 1, C1), jnp.float32)
    xp2_ref[:, :, W2 + 1:W2 + 2, :] = jnp.zeros((B, Hp2, 1, C1), jnp.float32)

    # ---------- conv2: im2col + ONE MXU matmul ----------
    for dy in range(3):
        for dx in range(3):
            t = dy * 3 + dx
            pat2_ref[:, t * C1:(t + 1) * C1] = (
                xp2_ref[:, dy:dy + H2, dx:dx + W2, :]
                .reshape(m2, C1).astype(jnp.bfloat16))
    acc2 = jnp.dot(pat2_ref[...], w2_ref[...],
                   preferred_element_type=jnp.float32)        # (m2, C1) f32
    y2 = _bn_relu(acc2, g2_ref[...], be2_ref[...]).reshape(B, H2, W2, C1)

    # ---- pool2 vectorized + fc1 as ONE dot (weights already NHWC-ordered) ----
    p2 = _maxpool2x2(y2)                                      # (B, H4, W4, C1)
    flat = jnp.concatenate(
        [p2[:, i, j, :] for i in range(H4) for j in range(W4)], axis=-1)  # (B, H4*W4*C1)
    h = jnp.maximum(
        jnp.dot(flat, fc1w_ref[...], preferred_element_type=jnp.float32)
        + fc1b_ref[...], 0.0)                                 # (B, HID)

    # ---------- head: fc2 (N=1) on the VPU + sigmoid ----------
    z = jnp.sum(h * fc2w_ref[...], axis=-1, keepdims=True) + fc2b_ref[...]
    o_ref[...] = jax.nn.sigmoid(z).astype(o_ref.dtype)


# --------------------------------- wrapper ----------------------------------

def _vmem_spec():
    return pl.BlockSpec(memory_space=pltpu.MemorySpace.VMEM)


@jax.jit
def relation_network_forward_nhwc(kparams, x_nhwc):
    """Fast path: x_nhwc is (B, H, W, 128) bf16 (layout prep done upstream)."""
    x = x_nhwc.astype(jnp.bfloat16)
    B, H, W, Cin = x.shape
    assert H % 4 == 0 and W % 4 == 0, "H and W must be divisible by 4 (two 2x2 pools)"
    C1 = kparams["g1"].shape[-1]
    H2, W2 = H // 2, W // 2
    assert kparams["fc1_w"].shape[0] == C1 * (H // 4) * (W // 4), \
        "fc1 input size must equal C1*(H/4)*(W/4)"
    args = (x, kparams["w1"], kparams["g1"], kparams["be1"],
            kparams["w2"], kparams["g2"], kparams["be2"],
            kparams["fc1_w"], kparams["fc1_b"], kparams["fc2_w"], kparams["fc2_b"])
    return pl.pallas_call(
        fused_forward_kernel,
        out_shape=jax.ShapeDtypeStruct((B, 1), jnp.float32),
        in_specs=[_vmem_spec() for _ in args],
        out_specs=_vmem_spec(),
        scratch_shapes=[
            pltpu.VMEM((B, H + 2, W + 2, Cin), jnp.float32),     # padded conv1 input
            pltpu.VMEM((B * H * W, 9 * Cin), jnp.bfloat16),      # conv1 im2col patches
            pltpu.VMEM((B, H2 + 2, W2 + 2, C1), jnp.float32),    # pooled1 (padded)
            pltpu.VMEM((B * H2 * W2, 9 * C1), jnp.bfloat16),     # conv2 im2col patches
        ],
    )(*args)


def relation_network_forward(kparams, x_nchw):
    """Convenience NCHW entry (PyTorch interface parity). Prefer producing
    NHWC bf16 activations upstream and calling relation_network_forward_nhwc."""
    return relation_network_forward_nhwc(kparams, jnp.transpose(x_nchw, (0, 2, 3, 1)))


def prepare_params(params, h_in, w_in):
    """One-time, host-side layout prep (PyTorch layouts -> kernel layouts)."""
    c1 = params["w1"].shape[-1]
    cin = params["w1"].shape[-2]
    hid = params["fc1_w"].shape[-1]
    h4, w4 = h_in // 4, w_in // 4
    assert params["fc1_w"].shape[0] == c1 * h4 * w4, "fc1 input_size mismatch"
    return {
        # conv weights HWIO (3,3,Cin,Cout) -> im2col (9*Cin, Cout) bf16
        "w1": params["w1"].reshape(9 * cin, c1).astype(jnp.bfloat16),
        "w2": params["w2"].reshape(9 * c1, c1).astype(jnp.bfloat16),
        "g1": params["g1"].reshape(1, c1), "be1": params["be1"].reshape(1, c1),
        "g2": params["g2"].reshape(1, c1), "be2": params["be2"].reshape(1, c1),
        # conv biases b1/b2 intentionally dropped: training-mode BN makes them a no-op.
        # fc1 rows: PyTorch .view(B,-1) flattens NCHW (row = c*H4*W4 + i*W4 + j);
        # permute once to NHWC [i, j, c] so the kernel never transposes activations.
        "fc1_w": jnp.transpose(params["fc1_w"].reshape(c1, h4, w4, hid),
                               (1, 2, 0, 3)).reshape(h4 * w4 * c1, hid),
        "fc1_b": params["fc1_b"].reshape(1, hid),
        "fc2_w": params["fc2_w"].reshape(1, -1),       # (hidden,1) -> (1,hidden) row
        "fc2_b": params["fc2_b"].reshape(1, 1),
    }


# ------------------------------- parameters ---------------------------------

def init_params(key, input_size, hidden_size):
    ks = jax.random.split(key, 6)
    return {
        # conv weights stored HWIO (3,3,Cin,Cout); PyTorch OIHW transposes to this.
        "w1": jax.random.normal(ks[0], (3, 3, 128, 64), jnp.float32) * 0.05,
        "b1": jax.random.normal(ks[1], (64,), jnp.float32) * 0.05,
        "g1": jnp.ones((64,), jnp.float32),
        "be1": jnp.zeros((64,), jnp.float32),
        "w2": jax.random.normal(ks[2], (3, 3, 64, 64), jnp.float32) * 0.05,
        "b2": jax.random.normal(ks[3], (64,), jnp.float32) * 0.05,
        "g2": jnp.ones((64,), jnp.float32),
        "be2": jnp.zeros((64,), jnp.float32),
        # Linear layers stored as (in, out); PyTorch (out, in) transposes to this.
        "fc1_w": jax.random.normal(ks[4], (input_size, hidden_size), jnp.float32) * 0.05,
        "fc1_b": jnp.zeros((hidden_size,), jnp.float32),
        "fc2_w": jax.random.normal(ks[5], (hidden_size, 1), jnp.float32) * 0.05,
        "fc2_b": jnp.zeros((1,), jnp.float32),
    }


# ------------------------- pure-JAX reference (check) -----------------------

def reference_forward(params, x_nchw):
    def block(x, w_hwio, b, g, be):
        w_oihw = jnp.transpose(w_hwio, (3, 2, 0, 1))
        y = lax.conv_general_dilated(
            x, w_oihw, (1, 1), ((1, 1), (1, 1)),
            dimension_numbers=("NCHW", "OIHW", "NCHW"),
            precision=lax.Precision.HIGHEST)
        y = y + b.reshape(1, -1, 1, 1)
        mean = jnp.mean(y, axis=(0, 2, 3), keepdims=True)
        var = jnp.mean((y - mean) ** 2, axis=(0, 2, 3), keepdims=True)
        y = (y - mean) * lax.rsqrt(var + EPS) * g.reshape(1, -1, 1, 1) + be.reshape(1, -1, 1, 1)
        y = jnp.maximum(y, 0.0)
        return lax.reduce_window(y, -jnp.inf, lax.max,
                                 (1, 1, 2, 2), (1, 1, 2, 2), "VALID")

    y = block(x_nchw, params["w1"], params["b1"], params["g1"], params["be1"])
    y = block(y, params["w2"], params["b2"], params["g2"], params["be2"])
    flat = y.reshape(y.shape[0], -1)
    h = jnp.maximum(
        jnp.matmul(flat, params["fc1_w"], precision=lax.Precision.HIGHEST)
        + params["fc1_b"], 0.0)
    z = jnp.matmul(h, params["fc2_w"], precision=lax.Precision.HIGHEST) \
        + params["fc2_b"].reshape(1, 1)
    return jax.nn.sigmoid(z)


# ----------------------------------- main ------------------------------------

if __name__ == "__main__":
    key = jax.random.PRNGKey(0)
    kx, kp = jax.random.split(key)

    # Small shapes consistent with the module: Conv2d expects 128 input channels.
    B, Cin, Hs, Ws = 2, 128, 8, 8
    input_size = 64 * (Hs // 4) * (Ws // 4)   # 64 * 2 * 2 = 256 after two pools
    hidden_size = 8

    x = jax.random.normal(kx, (B, Cin, Hs, Ws), jnp.float32)   # NCHW, like PyTorch
    params = init_params(kp, input_size, hidden_size)
    kparams = prepare_params(params, Hs, Ws)                   # one-time layout prep

    # NCHW -> NHWC bf16 once, OUTSIDE the per-call path (perf-review item).
    x_nhwc = jnp.transpose(x, (0, 2, 3, 1)).astype(jnp.bfloat16)

    out = relation_network_forward_nhwc(kparams, x_nhwc)
    out = jax.block_until_ready(out)
    assert out.shape == (B, 1), out.shape

    # f32/HIGHEST reference vs. kernel with bf16 MXU operands (f32 accumulation):
    # compare with a bf16-appropriate tolerance.
    ref = reference_forward(params, x)
    np.testing.assert_allclose(np.asarray(out), np.asarray(ref),
                               rtol=1e-2, atol=1e-2)
    print("KERNEL_OK")
</pallas_src>

<mosaic_0001>
module attributes {stable_mosaic.version = 11 : i64} {
  func.func @fused_forward_kernel(%arg0: memref<2x8x8x128xbf16, #tpu.memory_space<vmem>>, %arg1: memref<1152x64xbf16, #tpu.memory_space<vmem>>, %arg2: memref<1x64xf32, #tpu.memory_space<vmem>>, %arg3: memref<1x64xf32, #tpu.memory_space<vmem>>, %arg4: memref<576x64xbf16, #tpu.memory_space<vmem>>, %arg5: memref<1x64xf32, #tpu.memory_space<vmem>>, %arg6: memref<1x64xf32, #tpu.memory_space<vmem>>, %arg7: memref<256x8xf32, #tpu.memory_space<vmem>>, %arg8: memref<1x8xf32, #tpu.memory_space<vmem>>, %arg9: memref<1x8xf32, #tpu.memory_space<vmem>>, %arg10: memref<1x1xf32, #tpu.memory_space<vmem>>, %arg11: memref<2x1xf32, #tpu.memory_space<vmem>>, %arg12: memref<2x10x10x128xf32, #tpu.memory_space<vmem>>, %arg13: memref<128x1152xbf16, #tpu.memory_space<vmem>>, %arg14: memref<2x6x6x64xf32, #tpu.memory_space<vmem>>, %arg15: memref<32x576xbf16, #tpu.memory_space<vmem>>) attributes {dimension_semantics = [], scalar_prefetch = 0 : i64, scratch_operands = 4 : i64, tpu.core_type = #tpu.core_type<tc>} {
    %c0 = arith.constant 0 : index
    %c0_0 = arith.constant 0 : index
    %c0_1 = arith.constant 0 : index
    %c0_2 = arith.constant 0 : index
    %0 = vector.load %arg0[%c0, %c0_0, %c0_1, %c0_2] : memref<2x8x8x128xbf16, #tpu.memory_space<vmem>>, vector<2x8x8x128xbf16>
    %1 = arith.extf %0 : vector<2x8x8x128xbf16> to vector<2x8x8x128xf32>
    %c0_3 = arith.constant 0 : index
    %c1 = arith.constant 1 : index
    %c1_4 = arith.constant 1 : index
    %c0_5 = arith.constant 0 : index
    %2 = vector.load %arg12[%c0_3, %c1, %c1_4, %c0_5] : memref<2x10x10x128xf32, #tpu.memory_space<vmem>>, vector<2x8x8x128xf32>
    tpu.vector_store %arg12[%c0_3, %c1, %c1_4, %c0_5], %1 {strides = array<i32>} : memref<2x10x10x128xf32, #tpu.memory_space<vmem>>, vector<2x8x8x128xf32>,
    %cst = arith.constant 0.000000e+00 : f32
    %3 = vector.broadcast %cst : f32 to vector<2x1x10x128xf32>
    %c0_6 = arith.constant 0 : index
    %c0_7 = arith.constant 0 : index
    %c0_8 = arith.constant 0 : index
    %c0_9 = arith.constant 0 : index
    %4 = vector.load %arg12[%c0_6, %c0_7, %c0_8, %c0_9] : memref<2x10x10x128xf32, #tpu.memory_space<vmem>>, vector<2x1x10x128xf32>
    tpu.vector_store %arg12[%c0_6, %c0_7, %c0_8, %c0_9], %3 {strides = array<i32>} : memref<2x10x10x128xf32, #tpu.memory_space<vmem>>, vector<2x1x10x128xf32>,
    %cst_10 = arith.constant 0.000000e+00 : f32
    %5 = vector.broadcast %cst_10 : f32 to vector<2x1x10x128xf32>
    %c0_11 = arith.constant 0 : index
    %c9 = arith.constant 9 : index
    %c0_12 = arith.constant 0 : index
    %c0_13 = arith.constant 0 : index
    %6 = vector.load %arg12[%c0_11, %c9, %c0_12, %c0_13] : memref<2x10x10x128xf32, #tpu.memory_space<vmem>>, vector<2x1x10x128xf32>
    tpu.vector_store %arg12[%c0_11, %c9, %c0_12, %c0_13], %5 {strides = array<i32>} : memref<2x10x10x128xf32, #tpu.memory_space<vmem>>, vector<2x1x10x128xf32>,
    %cst_14 = arith.constant 0.000000e+00 : f32
    %7 = vector.broadcast %cst_14 : f32 to vector<2x10x1x128xf32>
    %c0_15 = arith.constant 0 : index
    %c0_16 = arith.constant 0 : index
    %c0_17 = arith.constant 0 : index
    %c0_18 = arith.constant 0 : index
    %8 = vector.load %arg12[%c0_15, %c0_16, %c0_17, %c0_18] : memref<2x10x10x128xf32, #tpu.memory_space<vmem>>, vector<2x10x1x128xf32>
    tpu.vector_store %arg12[%c0_15, %c0_16, %c0_17, %c0_18], %7 {strides = array<i32>} : memref<2x10x10x128xf32, #tpu.memory_space<vmem>>, vector<2x10x1x128xf32>,
    %cst_19 = arith.constant 0.000000e+00 : f32
    %9 = vector.broadcast %cst_19 : f32 to vector<2x10x1x128xf32>
    %c0_20 = arith.constant 0 : index
    %c0_21 = arith.constant 0 : index
    %c9_22 = arith.constant 9 : index
    %c0_23 = arith.constant 0 : index
    %10 = vector.load %arg12[%c0_20, %c0_21, %c9_22, %c0_23] : memref<2x10x10x128xf32, #tpu.memory_space<vmem>>, vector<2x10x1x128xf32>
    tpu.vector_store %arg12[%c0_20, %c0_21, %c9_22, %c0_23], %9 {strides = array<i32>} : memref<2x10x10x128xf32, #tpu.memory_space<vmem>>, vector<2x10x1x128xf32>,
    %c0_24 = arith.constant 0 : index
    %c0_25 = arith.constant 0 : index
    %c0_26 = arith.constant 0 : index
    %c0_27 = arith.constant 0 : index
    %11 = vector.load %arg12[%c0_24, %c0_25, %c0_26, %c0_27] : memref<2x10x10x128xf32, #tpu.memory_space<vmem>>, vector<2x8x8x128xf32>
    %12 = vector.shape_cast %11 : vector<2x8x8x128xf32> to vector<128x128xf32>
    %13 = arith.truncf %12 : vector<128x128xf32> to vector<128x128xbf16>
    %c0_28 = arith.constant 0 : index
    %c0_29 = arith.constant 0 : index
    %14 = vector.load %arg13[%c0_28, %c0_29] : memref<128x1152xbf16, #tpu.memory_space<vmem>>, vector<128x128xbf16>
    tpu.vector_store %arg13[%c0_28, %c0_29], %13 {strides = array<i32>} : memref<128x1152xbf16, #tpu.memory_space<vmem>>, vector<128x128xbf16>,
    %c0_30 = arith.constant 0 : index
    %c0_31 = arith.constant 0 : index
    %c1_32 = arith.constant 1 : index
    %c0_33 = arith.constant 0 : index
    %15 = vector.load %arg12[%c0_30, %c0_31, %c1_32, %c0_33] : memref<2x10x10x128xf32, #tpu.memory_space<vmem>>, vector<2x8x8x128xf32>
    %16 = vector.shape_cast %15 : vector<2x8x8x128xf32> to vector<128x128xf32>
    %17 = arith.truncf %16 : vector<128x128xf32> to vector<128x128xbf16>
    %c0_34 = arith.constant 0 : index
    %c128 = arith.constant 128 : index
    %18 = vector.load %arg13[%c0_34, %c128] : memref<128x1152xbf16, #tpu.memory_space<vmem>>, vector<128x128xbf16>
    tpu.vector_store %arg13[%c0_34, %c128], %17 {strides = array<i32>} : memref<128x1152xbf16, #tpu.memory_space<vmem>>, vector<128x128xbf16>,
    %c0_35 = arith.constant 0 : index
    %c0_36 = arith.constant 0 : index
    %c2 = arith.constant 2 : index
    %c0_37 = arith.constant 0 : index
    %19 = vector.load %arg12[%c0_35, %c0_36, %c2, %c0_37] : memref<2x10x10x128xf32, #tpu.memory_space<vmem>>, vector<2x8x8x128xf32>
    %20 = vector.shape_cast %19 : vector<2x8x8x128xf32> to vector<128x128xf32>
    %21 = arith.truncf %20 : vector<128x128xf32> to vector<128x128xbf16>
    %c0_38 = arith.constant 0 : index
    %c256 = arith.constant 256 : index
    %22 = vector.load %arg13[%c0_38, %c256] : memref<128x1152xbf16, #tpu.memory_space<vmem>>, vector<128x128xbf16>
    tpu.vector_store %arg13[%c0_38, %c256], %21 {strides = array<i32>} : memref<128x1152xbf16, #tpu.memory_space<vmem>>, vector<128x128xbf16>,
    %c0_39 = arith.constant 0 : index
    %c1_40 = arith.constant 1 : index
    %c0_41 = arith.constant 0 : index
    %c0_42 = arith.constant 0 : index
    %23 = vector.load %arg12[%c0_39, %c1_40, %c0_41, %c0_42] : memref<2x10x10x128xf32, #tpu.memory_space<vmem>>, vector<2x8x8x128xf32>
    %24 = vector.shape_cast %23 : vector<2x8x8x128xf32> to vector<128x128xf32>
    %25 = arith.truncf %24 : vector<128x128xf32> to vector<128x128xbf16>
    %c0_43 = arith.constant 0 : index
    %c384 = arith.constant 384 : index
    %26 = vector.load %arg13[%c0_43, %c384] : memref<128x1152xbf16, #tpu.memory_space<vmem>>, vector<128x128xbf16>
    tpu.vector_store %arg13[%c0_43, %c384], %25 {strides = array<i32>} : memref<128x1152xbf16, #tpu.memory_space<vmem>>, vector<128x128xbf16>,
    %c0_44 = arith.constant 0 : index
    %c1_45 = arith.constant 1 : index
    %c1_46 = arith.constant 1 : index
    %c0_47 = arith.constant 0 : index
    %27 = vector.load %arg12[%c0_44, %c1_45, %c1_46, %c0_47] : memref<2x10x10x128xf32, #tpu.memory_space<vmem>>, vector<2x8x8x128xf32>
    %28 = vector.shape_cast %27 : vector<2x8x8x128xf32> to vector<128x128xf32>
    %29 = arith.truncf %28 : vector<128x128xf32> to vector<128x128xbf16>
    %c0_48 = arith.constant 0 : index
    %c512 = arith.constant 512 : index
    %30 = vector.load %arg13[%c0_48, %c512] : memref<128x1152xbf16, #tpu.memory_space<vmem>>, vector<128x128xbf16>
    tpu.vector_store %arg13[%c0_48, %c512], %29 {strides = array<i32>} : memref<128x1152xbf16, #tpu.memory_space<vmem>>, vector<128x128xbf16>,
    %c0_49 = arith.constant 0 : index
    %c1_50 = arith.constant 1 : index
    %c2_51 = arith.constant 2 : index
    %c0_52 = arith.constant 0 : index
    %31 = vector.load %arg12[%c0_49, %c1_50, %c2_51, %c0_52] : memref<2x10x10x128xf32, #tpu.memory_space<vmem>>, vector<2x8x8x128xf32>
    %32 = vector.shape_cast %31 : vector<2x8x8x128xf32> to vector<128x128xf32>
    %33 = arith.truncf %32 : vector<128x128xf32> to vector<128x128xbf16>
    %c0_53 = arith.constant 0 : index
    %c640 = arith.constant 640 : index
    %34 = vector.load %arg13[%c0_53, %c640] : memref<128x1152xbf16, #tpu.memory_space<vmem>>, vector<128x128xbf16>
    tpu.vector_store %arg13[%c0_53, %c640], %33 {strides = array<i32>} : memref<128x1152xbf16, #tpu.memory_space<vmem>>, vector<128x128xbf16>,
    %c0_54 = arith.constant 0 : index
    %c2_55 = arith.constant 2 : index
    %c0_56 = arith.constant 0 : index
    %c0_57 = arith.constant 0 : index
    %35 = vector.load %arg12[%c0_54, %c2_55, %c0_56, %c0_57] : memref<2x10x10x128xf32, #tpu.memory_space<vmem>>, vector<2x8x8x128xf32>
    %36 = vector.shape_cast %35 : vector<2x8x8x128xf32> to vector<128x128xf32>
    %37 = arith.truncf %36 : vector<128x128xf32> to vector<128x128xbf16>
    %c0_58 = arith.constant 0 : index
    %c768 = arith.constant 768 : index
    %38 = vector.load %arg13[%c0_58, %c768] : memref<128x1152xbf16, #tpu.memory_space<vmem>>, vector<128x128xbf16>
    tpu.vector_store %arg13[%c0_58, %c768], %37 {strides = array<i32>} : memref<128x1152xbf16, #tpu.memory_space<vmem>>, vector<128x128xbf16>,
    %c0_59 = arith.constant 0 : index
    %c2_60 = arith.constant 2 : index
    %c1_61 = arith.constant 1 : index
    %c0_62 = arith.constant 0 : index
    %39 = vector.load %arg12[%c0_59, %c2_60, %c1_61, %c0_62] : memref<2x10x10x128xf32, #tpu.memory_space<vmem>>, vector<2x8x8x128xf32>
    %40 = vector.shape_cast %39 : vector<2x8x8x128xf32> to vector<128x128xf32>
    %41 = arith.truncf %40 : vector<128x128xf32> to vector<128x128xbf16>
    %c0_63 = arith.constant 0 : index
    %c896 = arith.constant 896 : index
    %42 = vector.load %arg13[%c0_63, %c896] : memref<128x1152xbf16, #tpu.memory_space<vmem>>, vector<128x128xbf16>
    tpu.vector_store %arg13[%c0_63, %c896], %41 {strides = array<i32>} : memref<128x1152xbf16, #tpu.memory_space<vmem>>, vector<128x128xbf16>,
    %c0_64 = arith.constant 0 : index
    %c2_65 = arith.constant 2 : index
    %c2_66 = arith.constant 2 : index
    %c0_67 = arith.constant 0 : index
    %43 = vector.load %arg12[%c0_64, %c2_65, %c2_66, %c0_67] : memref<2x10x10x128xf32, #tpu.memory_space<vmem>>, vector<2x8x8x128xf32>
    %44 = vector.shape_cast %43 : vector<2x8x8x128xf32> to vector<128x128xf32>
    %45 = arith.truncf %44 : vector<128x128xf32> to vector<128x128xbf16>
    %c0_68 = arith.constant 0 : index
    %c1024 = arith.constant 1024 : index
    %46 = vector.load %arg13[%c0_68, %c1024] : memref<128x1152xbf16, #tpu.memory_space<vmem>>, vector<128x128xbf16>
    tpu.vector_store %arg13[%c0_68, %c1024], %45 {strides = array<i32>} : memref<128x1152xbf16, #tpu.memory_space<vmem>>, vector<128x128xbf16>,
    %c0_69 = arith.constant 0 : index
    %c0_70 = arith.constant 0 : index
    %47 = vector.load %arg13[%c0_69, %c0_70] : memref<128x1152xbf16, #tpu.memory_space<vmem>>, vector<128x1152xbf16>
    %c0_71 = arith.constant 0 : index
    %c0_72 = arith.constant 0 : index
    %48 = vector.load %arg1[%c0_71, %c0_72] : memref<1152x64xbf16, #tpu.memory_space<vmem>>, vector<1152x64xbf16>
    %cst_73 = arith.constant dense<0.000000e+00> : vector<128x64xf32>
    %49 = tpu.matmul %47, %48, %cst_73 {dimension_numbers = #tpu.dot_dimension_numbers<[1], [0], [0], [1], [0, 0, 1, 1], [], []>} : vector<128x1152xbf16>, vector<1152x64xbf16>, vector<128x64xf32> -> vector<128x64xf32>
    %c0_74 = arith.constant 0 : index
    %c0_75 = arith.constant 0 : index
    %50 = vector.load %arg2[%c0_74, %c0_75] : memref<1x64xf32, #tpu.memory_space<vmem>>, vector<1x64xf32>
    %c0_76 = arith.constant 0 : index
    %c0_77 = arith.constant 0 : index
    %51 = vector.load %arg3[%c0_76, %c0_77] : memref<1x64xf32, #tpu.memory_space<vmem>>, vector<1x64xf32>
    %cst_78 = arith.constant dense<0.000000e+00> : vector<64xf32>
    %52 = vector.multi_reduction <add>, %49, %cst_78 [0] : vector<128x64xf32> to vector<64xf32>
    %53 = vector.shape_cast %52 : vector<64xf32> to vector<1x64xf32>
    %cst_79 = arith.constant 1.280000e+02 : f32
    %54 = vector.broadcast %cst_79 : f32 to vector<1x64xf32>
    %55 = arith.divf %53, %54 : vector<1x64xf32>
    %56 = vector.broadcast %55 : vector<1x64xf32> to vector<128x64xf32>
    %57 = arith.subf %49, %56 : vector<128x64xf32>
    %58 = arith.mulf %57, %57 : vector<128x64xf32>
    %cst_80 = arith.constant dense<0.000000e+00> : vector<64xf32>
    %59 = vector.multi_reduction <add>, %58, %cst_80 [0] : vector<128x64xf32> to vector<64xf32>
    %60 = vector.shape_cast %59 : vector<64xf32> to vector<1x64xf32>
    %cst_81 = arith.constant 1.280000e+02 : f32
    %61 = vector.broadcast %cst_81 : f32 to vector<1x64xf32>
    %62 = arith.divf %60, %61 : vector<1x64xf32>
    %63 = vector.broadcast %55 : vector<1x64xf32> to vector<128x64xf32>
    %64 = arith.subf %49, %63 : vector<128x64xf32>
    %cst_82 = arith.constant 9.99999974E-6 : f32
    %65 = vector.broadcast %cst_82 : f32 to vector<1x64xf32>
    %66 = arith.addf %62, %65 : vector<1x64xf32>
    %67 = math.rsqrt %66 : vector<1x64xf32>
    %68 = vector.broadcast %67 : vector<1x64xf32> to vector<128x64xf32>
    %69 = arith.mulf %64, %68 : vector<128x64xf32>
    %70 = vector.broadcast %50 : vector<1x64xf32> to vector<128x64xf32>
    %71 = arith.mulf %69, %70 : vector<128x64xf32>
    %72 = vector.broadcast %51 : vector<1x64xf32> to vector<128x64xf32>
    %73 = arith.addf %71, %72 : vector<128x64xf32>
    %cst_83 = arith.constant 0.000000e+00 : f32
    %74 = vector.broadcast %cst_83 : f32 to vector<128x64xf32>
    %75 = arith.maximumf %73, %74 : vector<128x64xf32>
    %76 = vector.shape_cast %75 : vector<128x64xf32> to vector<2x8x8x64xf32>
    %77 = vector.shape_cast %76 : vector<2x8x8x64xf32> to vector<2x8x4x2x64xf32>
    %78 = vector.extract_strided_slice %77 {offsets = [0, 0, 0, 0, 0], sizes = [2, 8, 4, 1, 64], strides = [1, 1, 1, 1, 1]} : vector<2x8x4x2x64xf32> to vector<2x8x4x1x64xf32>
    %79 = vector.shape_cast %78 : vector<2x8x4x1x64xf32> to vector<2x8x4x64xf32>
    %80 = vector.extract_strided_slice %77 {offsets = [0, 0, 0, 1, 0], sizes = [2, 8, 4, 1, 64], strides = [1, 1, 1, 1, 1]} : vector<2x8x4x2x64xf32> to vector<2x8x4x1x64xf32>
    %81 = vector.shape_cast %80 : vector<2x8x4x1x64xf32> to vector<2x8x4x64xf32>
    %82 = arith.maximumf %79, %81 : vector<2x8x4x64xf32>
    %83 = vector.shape_cast %82 : vector<2x8x4x64xf32> to vector<2x4x2x4x64xf32>
    %84 = vector.extract_strided_slice %83 {offsets = [0, 0, 0, 0, 0], sizes = [2, 4, 1, 4, 64], strides = [1, 1, 1, 1, 1]} : vector<2x4x2x4x64xf32> to vector<2x4x1x4x64xf32>
    %85 = vector.shape_cast %84 : vector<2x4x1x4x64xf32> to vector<2x4x4x64xf32>
    %86 = vector.extract_strided_slice %83 {offsets = [0, 0, 1, 0, 0], sizes = [2, 4, 1, 4, 64], strides = [1, 1, 1, 1, 1]} : vector<2x4x2x4x64xf32> to vector<2x4x1x4x64xf32>
    %87 = vector.shape_cast %86 : vector<2x4x1x4x64xf32> to vector<2x4x4x64xf32>
    %88 = arith.maximumf %85, %87 : vector<2x4x4x64xf32>
    %c0_84 = arith.constant 0 : index
    %c1_85 = arith.constant 1 : index
    %c1_86 = arith.constant 1 : index
    %c0_87 = arith.constant 0 : index
    %89 = vector.load %arg14[%c0_84, %c1_85, %c1_86, %c0_87] : memref<2x6x6x64xf32, #tpu.memory_space<vmem>>, vector<2x4x4x64xf32>
    tpu.vector_store %arg14[%c0_84, %c1_85, %c1_86, %c0_87], %88 {strides = array<i32>} : memref<2x6x6x64xf32, #tpu.memory_space<vmem>>, vector<2x4x4x64xf32>,
    %cst_88 = arith.constant 0.000000e+00 : f32
    %90 = vector.broadcast %cst_88 : f32 to vector<2x1x6x64xf32>
    %c0_89 = arith.constant 0 : index
    %c0_90 = arith.constant 0 : index
    %c0_91 = arith.constant 0 : index
    %c0_92 = arith.constant 0 : index
    %91 = vector.load %arg14[%c0_89, %c0_90, %c0_91, %c0_92] : memref<2x6x6x64xf32, #tpu.memory_space<vmem>>, vector<2x1x6x64xf32>
    tpu.vector_store %arg14[%c0_89, %c0_90, %c0_91, %c0_92], %90 {strides = array<i32>} : memref<2x6x6x64xf32, #tpu.memory_space<vmem>>, vector<2x1x6x64xf32>,
    %cst_93 = arith.constant 0.000000e+00 : f32
    %92 = vector.broadcast %cst_93 : f32 to vector<2x1x6x64xf32>
    %c0_94 = arith.constant 0 : index
    %c5 = arith.constant 5 : index
    %c0_95 = arith.constant 0 : index
    %c0_96 = arith.constant 0 : index
    %93 = vector.load %arg14[%c0_94, %c5, %c0_95, %c0_96] : memref<2x6x6x64xf32, #tpu.memory_space<vmem>>, vector<2x1x6x64xf32>
    tpu.vector_store %arg14[%c0_94, %c5, %c0_95, %c0_96], %92 {strides = array<i32>} : memref<2x6x6x64xf32, #tpu.memory_space<vmem>>, vector<2x1x6x64xf32>,
    %cst_97 = arith.constant 0.000000e+00 : f32
    %94 = vector.broadcast %cst_97 : f32 to vector<2x6x1x64xf32>
    %c0_98 = arith.constant 0 : index
    %c0_99 = arith.constant 0 : index
    %c0_100 = arith.constant 0 : index
    %c0_101 = arith.constant 0 : index
    %95 = vector.load %arg14[%c0_98, %c0_99, %c0_100, %c0_101] : memref<2x6x6x64xf32, #tpu.memory_space<vmem>>, vector<2x6x1x64xf32>
    tpu.vector_store %arg14[%c0_98, %c0_99, %c0_100, %c0_101], %94 {strides = array<i32>} : memref<2x6x6x64xf32, #tpu.memory_space<vmem>>, vector<2x6x1x64xf32>,
    %cst_102 = arith.constant 0.000000e+00 : f32
    %96 = vector.broadcast %cst_102 : f32 to vector<2x6x1x64xf32>
    %c0_103 = arith.constant 0 : index
    %c0_104 = arith.constant 0 : index
    %c5_105 = arith.constant 5 : index
    %c0_106 = arith.constant 0 : index
    %97 = vector.load %arg14[%c0_103, %c0_104, %c5_105, %c0_106] : memref<2x6x6x64xf32, #tpu.memory_space<vmem>>, vector<2x6x1x64xf32>
    tpu.vector_store %arg14[%c0_103, %c0_104, %c5_105, %c0_106], %96 {strides = array<i32>} : memref<2x6x6x64xf32, #tpu.memory_space<vmem>>, vector<2x6x1x64xf32>,
    %c0_107 = arith.constant 0 : index
    %c0_108 = arith.constant 0 : index
    %c0_109 = arith.constant 0 : index
    %c0_110 = arith.constant 0 : index
    %98 = vector.load %arg14[%c0_107, %c0_108, %c0_109, %c0_110] : memref<2x6x6x64xf32, #tpu.memory_space<vmem>>, vector<2x4x4x64xf32>
    %99 = vector.shape_cast %98 : vector<2x4x4x64xf32> to vector<32x64xf32>
    %100 = arith.truncf %99 : vector<32x64xf32> to vector<32x64xbf16>
    %c0_111 = arith.constant 0 : index
    %c0_112 = arith.constant 0 : index
    %101 = vector.load %arg15[%c0_111, %c0_112] : memref<32x576xbf16, #tpu.memory_space<vmem>>, vector<32x64xbf16>
    tpu.vector_store %arg15[%c0_111, %c0_112], %100 {strides = array<i32>} : memref<32x576xbf16, #tpu.memory_space<vmem>>, vector<32x64xbf16>,
    %c0_113 = arith.constant 0 : index
    %c0_114 = arith.constant 0 : index
    %c1_115 = arith.constant 1 : index
    %c0_116 = arith.constant 0 : index
    %102 = vector.load %arg14[%c0_113, %c0_114, %c1_115, %c0_116] : memref<2x6x6x64xf32, #tpu.memory_space<vmem>>, vector<2x4x4x64xf32>
    %103 = vector.shape_cast %102 : vector<2x4x4x64xf32> to vector<32x64xf32>
    %104 = arith.truncf %103 : vector<32x64xf32> to vector<32x64xbf16>
    %c0_117 = arith.constant 0 : index
    %c64 = arith.constant 64 : index
    %105 = vector.load %arg15[%c0_117, %c64] : memref<32x576xbf16, #tpu.memory_space<vmem>>, vector<32x64xbf16>
    tpu.vector_store %arg15[%c0_117, %c64], %104 {strides = array<i32>} : memref<32x576xbf16, #tpu.memory_space<vmem>>, vector<32x64xbf16>,
    %c0_118 = arith.constant 0 : index
    %c0_119 = arith.constant 0 : index
    %c2_120 = arith.constant 2 : index
    %c0_121 = arith.constant 0 : index
    %106 = vector.load %arg14[%c0_118, %c0_119, %c2_120, %c0_121] : memref<2x6x6x64xf32, #tpu.memory_space<vmem>>, vector<2x4x4x64xf32>
    %107 = vector.shape_cast %106 : vector<2x4x4x64xf32> to vector<32x64xf32>
    %108 = arith.truncf %107 : vector<32x64xf32> to vector<32x64xbf16>
    %c0_122 = arith.constant 0 : index
    %c128_123 = arith.constant 128 : index
    %109 = vector.load %arg15[%c0_122, %c128_123] : memref<32x576xbf16, #tpu.memory_space<vmem>>, vector<32x64xbf16>
    tpu.vector_store %arg15[%c0_122, %c128_123], %108 {strides = array<i32>} : memref<32x576xbf16, #tpu.memory_space<vmem>>, vector<32x64xbf16>,
    %c0_124 = arith.constant 0 : index
    %c1_125 = arith.constant 1 : index
    %c0_126 = arith.constant 0 : index
    %c0_127 = arith.constant 0 : index
    %110 = vector.load %arg14[%c0_124, %c1_125, %c0_126, %c0_127] : memref<2x6x6x64xf32, #tpu.memory_space<vmem>>, vector<2x4x4x64xf32>
    %111 = vector.shape_cast %110 : vector<2x4x4x64xf32> to vector<32x64xf32>
    %112 = arith.truncf %111 : vector<32x64xf32> to vector<32x64xbf16>
    %c0_128 = arith.constant 0 : index
    %c192 = arith.constant 192 : index
    %113 = vector.load %arg15[%c0_128, %c192] : memref<32x576xbf16, #tpu.memory_space<vmem>>, vector<32x64xbf16>
    tpu.vector_store %arg15[%c0_128, %c192], %112 {strides = array<i32>} : memref<32x576xbf16, #tpu.memory_space<vmem>>, vector<32x64xbf16>,
    %c0_129 = arith.constant 0 : index
    %c1_130 = arith.constant 1 : index
    %c1_131 = arith.constant 1 : index
    %c0_132 = arith.constant 0 : index
    %114 = vector.load %arg14[%c0_129, %c1_130, %c1_131, %c0_132] : memref<2x6x6x64xf32, #tpu.memory_space<vmem>>, vector<2x4x4x64xf32>
    %115 = vector.shape_cast %114 : vector<2x4x4x64xf32> to vector<32x64xf32>
    %116 = arith.truncf %115 : vector<32x64xf32> to vector<32x64xbf16>
    %c0_133 = arith.constant 0 : index
    %c256_134 = arith.constant 256 : index
    %117 = vector.load %arg15[%c0_133, %c256_134] : memref<32x576xbf16, #tpu.memory_space<vmem>>, vector<32x64xbf16>
    tpu.vector_store %arg15[%c0_133, %c256_134], %116 {strides = array<i32>} : memref<32x576xbf16, #tpu.memory_space<vmem>>, vector<32x64xbf16>,
    %c0_135 = arith.constant 0 : index
    %c1_136 = arith.constant 1 : index
    %c2_137 = arith.constant 2 : index
    %c0_138 = arith.constant 0 : index
    %118 = vector.load %arg14[%c0_135, %c1_136, %c2_137, %c0_138] : memref<2x6x6x64xf32, #tpu.memory_space<vmem>>, vector<2x4x4x64xf32>
    %119 = vector.shape_cast %118 : vector<2x4x4x64xf32> to vector<32x64xf32>
    %120 = arith.truncf %119 : vector<32x64xf32> to vector<32x64xbf16>
    %c0_139 = arith.constant 0 : index
    %c320 = arith.constant 320 : index
    %121 = vector.load %arg15[%c0_139, %c320] : memref<32x576xbf16, #tpu.memory_space<vmem>>, vector<32x64xbf16>
    tpu.vector_store %arg15[%c0_139, %c320], %120 {strides = array<i32>} : memref<32x576xbf16, #tpu.memory_space<vmem>>, vector<32x64xbf16>,
    %c0_140 = arith.constant 0 : index
    %c2_141 = arith.constant 2 : index
    %c0_142 = arith.constant 0 : index
    %c0_143 = arith.constant 0 : index
    %122 = vector.load %arg14[%c0_140, %c2_141, %c0_142, %c0_143] : memref<2x6x6x64xf32, #tpu.memory_space<vmem>>, vector<2x4x4x64xf32>
    %123 = vector.shape_cast %122 : vector<2x4x4x64xf32> to vector<32x64xf32>
    %124 = arith.truncf %123 : vector<32x64xf32> to vector<32x64xbf16>
    %c0_144 = arith.constant 0 : index
    %c384_145 = arith.constant 384 : index
    %125 = vector.load %arg15[%c0_144, %c384_145] : memref<32x576xbf16, #tpu.memory_space<vmem>>, vector<32x64xbf16>
    tpu.vector_store %arg15[%c0_144, %c384_145], %124 {strides = array<i32>} : memref<32x576xbf16, #tpu.memory_space<vmem>>, vector<32x64xbf16>,
    %c0_146 = arith.constant 0 : index
    %c2_147 = arith.constant 2 : index
    %c1_148 = arith.constant 1 : index
    %c0_149 = arith.constant 0 : index
    %126 = vector.load %arg14[%c0_146, %c2_147, %c1_148, %c0_149] : memref<2x6x6x64xf32, #tpu.memory_space<vmem>>, vector<2x4x4x64xf32>
    %127 = vector.shape_cast %126 : vector<2x4x4x64xf32> to vector<32x64xf32>
    %128 = arith.truncf %127 : vector<32x64xf32> to vector<32x64xbf16>
    %c0_150 = arith.constant 0 : index
    %c448 = arith.constant 448 : index
    %129 = vector.load %arg15[%c0_150, %c448] : memref<32x576xbf16, #tpu.memory_space<vmem>>, vector<32x64xbf16>
    tpu.vector_store %arg15[%c0_150, %c448], %128 {strides = array<i32>} : memref<32x576xbf16, #tpu.memory_space<vmem>>, vector<32x64xbf16>,
    %c0_151 = arith.constant 0 : index
    %c2_152 = arith.constant 2 : index
    %c2_153 = arith.constant 2 : index
    %c0_154 = arith.constant 0 : index
    %130 = vector.load %arg14[%c0_151, %c2_152, %c2_153, %c0_154] : memref<2x6x6x64xf32, #tpu.memory_space<vmem>>, vector<2x4x4x64xf32>
    %131 = vector.shape_cast %130 : vector<2x4x4x64xf32> to vector<32x64xf32>
    %132 = arith.truncf %131 : vector<32x64xf32> to vector<32x64xbf16>
    %c0_155 = arith.constant 0 : index
    %c512_156 = arith.constant 512 : index
    %133 = vector.load %arg15[%c0_155, %c512_156] : memref<32x576xbf16, #tpu.memory_space<vmem>>, vector<32x64xbf16>
    tpu.vector_store %arg15[%c0_155, %c512_156], %132 {strides = array<i32>} : memref<32x576xbf16, #tpu.memory_space<vmem>>, vector<32x64xbf16>,
    %c0_157 = arith.constant 0 : index
    %c0_158 = arith.constant 0 : index
    %134 = vector.load %arg15[%c0_157, %c0_158] : memref<32x576xbf16, #tpu.memory_space<vmem>>, vector<32x576xbf16>
    %c0_159 = arith.constant 0 : index
    %c0_160 = arith.constant 0 : index
    %135 = vector.load %arg4[%c0_159, %c0_160] : memref<576x64xbf16, #tpu.memory_space<vmem>>, vector<576x64xbf16>
    %cst_161 = arith.constant dense<0.000000e+00> : vector<32x64xf32>
    %136 = tpu.matmul %134, %135, %cst_161 {dimension_numbers = #tpu.dot_dimension_numbers<[1], [0], [0], [1], [0, 0, 1, 1], [], []>} : vector<32x576xbf16>, vector<576x64xbf16>, vector<32x64xf32> -> vector<32x64xf32>
    %c0_162 = arith.constant 0 : index
    %c0_163 = arith.constant 0 : index
    %137 = vector.load %arg5[%c0_162, %c0_163] : memref<1x64xf32, #tpu.memory_space<vmem>>, vector<1x64xf32>
    %c0_164 = arith.constant 0 : index
    %c0_165 = arith.constant 0 : index
    %138 = vector.load %arg6[%c0_164, %c0_165] : memref<1x64xf32, #tpu.memory_space<vmem>>, vector<1x64xf32>
    %cst_166 = arith.constant dense<0.000000e+00> : vector<64xf32>
    %139 = vector.multi_reduction <add>, %136, %cst_166 [0] : vector<32x64xf32> to vector<64xf32>
    %140 = vector.shape_cast %139 : vector<64xf32> to vector<1x64xf32>
    %cst_167 = arith.constant 3.200000e+01 : f32
    %141 = vector.broadcast %cst_167 : f32 to vector<1x64xf32>
    %142 = arith.divf %140, %141 : vector<1x64xf32>
    %143 = vector.broadcast %142 : vector<1x64xf32> to vector<32x64xf32>
    %144 = arith.subf %136, %143 : vector<32x64xf32>
    %145 = arith.mulf %144, %144 : vector<32x64xf32>
    %cst_168 = arith.constant dense<0.000000e+00> : vector<64xf32>
    %146 = vector.multi_reduction <add>, %145, %cst_168 [0] : vector<32x64xf32> to vector<64xf32>
    %147 = vector.shape_cast %146 : vector<64xf32> to vector<1x64xf32>
    %cst_169 = arith.constant 3.200000e+01 : f32
    %148 = vector.broadcast %cst_169 : f32 to vector<1x64xf32>
    %149 = arith.divf %147, %148 : vector<1x64xf32>
    %150 = vector.broadcast %142 : vector<1x64xf32> to vector<32x64xf32>
    %151 = arith.subf %136, %150 : vector<32x64xf32>
    %cst_170 = arith.constant 9.99999974E-6 : f32
    %152 = vector.broadcast %cst_170 : f32 to vector<1x64xf32>
    %153 = arith.addf %149, %152 : vector<1x64xf32>
    %154 = math.rsqrt %153 : vector<1x64xf32>
    %155 = vector.broadcast %154 : vector<1x64xf32> to vector<32x64xf32>
    %156 = arith.mulf %151, %155 : vector<32x64xf32>
    %157 = vector.broadcast %137 : vector<1x64xf32> to vector<32x64xf32>
    %158 = arith.mulf %156, %157 : vector<32x64xf32>
    %159 = vector.broadcast %138 : vector<1x64xf32> to vector<32x64xf32>
    %160 = arith.addf %158, %159 : vector<32x64xf32>
    %cst_171 = arith.constant 0.000000e+00 : f32
    %161 = vector.broadcast %cst_171 : f32 to vector<32x64xf32>
    %162 = arith.maximumf %160, %161 : vector<32x64xf32>
    %163 = vector.shape_cast %162 : vector<32x64xf32> to vector<2x4x4x64xf32>
    %164 = vector.shape_cast %163 : vector<2x4x4x64xf32> to vector<2x4x2x2x64xf32>
    %165 = vector.extract_strided_slice %164 {offsets = [0, 0, 0, 0, 0], sizes = [2, 4, 2, 1, 64], strides = [1, 1, 1, 1, 1]} : vector<2x4x2x2x64xf32> to vector<2x4x2x1x64xf32>
    %166 = vector.shape_cast %165 : vector<2x4x2x1x64xf32> to vector<2x4x2x64xf32>
    %167 = vector.extract_strided_slice %164 {offsets = [0, 0, 0, 1, 0], sizes = [2, 4, 2, 1, 64], strides = [1, 1, 1, 1, 1]} : vector<2x4x2x2x64xf32> to vector<2x4x2x1x64xf32>
    %168 = vector.shape_cast %167 : vector<2x4x2x1x64xf32> to vector<2x4x2x64xf32>
    %169 = arith.maximumf %166, %168 : vector<2x4x2x64xf32>
    %170 = vector.shape_cast %169 : vector<2x4x2x64xf32> to vector<2x2x2x2x64xf32>
    %171 = vector.extract_strided_slice %170 {offsets = [0, 0, 0, 0, 0], sizes = [2, 2, 1, 2, 64], strides = [1, 1, 1, 1, 1]} : vector<2x2x2x2x64xf32> to vector<2x2x1x2x64xf32>
    %172 = vector.shape_cast %171 : vector<2x2x1x2x64xf32> to vector<2x2x2x64xf32>
    %173 = vector.extract_strided_slice %170 {offsets = [0, 0, 1, 0, 0], sizes = [2, 2, 1, 2, 64], strides = [1, 1, 1, 1, 1]} : vector<2x2x2x2x64xf32> to vector<2x2x1x2x64xf32>
    %174 = vector.shape_cast %173 : vector<2x2x1x2x64xf32> to vector<2x2x2x64xf32>
    %175 = arith.maximumf %172, %174 : vector<2x2x2x64xf32>
    %176 = vector.extract_strided_slice %175 {offsets = [0, 0, 0, 0], sizes = [2, 1, 1, 64], strides = [1, 1, 1, 1]} : vector<2x2x2x64xf32> to vector<2x1x1x64xf32>
    %177 = vector.shape_cast %176 : vector<2x1x1x64xf32> to vector<2x64xf32>
    %178 = vector.extract_strided_slice %175 {offsets = [0, 0, 1, 0], sizes = [2, 1, 1, 64], strides = [1, 1, 1, 1]} : vector<2x2x2x64xf32> to vector<2x1x1x64xf32>
    %179 = vector.shape_cast %178 : vector<2x1x1x64xf32> to vector<2x64xf32>
    %180 = vector.extract_strided_slice %175 {offsets = [0, 1, 0, 0], sizes = [2, 1, 1, 64], strides = [1, 1, 1, 1]} : vector<2x2x2x64xf32> to vector<2x1x1x64xf32>
    %181 = vector.shape_cast %180 : vector<2x1x1x64xf32> to vector<2x64xf32>
    %182 = vector.extract_strided_slice %175 {offsets = [0, 1, 1, 0], sizes = [2, 1, 1, 64], strides = [1, 1, 1, 1]} : vector<2x2x2x64xf32> to vector<2x1x1x64xf32>
    %183 = vector.shape_cast %182 : vector<2x1x1x64xf32> to vector<2x64xf32>
    %184 = tpu.concatenate %177, %179, %181, %183 in 1 : vector<2x64xf32>, vector<2x64xf32>, vector<2x64xf32>, vector<2x64xf32> -> vector<2x256xf32>
    %c0_172 = arith.constant 0 : index
    %c0_173 = arith.constant 0 : index
    %185 = vector.load %arg7[%c0_172, %c0_173] : memref<256x8xf32, #tpu.memory_space<vmem>>, vector<256x8xf32>
    %cst_174 = arith.constant dense<0.000000e+00> : vector<2x8xf32>
    %186 = tpu.matmul %184, %185, %cst_174 {dimension_numbers = #tpu.dot_dimension_numbers<[1], [0], [0], [1], [0, 0, 1, 1], [], []>} : vector<2x256xf32>, vector<256x8xf32>, vector<2x8xf32> -> vector<2x8xf32>
    %c0_175 = arith.constant 0 : index
    %c0_176 = arith.constant 0 : index
    %187 = vector.load %arg8[%c0_175, %c0_176] : memref<1x8xf32, #tpu.memory_space<vmem>>, vector<1x8xf32>
    %188 = vector.broadcast %187 : vector<1x8xf32> to vector<2x8xf32>
    %189 = arith.addf %186, %188 : vector<2x8xf32>
    %cst_177 = arith.constant 0.000000e+00 : f32
    %190 = vector.broadcast %cst_177 : f32 to vector<2x8xf32>
    %191 = arith.maximumf %189, %190 : vector<2x8xf32>
    %c0_178 = arith.constant 0 : index
    %c0_179 = arith.constant 0 : index
    %192 = vector.load %arg9[%c0_178, %c0_179] : memref<1x8xf32, #tpu.memory_space<vmem>>, vector<1x8xf32>
    %193 = vector.broadcast %192 : vector<1x8xf32> to vector<2x8xf32>
    %194 = arith.mulf %191, %193 : vector<2x8xf32>
    %cst_180 = arith.constant dense<0.000000e+00> : vector<2xf32>
    %195 = vector.multi_reduction <add>, %194, %cst_180 [1] : vector<2x8xf32> to vector<2xf32>
    %196 = vector.shape_cast %195 : vector<2xf32> to vector<2x1xf32>
    %c0_181 = arith.constant 0 : index
    %c0_182 = arith.constant 0 : index
    %197 = vector.load %arg10[%c0_181, %c0_182] : memref<1x1xf32, #tpu.memory_space<vmem>>, vector<1x1xf32>
    %198 = vector.broadcast %197 : vector<1x1xf32> to vector<2x1xf32>
    %199 = arith.addf %196, %198 : vector<2x1xf32>
    %200 = arith.negf %199 : vector<2x1xf32>
    %201 = math.exp %200 : vector<2x1xf32>
    %cst_183 = arith.constant 1.000000e+00 : f32
    %202 = vector.broadcast %cst_183 : f32 to vector<2x1xf32>
    %203 = arith.addf %202, %201 : vector<2x1xf32>
    %204 = arith.divf %202, %203 : vector<2x1xf32>
    %c0_184 = arith.constant 0 : index
    %c0_185 = arith.constant 0 : index
    %205 = vector.load %arg11[%c0_184, %c0_185] : memref<2x1xf32, #tpu.memory_space<vmem>>, vector<2x1xf32>
    tpu.vector_store %arg11[%c0_184, %c0_185], %204 {strides = array<i32>} : memref<2x1xf32, #tpu.memory_space<vmem>>, vector<2x1xf32>,
    return
  }
}

</mosaic_0001>

<bundles_post_ra>
// kernel: relation_network_forward_nhwc.1
= control target key start
LH: loop header
LB: loop body
LE: loop exit
PB: predicated region body
PF: predicated region fallthrough
CT: control target
= control target key end

     0   :  { %v7959_v1 = vmov 0.0   ;;  %vm2515_vm0 = vcmask 523264   ;;  %vm3554_vm1 = vcmask 516096   ;;  %vm3548_vm2 = vcmask 521216   ;;  %s6317_s13 = smov 64   ;;  %s7947_s1 = inlined_call_operand.vmem [shape: bf16[1152,64], index: 1, kind: input, shape index: {}]   ;;  %s7948_s0 = inlined_call_operand.vmem [shape: bf16[2,8,8,128], index: 0, kind: input, shape index: {}]   ;;  %s7949_s2 = inlined_call_operand.vmem [shape: f32[1,64], index: 2, kind: input, shape index: {}]   ;;  %s7950_s4 = inlined_call_operand.vmem [shape: bf16[576,64], index: 4, kind: input, shape index: {}]   ;;  %s7951_s3 = inlined_call_operand.vmem [shape: f32[1,64], index: 3, kind: input, shape index: {}]   ;;  %s7952_s7 = inlined_call_operand.vmem [shape: f32[256,8], index: 7, kind: input, shape index: {}]   ;;  %s7953_s5 = inlined_call_operand.vmem [shape: f32[1,64], index: 5, kind: input, shape index: {}]   ;;  %s7954_s6 = inlined_call_operand.vmem [shape: f32[1,64], index: 6, kind: input, shape index: {}]   ;;  %s7955_s10 = inlined_call_operand.<no memory space> [shape: f32[1,1], index: 10, kind: input, shape index: {}]   ;;  %s7956_s8 = inlined_call_operand.vmem [shape: f32[1,8], index: 8, kind: input, shape index: {}]   ;;  %s7957_s9 = inlined_call_operand.vmem [shape: f32[1,8], index: 9, kind: input, shape index: {}]   ;;  %s7958_s11 = inlined_call_operand.vmem [shape: f32[2,1], index: 11, kind: output, shape index: {}]  }
   0x1   :  { %v6037_v0 = vld [vmem:[%s7947_s1 + $0x78] sm:$0xff]   ;;  %90 = vst [vmem:[#allocation2] sm:$0xff] %v7959_v1  ;;  %91 = vst [vmem:[#allocation2 + $0x8] sm:$0x3] %v7959_v1  ;;  %v6041_v5 = vld [vmem:[%s7947_s1 + $0x70] sm:$0xff]   ;;  %vm3503_vm3 = vcmask 1041409  }
   0x2   :  { %100 = vst [vmem:[#allocation2 + $0x10] sm:$0x1] %v7959_v1  ;;  %92 = vst [vmem:[#allocation2 + $0xa0] sm:$0xff] %v7959_v1  ;;  %v6038_v2 = vld [vmem:[%s7947_s1 + $0xf8] sm:$0xff]   ;;  %5616 = vmatprep.subr.bf16.mxu0 %v6037_v0  ;;  %v6042_v6 = vld [vmem:[%s7947_s1 + $0xf0] sm:$0xff]   ;;  %vm3505_vm4 = vcmask 1042434  }
   0x3   :  { %93 = vst [vmem:[#allocation2 + $0xa8] sm:$0x3] %v7959_v1  ;;  %95 = vst [vmem:[#allocation2 + $0x90] sm:$0xff] %v7959_v1  ;;  %v6039_v3 = vld [vmem:[%s7947_s1 + $0x38] sm:$0xff]   ;;  %5680 = vmatprep.subr.bf16.mxu1 %v6038_v2  ;;  %v6043_v7 = vld [vmem:[%s7947_s1 + $0x30] sm:$0xff]   ;;  %vm3507_vm5 = vcmask 1043459  }
   0x4   :  { %96 = vst [vmem:[#allocation2 + $0x98] sm:$0x3] %v7959_v1  ;;  %97 = vst [vmem:[#allocation2 + $0x130] sm:$0xff] %v7959_v1  ;;  %v6040_v4 = vld [vmem:[%s7947_s1 + $0xb8] sm:$0xff]   ;;  %5617 = vmatpush3.bf16.msra.mxu0 %v6039_v3  ;;  %v6044_v8 = vld [vmem:[%s7947_s1 + $0xb0] sm:$0xff]   ;;  %vm3539_vm6 = vcmask 519168  }
   0x5   :  { %98 = vst [vmem:[#allocation2 + $0x138] sm:$0x3] %v7959_v1  ;;  %101 = vst [vmem:[#allocation2 + $0x20] sm:$0x1] %v7959_v1  ;;  %5681 = vmatpush3.bf16.msra.mxu1 %v6040_v4  ;;  %5618 = vmatprep.subr.bf16.mxu0 %v6041_v5  ;;  %v6045_v9 = vld [vmem:[%s7947_s1 + $0x68] sm:$0xff]   ;;  %v6049_v13 = vld [vmem:[%s7947_s1 + $0x60] sm:$0xff]  }
   0x6   :  { %102 = vst [vmem:[#allocation2 + $0x30] sm:$0x1] %v7959_v1  ;;  %103 = vst [vmem:[#allocation2 + $0x40] sm:$0x1] %v7959_v1  ;;  %5682 = vmatprep.subr.bf16.mxu1 %v6042_v6  ;;  %v6046_v10 = vld [vmem:[%s7947_s1 + $0xe8] sm:$0xff]   ;;  %v6050_v14 = vld [vmem:[%s7947_s1 + $0xe0] sm:$0xff]  }
   0x7   :  { %104 = vst [vmem:[#allocation2 + $0x50] sm:$0x1] %v7959_v1  ;;  %105 = vst [vmem:[#allocation2 + $0x60] sm:$0x1] %v7959_v1  ;;  %v6047_v11 = vld [vmem:[%s7947_s1 + $0x28] sm:$0xff]   ;;  %v6051_v15 = vld [vmem:[%s7947_s1 + $0x20] sm:$0xff]  }
   0x8   :  { %106 = vst [vmem:[#allocation2 + $0x70] sm:$0x1] %v7959_v1  ;;  %107 = vst [vmem:[#allocation2 + $0x80] sm:$0x1] %v7959_v1  ;;  %5619 = vmatpush3.bf16.msra.mxu0 %v6043_v7  ;;  %v6048_v12 = vld [vmem:[%s7947_s1 + $0xa8] sm:$0xff]   ;;  %v6052_v16 = vld [vmem:[%s7947_s1 + $0xa0] sm:$0xff]  }
   0x9   :  { %110 = vst [vmem:[#allocation2 + $0xb0] sm:$0x1] %v7959_v1  ;;  %111 = vst [vmem:[#allocation2 + $0xc0] sm:$0x1] %v7959_v1  ;;  %5683 = vmatpush3.bf16.msra.mxu1 %v6044_v8  ;;  %5620 = vmatprep.subr.bf16.mxu0 %v6045_v9  ;;  %v6053_v17 = vld [vmem:[%s7947_s1 + $0x58] sm:$0xff]   ;;  %v6057_v21 = vld [vmem:[%s7947_s1 + $0x50] sm:$0xff]  }
   0xa   :  { %112 = vst [vmem:[#allocation2 + $0xd0] sm:$0x1] %v7959_v1  ;;  %113 = vst [vmem:[#allocation2 + $0xe0] sm:$0x1] %v7959_v1  ;;  %5684 = vmatprep.subr.bf16.mxu1 %v6046_v10  ;;  %v6054_v18 = vld [vmem:[%s7947_s1 + $0xd8] sm:$0xff]   ;;  %v6058_v22 = vld [vmem:[%s7947_s1 + $0xd0] sm:$0xff]  }
   0xb   :  { %114 = vst [vmem:[#allocation2 + $0xf0] sm:$0x1] %v7959_v1  ;;  %115 = vst [vmem:[#allocation2 + $0x100] sm:$0x1] %v7959_v1  ;;  %v6055_v19 = vld [vmem:[%s7947_s1 + $0x18] sm:$0xff]   ;;  %v6059_v23 = vld [vmem:[%s7947_s1 + $0x10] sm:$0xff]  }
   0xc   :  { %116 = vst [vmem:[#allocation2 + $0x110] sm:$0x1] %v7959_v1  ;;  %117 = vst [vmem:[#allocation2 + $0x120] sm:$0x1] %v7959_v1  ;;  %5621 = vmatpush3.bf16.msra.mxu0 %v6047_v11  ;;  %v6056_v20 = vld [vmem:[%s7947_s1 + $0x98] sm:$0xff]   ;;  %v6060_v24 = vld [vmem:[%s7947_s1 + $0x90] sm:$0xff]  }
   0xd   :  { %120 = vst [vmem:[#allocation2 + $0x19] sm:$0x1] %v7959_v1  ;;  %121 = vst [vmem:[#allocation2 + $0x29] sm:$0x1] %v7959_v1  ;;  %5685 = vmatpush3.bf16.msra.mxu1 %v6048_v12  ;;  %5622 = vmatprep.subr.bf16.mxu0 %v6049_v13  ;;  %v6061_v25 = vld [vmem:[%s7947_s1 + $0x48] sm:$0xff]   ;;  %v6065_v29 = vld [vmem:[%s7947_s1 + $0x40] sm:$0xff]  }
   0xe   :  { %122 = vst [vmem:[#allocation2 + $0x39] sm:$0x1] %v7959_v1  ;;  %123 = vst [vmem:[#allocation2 + $0x49] sm:$0x1] %v7959_v1  ;;  %5686 = vmatprep.subr.bf16.mxu1 %v6050_v14  ;;  %v6062_v26 = vld [vmem:[%s7947_s1 + $0xc8] sm:$0xff]   ;;  %v6066_v30 = vld [vmem:[%s7947_s1 + $0xc0] sm:$0xff]  }
   0xf   :  { %124 = vst [vmem:[#allocation2 + $0x59] sm:$0x1] %v7959_v1  ;;  %125 = vst [vmem:[#allocation2 + $0x69] sm:$0x1] %v7959_v1  ;;  %v6063_v27 = vld [vmem:[%s7947_s1 + $0x8] sm:$0xff]   ;;  %v6067_v31 = vld [vmem:[%s7947_s1] sm:$0xff]  }
  0x10   :  { %126 = vst [vmem:[#allocation2 + $0x79] sm:$0x1] %v7959_v1  ;;  %127 = vst [vmem:[#allocation2 + $0x89] sm:$0x1] %v7959_v1  ;;  %5623 = vmatpush3.bf16.msra.mxu0 %v6051_v15  ;;  %v6064_v28 = vld [vmem:[%s7947_s1 + $0x88] sm:$0xff]   ;;  %v6068_v32 = vld [vmem:[%s7947_s1 + $0x80] sm:$0xff]  }
  0x11   :  { %130 = vst [vmem:[#allocation2 + $0xb9] sm:$0x1] %v7959_v1  ;;  %131 = vst [vmem:[#allocation2 + $0xc9] sm:$0x1] %v7959_v1  ;;  %5687 = vmatpush3.bf16.msra.mxu1 %v6052_v16  ;;  %5624 = vmatprep.subr.bf16.mxu0 %v6053_v17  ;;  %v5578_v33 = vld [vmem:[%s7948_s0] sm:$0xff]   ;;  %v6076_v43 = vld [vmem:[%s7947_s1 + $0x178] sm:$0xff]  }
  0x12   :  { %132 = vst [vmem:[#allocation2 + $0xd9] sm:$0x1] %v7959_v1  ;;  %133 = vst [vmem:[#allocation2 + $0xe9] sm:$0x1] %v7959_v1  ;;  %5688 = vmatprep.subr.bf16.mxu1 %v6054_v18  ;;  %v235_v35 = vld [vmem:[#allocation2 + $0x1] sm:$0xff]  ;;  %v5579_v36 = vunpack.c.l.bf16 %v5578_v33  ;;  %v5580_v40 = vunpack.c.h.bf16 %v5578_v33  ;;  %v5610_v49 = vld [vmem:[%s7948_s0 + $0x10] sm:$0xff]  }
  0x13   :  { %134 = vst [vmem:[#allocation2 + $0xf9] sm:$0x1] %v7959_v1  ;;  %135 = vst [vmem:[#allocation2 + $0x109] sm:$0x1] %v7959_v1  ;;  %v5413_v38 = vpack.c.bf16 %v235_v35, %v235_v35  ;;  %v6069_v39 = vld [vmem:[%s7948_s0] ss:$0 sps:$4 sm:$0xff]   ;;  %v5587_v50 = vunpack.c.l.bf16 %v5610_v49  ;;  %v5588_v53 = vunpack.c.h.bf16 %v5610_v49 }
  0x14   :  { %136 = vst [vmem:[#allocation2 + $0x119] sm:$0x1] %v7959_v1  ;;  %137 = vst [vmem:[#allocation2 + $0x129] sm:$0x1] %v7959_v1  ;;  %5625 = vmatpush3.bf16.msra.mxu0 %v6055_v19  ;;  %v5609_v44 = vld [vmem:[%s7948_s0 + $0x8] sm:$0xff]   ;;  %v5611_v54 = vld [vmem:[%s7948_s0 + $0x18] sm:$0xff]  }
  0x15   :  { %99 = vst [vmem:[#allocation2] sm:$0x1] %v7959_v1  ;;  %119 = vst [vmem:[#allocation2 + $0x9] sm:$0x1] %v7959_v1  ;;  %5689 = vmatpush3.bf16.msra.mxu1 %v6056_v20  ;;  %5626 = vmatprep.subr.bf16.mxu0 %v6057_v21  ;;  %v5583_v45 = vunpack.c.l.bf16 %v5609_v44  ;;  %v6078_v46 = vld [vmem:[%s7948_s0 + $0x4] ss:$0 sps:$4 sm:$0xff]   ;;  %v5584_v48 = vunpack.c.h.bf16 %v5609_v44  ;;  %v5591_v57 = vunpack.c.l.bf16 %v5611_v54  ;;  %v5592_v58 = vunpack.c.h.bf16 %v5611_v54 }
  0x16   :  { %108 = vst [vmem:[#allocation2 + $0x90] sm:$0x1] %v7959_v1  ;;  %109 = vst [vmem:[#allocation2 + $0xa0] sm:$0x1] %v7959_v1  ;;  %5690 = vmatprep.subr.bf16.mxu1 %v6058_v22  ;;  %v6079_v47 = vld [vmem:[%s7948_s0 + $0x8] ss:$0 sps:$4 sm:$0xff]  }
  0x17   :  { %118 = vst [vmem:[#allocation2 + $0x130] sm:$0x1] %v7959_v1  ;;  %128 = vst [vmem:[#allocation2 + $0x99] sm:$0x1] %v7959_v1  ;;  %v6087_v51 = vld [vmem:[%s7948_s0 + $0xc] ss:$0 sps:$4 sm:$0xff]  }
  0x18   :  { %129 = vst [vmem:[#allocation2 + $0xa9] sm:$0x1] %v7959_v1  ;;  %138 = vst [vmem:[#allocation2 + $0x139] sm:$0x1] %v7959_v1  ;;  %5627 = vmatpush3.bf16.msra.mxu0 %v6059_v23  ;;  %v6088_v52 = vld [vmem:[%s7948_s0 + $0x10] ss:$0 sps:$4 sm:$0xff]  }
  0x19   :  { %5691 = vmatpush3.bf16.msra.mxu1 %v6060_v24  ;;  %5628 = vmatprep.subr.bf16.mxu0 %v6061_v25  ;;  %74 = vst [vmem:[#allocation2 + $0x11] sm:$0xff] %v5579_v36  ;;  %315 = vst [vmem:[#allocation3 + $0x4] sm:$0xf] %v5413_v38  ;;  %v6096_v63 = vld [vmem:[%s7948_s0 + $0x14] ss:$0 sps:$4 sm:$0xff]   ;;  %v5612_v12 = vld [vmem:[%s7948_s0 + $0x20] sm:$0xff]  }
  0x1a   :  { %5692 = vmatprep.subr.bf16.mxu1 %v6062_v26  ;;  %316 = vst [vmem:[#allocation3 + $0x28] sm:$0xf] %v6069_v39  ;;  %75 = vst [vmem:[#allocation2 + $0x21] sm:$0xff] %v5580_v40  ;;  %v6097_v3 = vld [vmem:[%s7948_s0 + $0x18] ss:$0 sps:$4 sm:$0xff]   ;;  %v5595_v16 = vunpack.c.l.bf16 %v5612_v12  ;;  %v5596_v17 = vunpack.c.h.bf16 %v5612_v12  ;;  %v243_v23 = vld [vmem:[#allocation2 + $0xa1] sm:$0xff] }
  0x1b   :  { %603 = vst [vmem:[#allocation3 + $0x10] sm:$0xf] %v6069_v39  ;;  %76 = vst [vmem:[#allocation2 + $0x31] sm:$0xff] %v5583_v45  ;;  %v6077_v24 = vld [vmem:[%s7947_s1 + $0x138] sm:$0xff]   ;;  %v6085_v36 = vld [vmem:[%s7947_s1 + $0x170] sm:$0xff]   ;;  %vm3671_vm7 = vcmask 1043968  }
  0x1c   :  { %5629 = vmatpush3.bf16.msra.mxu0 %v6063_v27  ;;  %v139_v34 = vld [vmem:[#allocation2] sm:$0xff]  ;;  %317 = vst [vmem:[#allocation3 + $0x4c] sm:$0xf] %v6078_v46  ;;  %318 = vst [vmem:[#allocation3 + $0x70] sm:$0xf] %v6079_v47  ;;  %v5421_v27 = vpack.c.bf16 %v243_v23, %v243_v23  ;;  %v6095_v54 = vld [vmem:[%s7947_s1 + $0x128] sm:$0xff]  }
  0x1d   :  { %5693 = vmatpush3.bf16.msra.mxu1 %v6064_v28  ;;  %5630 = vmatprep.subr.bf16.mxu0 %v6065_v29  ;;  %v5397_v37 = vpack.c.bf16 %v139_v34, %v139_v34  ;;  %v331_v41 = vld [vmem:[#allocation2 + $0x2] sm:$0xff]  ;;  %77 = vst [vmem:[#allocation2 + $0x41] sm:$0xff] %v5584_v48  ;;  %604 = vst [vmem:[#allocation3 + $0x34] sm:$0xf] %v6078_v46  ;;  %v6105_v28 = vld [vmem:[%s7948_s0 + $0x20] ss:$0 sps:$4 sm:$0xff]  }
  0x1e   :  { %5694 = vmatprep.subr.bf16.mxu1 %v6066_v30  ;;  %v5429_v42 = vpack.c.bf16 %v331_v41, %v331_v41  ;;  %892 = vst [vmem:[#allocation3 + $0x1c] sm:$0xf] %v6078_v46  ;;  %893 = vst [vmem:[#allocation3 + $0x40] sm:$0xf] %v6079_v47  ;;  %v147_v22 = vld [vmem:[#allocation2 + $0xa0] sm:$0xff]  ;;  %vm4913_vm8 = vcmask 58368  }
  0x1f   :  { %219 = vst [vmem:[#allocation3] sm:$0xf] %v5397_v37  ;;  %605 = vst [vmem:[#allocation3 + $0x58] sm:$0xf] %v6079_v47  ;;  %v5405_v26 = vpack.c.bf16 %v147_v22, %v147_v22  ;;  %v339_v29 = vld [vmem:[#allocation2 + $0xa2] sm:$0xff]  ;;  %vm4931_vm9 = vcmask 1024  }
  0x20   :  { %5631 = vmatpush3.bf16.msra.mxu0 %v6067_v31  ;;  %411 = vst [vmem:[#allocation3 + $0x8] sm:$0xf] %v5429_v42  ;;  %78 = vst [vmem:[#allocation2 + $0x51] sm:$0xff] %v5587_v50  ;;  %v140_v55 = vld [vmem:[#allocation2 + $0x10] sm:$0xff]  ;;  %v5437_v33 = vpack.c.bf16 %v339_v29, %v339_v29  ;;  %v6094_v47 = vld [vmem:[%s7947_s1 + $0x168] sm:$0xff]  }
  0x21   :  { %5695 = vmatpush3.bf16.msra.mxu1 %v6068_v32  ;;  %5744 = vmatprep.subr.bf16.mxu0 %v6076_v43  ;;  %319 = vst [vmem:[#allocation3 + $0x94] sm:$0xf] %v6087_v51  ;;  %320 = vst [vmem:[#allocation3 + $0xb8] sm:$0xf] %v6088_v52  ;;  %v332_v56 = vld [vmem:[#allocation2 + $0x12] sm:$0xff]  ;;  %v5398_v59 = vpack.c.bf16 %v140_v55, %v140_v55  ;;  %v428_v61 = vld [vmem:[#allocation2 + $0x20] sm:$0xff] }
  0x22   :  { %79 = vst [vmem:[#allocation2 + $0x61] sm:$0xff] %v5588_v53  ;;  %606 = vst [vmem:[#allocation3 + $0x7c] sm:$0xf] %v6087_v51  ;;  %v5430_v60 = vpack.c.bf16 %v332_v56, %v332_v56  ;;  %v333_v62 = vld [vmem:[#allocation2 + $0x22] sm:$0xff]  ;;  %v5446_v0 = vpack.c.bf16 %v428_v61, %v428_v61  ;;  %v142_v4 = vld [vmem:[#allocation2 + $0x30] sm:$0xff] }
  0x23   :  { %894 = vst [vmem:[#allocation3 + $0x64] sm:$0xf] %v6087_v51  ;;  %895 = vst [vmem:[#allocation3 + $0x88] sm:$0xf] %v6088_v52  ;;  %v5431_v2 = vpack.c.bf16 %v333_v62, %v333_v62  ;;  %v334_v5 = vld [vmem:[#allocation2 + $0x32] sm:$0xff]  ;;  %v5400_v7 = vpack.c.bf16 %v142_v4, %v142_v4  ;;  %v6104_v61 = vld [vmem:[%s7947_s1 + $0x120] sm:$0xff]  }
  0x24   :  { %607 = vst [vmem:[#allocation3 + $0xa0] sm:$0xf] %v6088_v52  ;;  %80 = vst [vmem:[#allocation2 + $0x71] sm:$0xff] %v5591_v57  ;;  %v430_v6 = vld [vmem:[#allocation2 + $0x40] sm:$0xff]  ;;  %v5432_v8 = vpack.c.bf16 %v334_v5, %v334_v5  ;;  %v6086_v42 = vld [vmem:[%s7947_s1 + $0x130] sm:$0xff]  }
  0x25   :  { %81 = vst [vmem:[#allocation2 + $0x81] sm:$0xff] %v5592_v58  ;;  %220 = vst [vmem:[#allocation3 + $0x24] sm:$0xf] %v5398_v59  ;;  %v5448_v9 = vpack.c.bf16 %v430_v6, %v430_v6  ;;  %v335_v10 = vld [vmem:[#allocation2 + $0x42] sm:$0xff]  ;;  %v6080_v44 = vld [vmem:[#allocation3 + $0x4c] ss:$36 sps:$4 sm:$0xff]  }
  0x26   :  { %412 = vst [vmem:[#allocation3 + $0x2c] sm:$0xf] %v5430_v60  ;;  %507 = vst [vmem:[#allocation3 + $0xc] sm:$0xf] %v5398_v59  ;;  %v5433_v11 = vpack.c.bf16 %v335_v10, %v335_v10  ;;  %v6072_v35 = vld [vmem:[#allocation3 + $0x4] ss:$36 sps:$4 sm:$0xff]  }
  0x27   :  { %321 = vst [vmem:[#allocation3 + $0xdc] sm:$0xf] %v6096_v63  ;;  %699 = vst [vmem:[#allocation3 + $0x14] sm:$0xf] %v5430_v60  ;;  %v144_v13 = vld [vmem:[#allocation2 + $0x50] sm:$0xff]  ;;  %2060 = vmatprep.mubr.bf16.mxu0 %v6072_v35  ;;  %v6103_v57 = vld [vmem:[%s7947_s1 + $0x160] sm:$0xff]  }
  0x28   :  { %608 = vst [vmem:[#allocation3 + $0xc4] sm:$0xf] %v6096_v63  ;;  %896 = vst [vmem:[#allocation3 + $0xac] sm:$0xf] %v6096_v63  ;;  %v336_v14 = vld [vmem:[#allocation2 + $0x52] sm:$0xff]  ;;  %v5402_v18 = vpack.c.bf16 %v144_v13, %v144_v13  ;;  %v6126_v22 = vld [vmem:[%s7947_s1 + $0x1e8] sm:$0xff]  }
  0x29   :  { %508 = vst [vmem:[#allocation3 + $0x30] sm:$0xf] %v5446_v0  ;;  %221 = vst [vmem:[#allocation3 + $0x48] sm:$0xf] %v5446_v0  ;;  %v432_v15 = vld [vmem:[#allocation2 + $0x60] sm:$0xff]  ;;  %v5434_v19 = vpack.c.bf16 %v336_v14, %v336_v14  ;;  %v6112_v63 = vld [vmem:[%s7947_s1 + $0x1f8] sm:$0xff]  }
  0x2a   :  { %413 = vst [vmem:[#allocation3 + $0x50] sm:$0xf] %v5431_v2  ;;  %322 = vst [vmem:[#allocation3 + $0x100] sm:$0xf] %v6097_v3  ;;  %v5450_v20 = vpack.c.bf16 %v432_v15, %v432_v15  ;;  %v337_v21 = vld [vmem:[#allocation2 + $0x62] sm:$0xff]  ;;  %5808 = vmatprep.subr.bf16.mxu1 %v6112_v63  ;;  %v6113_v6 = vld [vmem:[%s7947_s1 + $0x118] sm:$0xff]  }
  0x2b   :  { %700 = vst [vmem:[#allocation3 + $0x38] sm:$0xf] %v5431_v2  ;;  %796 = vst [vmem:[#allocation3 + $0x18] sm:$0xf] %v5446_v0  ;;  %v5435_v25 = vpack.c.bf16 %v337_v21, %v337_v21  ;;  %v146_v30 = vld [vmem:[#allocation2 + $0x70] sm:$0xff]  ;;  %v6111_v0 = vld [vmem:[%s7947_s1 + $0x158] sm:$0xff]  }
  0x2c   :  { %897 = vst [vmem:[#allocation3 + $0xd0] sm:$0xf] %v6097_v3  ;;  %609 = vst [vmem:[#allocation3 + $0xe8] sm:$0xf] %v6097_v3  ;;  %v338_v31 = vld [vmem:[#allocation2 + $0x72] sm:$0xff]  ;;  %v434_v32 = vld [vmem:[#allocation2 + $0x80] sm:$0xff]  ;;  %v5404_v37 = vpack.c.bf16 %v146_v30, %v146_v30 }
  0x2d   :  { %222 = vst [vmem:[#allocation3 + $0x6c] sm:$0xf] %v5400_v7  ;;  %414 = vst [vmem:[#allocation3 + $0x74] sm:$0xf] %v5432_v8  ;;  %v6070_v34 = vld [vmem:[#allocation3] ss:$36 sps:$4 sm:$0xff]   ;;  %v5436_v38 = vpack.c.bf16 %v338_v31, %v338_v31  ;;  %v5452_v39 = vpack.c.bf16 %v434_v32, %v434_v32 }
  0x2e   :  { %509 = vst [vmem:[#allocation3 + $0x54] sm:$0xf] %v5400_v7  ;;  %510 = vst [vmem:[#allocation3 + $0x78] sm:$0xf] %v5448_v9  ;;  %v6073_v40 = vld [vmem:[#allocation3 + $0x8] ss:$36 sps:$4 sm:$0xff]   ;;  %2061 = vmatmul.mubr.bf16.vlgmr.msra.gmra.mxu0 %v6070_v34 }
  0x2f   :  { %223 = vst [vmem:[#allocation3 + $0x90] sm:$0xf] %v5448_v9  ;;  %797 = vst [vmem:[#allocation3 + $0x3c] sm:$0xf] %v5400_v7  ;;  %5745 = vmatpush3.bf16.msra.mxu0 %v6077_v24  ;;  %2068 = vmatprep.mubr.bf16.mxu0 %v6080_v44  ;;  %v6089_v53 = vld [vmem:[#allocation3 + $0x94] ss:$36 sps:$4 sm:$0xff]  }
  0x30   :  { %701 = vst [vmem:[#allocation3 + $0x5c] sm:$0xf] %v5432_v8  ;;  %798 = vst [vmem:[#allocation3 + $0x60] sm:$0xf] %v5448_v9  ;;  %v6075_v41 = vld [vmem:[#allocation3 + $0xc] ss:$36 sps:$4 sm:$0xff]   ;;  %5746 = vmatprep.subr.bf16.mxu0 %v6085_v36 }
  0x31   :  { %415 = vst [vmem:[#allocation3 + $0x98] sm:$0xf] %v5433_v11  ;;  %702 = vst [vmem:[#allocation3 + $0x80] sm:$0xf] %v5433_v11  ;;  %v1014_v43 = vld [vmem:[#allocation3 + $0x48] sm:$0xff]  ;;  %2157 = vmatprep.mubr.bf16.mxu1 %v6075_v41  ;;  %v6114_v2 = vld [vmem:[%s7947_s1 + $0x1b8] sm:$0xff]  }
  0x32   :  { %82 = vst [vmem:[#allocation2 + $0xb1] sm:$0xff] %v5595_v16  ;;  %83 = vst [vmem:[#allocation2 + $0xc1] sm:$0xff] %v5596_v17  ;;  %2158 = vmatmul.mubr.bf16.vlgmr.msra.gmra.mxu1 %v6073_v40  ;;  %v6098_v5 = vld [vmem:[#allocation3 + $0xdc] ss:$36 sps:$4 sm:$0xff]   ;;  %v6115_v7 = vld [vmem:[%s7947_s1 + $0x1f0] sm:$0xff]  }
  0x33   :  { %224 = vst [vmem:[#allocation3 + $0xb4] sm:$0xf] %v5402_v18  ;;  %416 = vst [vmem:[#allocation3 + $0xbc] sm:$0xf] %v5434_v19  ;;  %5747 = vmatpush3.bf16.msra.mxu0 %v6086_v42  ;;  %5809 = vmatpush3.bf16.msra.mxu1 %v6114_v2  ;;  %v5613_v8 = vld [vmem:[%s7948_s0 + $0x28] sm:$0xff]  }
  0x34   :  { %511 = vst [vmem:[#allocation3 + $0x9c] sm:$0xf] %v5402_v18  ;;  %512 = vst [vmem:[#allocation3 + $0xc0] sm:$0xf] %v5450_v20  ;;  %v1019_v45 = vld [vmem:[#allocation3 + $0x6c] sm:$0xff]  ;;  %5748 = vmatprep.subr.bf16.mxu0 %v6094_v47  ;;  %v5599_v10 = vunpack.c.l.bf16 %v5613_v8  ;;  %v5600_v12 = vunpack.c.h.bf16 %v5613_v8  ;;  %5810 = vmatprep.subr.bf16.mxu1 %v6115_v7  ;;  %v6150_v8 = vld [vmem:[%s7947_s1 + $0x140] sm:$0xff]  }
  0x35   :  { %225 = vst [vmem:[#allocation3 + $0xd8] sm:$0xf] %v5450_v20  ;;  %799 = vst [vmem:[#allocation3 + $0x84] sm:$0xf] %v5402_v18  ;;  %v6082_v46 = vld [vmem:[#allocation3 + $0x54] ss:$36 sps:$4 sm:$0xff]   ;;  %v5090_v52 = vcombine.low %v1014_v43, %v1019_v45 }
  0x36   :  { %703 = vst [vmem:[#allocation3 + $0xa4] sm:$0xf] %v5434_v19  ;;  %800 = vst [vmem:[#allocation3 + $0xa8] sm:$0xf] %v5450_v20  ;;  %2165 = vmatprep.mubr.bf16.mxu1 %v6082_v46  ;;  %v6084_v56 = vld [vmem:[#allocation3 + $0x50] ss:$36 sps:$4 sm:$0xff]  }
  0x37   :  { %417 = vst [vmem:[#allocation3 + $0xe0] sm:$0xf] %v5435_v25  ;;  %227 = vst [vmem:[#allocation3 + $0x120] sm:$0xf] %v5405_v26  ;;  %v1024_v59 = vld [vmem:[#allocation3 + $0x90] sm:$0xff]  ;;  %2069 = vmatmul.mubr.bf16.gmra.mxu0 %v5090_v52  ;;  %v6128_v26 = vld [vmem:[%s7947_s1 + $0x1e0] sm:$0xff]  }
  0x38   :  { %323 = vst [vmem:[#allocation3 + $0x124] sm:$0xf] %v5421_v27  ;;  %324 = vst [vmem:[#allocation3 + $0x148] sm:$0xf] %v6105_v28  ;;  %2076 = vmatprep.mubr.bf16.mxu0 %v6089_v53  ;;  %5749 = vmatpush3.bf16.msra.mxu0 %v6095_v54  ;;  %v6116_v9 = vld [vmem:[%s7948_s0 + $0x24] ss:$0 sps:$4 sm:$0xff]  }
  0x39   :  { %704 = vst [vmem:[#allocation3 + $0xc8] sm:$0xf] %v5435_v25  ;;  %611 = vst [vmem:[#allocation3 + $0x130] sm:$0xf] %v6105_v28  ;;  %v148_v48 = vld [vmem:[#allocation2 + $0xb0] sm:$0xff]  ;;  %v436_v55 = vld [vmem:[#allocation2 + $0xc0] sm:$0xff]  ;;  %5750 = vmatprep.subr.bf16.mxu0 %v6103_v57 }
  0x3a   :  { %419 = vst [vmem:[#allocation3 + $0x128] sm:$0xf] %v5437_v33  ;;  %226 = vst [vmem:[#allocation3 + $0xfc] sm:$0xf] %v5404_v37  ;;  %v340_v49 = vld [vmem:[#allocation2 + $0xb2] sm:$0xff]  ;;  %v5406_v50 = vpack.c.bf16 %v148_v48, %v148_v48  ;;  %v5454_v58 = vpack.c.bf16 %v436_v55, %v436_v55  ;;  %2166 = vmatmul.mubr.bf16.gmra.mxu1 %v6084_v56  ;;  %v341_v13 = vld [vmem:[#allocation2 + $0xc2] sm:$0xff] }
  0x3b   :  { %418 = vst [vmem:[#allocation3 + $0x104] sm:$0xf] %v5436_v38  ;;  %513 = vst [vmem:[#allocation3 + $0xe4] sm:$0xf] %v5404_v37  ;;  %v5438_v51 = vpack.c.bf16 %v340_v49, %v340_v49  ;;  %v6091_v60 = vld [vmem:[#allocation3 + $0x9c] ss:$36 sps:$4 sm:$0xff]   ;;  %v5439_v17 = vpack.c.bf16 %v341_v13, %v341_v13 }
  0x3c   :  { %514 = vst [vmem:[#allocation3 + $0x108] sm:$0xf] %v5452_v39  ;;  %801 = vst [vmem:[#allocation3 + $0xcc] sm:$0xf] %v5404_v37  ;;  %v1029_v62 = vld [vmem:[#allocation3 + $0xb4] sm:$0xff]  ;;  %2173 = vmatprep.mubr.bf16.mxu1 %v6091_v60  ;;  %5751 = vmatpush3.bf16.msra.mxu0 %v6104_v61  ;;  %v6127_v25 = vld [vmem:[%s7947_s1 + $0x1a8] sm:$0xff]  }
  0x3d   :  { %705 = vst [vmem:[#allocation3 + $0xec] sm:$0xf] %v5436_v38  ;;  %802 = vst [vmem:[#allocation3 + $0xf0] sm:$0xf] %v5452_v39  ;;  %v5099_v3 = vcombine.low %v1024_v59, %v1029_v62  ;;  %v6093_v4 = vld [vmem:[#allocation3 + $0x98] ss:$36 sps:$4 sm:$0xff]   ;;  %5752 = vmatprep.subr.bf16.mxu0 %v6111_v0 }
  0x3e   :  { %228 = vst [vmem:[#allocation3 + $0x144] sm:$0xf] %v5406_v50  ;;  %420 = vst [vmem:[#allocation3 + $0x14c] sm:$0xf] %v5438_v51  ;;  %v6117_v11 = vld [vmem:[%s7948_s0 + $0x28] ss:$0 sps:$4 sm:$0xff]  }
  0x3f   :  { %515 = vst [vmem:[#allocation3 + $0x12c] sm:$0xf] %v5406_v50  ;;  %707 = vst [vmem:[#allocation3 + $0x134] sm:$0xf] %v5438_v51  ;;  %v1034_v14 = vld [vmem:[#allocation3 + $0xd8] sm:$0xff]  ;;  %2077 = vmatmul.mubr.bf16.gmra.mxu0 %v5099_v3  ;;  %v6122_v18 = vld [vmem:[%s7947_s1 + $0x1b0] sm:$0xff]  }
  0x40   :  { %516 = vst [vmem:[#allocation3 + $0x150] sm:$0xf] %v5454_v58  ;;  %229 = vst [vmem:[#allocation3 + $0x168] sm:$0xf] %v5454_v58  ;;  %2084 = vmatprep.mubr.bf16.mxu0 %v6098_v5  ;;  %5753 = vmatpush3.bf16.msra.mxu0 %v6113_v6  ;;  %v6124_v19 = vld [vmem:[%s7947_s1 + $0x150] sm:$0xff]   ;;  %v1044_v33 = vld [vmem:[#allocation3 + $0x120] sm:$0xff] }
  0x41   :  { %804 = vst [vmem:[#allocation3 + $0x138] sm:$0xf] %v5454_v58  ;;  %v1039_v15 = vld [vmem:[#allocation3 + $0xfc] sm:$0xff]  ;;  %325 = vst [vmem:[#allocation3 + $0x16c] sm:$0xf] %v6116_v9  ;;  %v6125_v20 = vld [vmem:[%s7947_s1 + $0x110] sm:$0xff]   ;;  %5811 = vmatpush3.bf16.msra.mxu1 %v6122_v18  ;;  %5754 = vmatprep.subr.bf16.mxu0 %v6124_v19 }
  0x42   :  { %612 = vst [vmem:[#allocation3 + $0x154] sm:$0xf] %v6116_v9  ;;  %900 = vst [vmem:[#allocation3 + $0x13c] sm:$0xf] %v6116_v9  ;;  %2174 = vmatmul.mubr.bf16.gmra.mxu1 %v6093_v4  ;;  %v6106_v21 = vld [vmem:[#allocation3 + $0x124] ss:$36 sps:$4 sm:$0xff]   ;;  %v5108_v23 = vcombine.low %v1034_v14, %v1039_v15  ;;  %5812 = vmatprep.subr.bf16.mxu1 %v6126_v22 }
  0x43   :  { %v6100_v16 = vld [vmem:[#allocation3 + $0xe4] ss:$36 sps:$4 sm:$0xff]   ;;  %84 = vst [vmem:[#allocation2 + $0xd1] sm:$0xff] %v5599_v10  ;;  %326 = vst [vmem:[#allocation3 + $0x190] sm:$0xf] %v6117_v11  ;;  %v5614_v27 = vld [vmem:[%s7948_s0 + $0x30] sm:$0xff]  }
  0x44   :  { %85 = vst [vmem:[#allocation2 + $0xe1] sm:$0xff] %v5600_v12  ;;  %901 = vst [vmem:[#allocation3 + $0x160] sm:$0xf] %v6117_v11  ;;  %2181 = vmatprep.mubr.bf16.mxu1 %v6100_v16  ;;  %v6102_v24 = vld [vmem:[#allocation3 + $0xe0] ss:$36 sps:$4 sm:$0xff]   ;;  %5755 = vmatpush3.bf16.msra.mxu0 %v6125_v20  ;;  %v5603_v29 = vunpack.c.l.bf16 %v5614_v27  ;;  %v5604_v32 = vunpack.c.h.bf16 %v5614_v27  ;;  %v6137_v44 = vld [vmem:[%s7947_s1 + $0x148] sm:$0xff]  }
  0x45   :  { %613 = vst [vmem:[#allocation3 + $0x178] sm:$0xf] %v6117_v11  ;;  %421 = vst [vmem:[#allocation3 + $0x170] sm:$0xf] %v5439_v17  ;;  %v6129_v30 = vld [vmem:[%s7948_s0 + $0x2c] ss:$0 sps:$4 sm:$0xff]   ;;  %5813 = vmatpush3.bf16.msra.mxu1 %v6127_v25  ;;  %5756 = vmatprep.subr.bf16.mxu0 %v6137_v44 }
  0x46   :  { %708 = vst [vmem:[#allocation3 + $0x158] sm:$0xf] %v5439_v17  ;;  %v6130_v31 = vld [vmem:[%s7948_s0 + $0x30] ss:$0 sps:$4 sm:$0xff]   ;;  %v1049_v34 = vld [vmem:[#allocation3 + $0x144] sm:$0xff]  ;;  %5814 = vmatprep.subr.bf16.mxu1 %v6128_v26  ;;  %86 = vst [vmem:[#allocation2 + $0xf1] sm:$0xff] %v5603_v29 }
  0x47   :  { %v6108_v28 = vld [vmem:[#allocation3 + $0x12c] ss:$36 sps:$4 sm:$0xff]   ;;  %2085 = vmatmul.mubr.bf16.gmra.mxu0 %v5108_v23  ;;  %327 = vst [vmem:[#allocation3 + $0x1b4] sm:$0xf] %v6129_v30  ;;  %328 = vst [vmem:[#allocation3 + $0x1d8] sm:$0xf] %v6130_v31  ;;  %v5117_v46 = vcombine.low %v1044_v33, %v1049_v34 }
  0x48   :  { %87 = vst [vmem:[#allocation2 + $0x101] sm:$0xff] %v5604_v32  ;;  %614 = vst [vmem:[#allocation3 + $0x19c] sm:$0xf] %v6129_v30  ;;  %2092 = vmatprep.mubr.bf16.mxu0 %v6106_v21  ;;  %v6135_v43 = vld [vmem:[%s7947_s1 + $0x1a0] sm:$0xff]   ;;  %v6138_v45 = vld [vmem:[%s7947_s1 + $0x108] sm:$0xff]  }
  0x49   :  { %902 = vst [vmem:[#allocation3 + $0x184] sm:$0xf] %v6129_v30  ;;  %903 = vst [vmem:[#allocation3 + $0x1a8] sm:$0xf] %v6130_v31  ;;  %5815 = vmatpush3.bf16.msra.mxu1 %v6135_v43  ;;  %v6110_v47 = vld [vmem:[#allocation3 + $0x128] ss:$36 sps:$4 sm:$0xff]   ;;  %5757 = vmatpush3.bf16.msra.mxu0 %v6138_v45 }
  0x4a   :  { %v150_v35 = vld [vmem:[#allocation2 + $0xd0] sm:$0xff]  ;;  %615 = vst [vmem:[#allocation3 + $0x1c0] sm:$0xf] %v6130_v31  ;;  %2182 = vmatmul.mubr.bf16.gmra.mxu1 %v6102_v24  ;;  %v6139_v48 = vld [vmem:[%s7947_s1 + $0x1d8] sm:$0xff]   ;;  %v1054_v53 = vld [vmem:[#allocation3 + $0x168] sm:$0xff]  ;;  %5758 = vmatprep.subr.bf16.mxu0 %v6150_v8 }
  0x4b   :  { %v342_v36 = vld [vmem:[#allocation2 + $0xd2] sm:$0xff]  ;;  %v438_v37 = vld [vmem:[#allocation2 + $0xe0] sm:$0xff]  ;;  %v5408_v38 = vpack.c.bf16 %v150_v35, %v150_v35  ;;  %2189 = vmatprep.mubr.bf16.mxu1 %v6108_v28  ;;  %5816 = vmatprep.subr.bf16.mxu1 %v6139_v48  ;;  %v6152_v10 = vld [vmem:[%s7947_s1 + $0x1c8] sm:$0xff]  }
  0x4c   :  { %v5440_v39 = vpack.c.bf16 %v342_v36, %v342_v36  ;;  %v5456_v40 = vpack.c.bf16 %v438_v37, %v438_v37  ;;  %v343_v41 = vld [vmem:[#allocation2 + $0xe2] sm:$0xff]  ;;  %v6140_v49 = vld [vmem:[%s7947_s1 + $0x198] sm:$0xff]   ;;  %v6141_v50 = vld [vmem:[%s7947_s1 + $0x1d0] sm:$0xff]  }
  0x4d   :  { %v5441_v42 = vpack.c.bf16 %v343_v41, %v343_v41  ;;  %230 = vst [vmem:[#allocation3 + $0x18c] sm:$0xf] %v5408_v38  ;;  %517 = vst [vmem:[#allocation3 + $0x174] sm:$0xf] %v5408_v38  ;;  %v5615_v51 = vld [vmem:[%s7948_s0 + $0x38] sm:$0xff]   ;;  %v152_v54 = vld [vmem:[#allocation2 + $0xf0] sm:$0xff]  ;;  %5817 = vmatpush3.bf16.msra.mxu1 %v6140_v49 }
  0x4e   :  { %422 = vst [vmem:[#allocation3 + $0x194] sm:$0xf] %v5440_v39  ;;  %518 = vst [vmem:[#allocation3 + $0x198] sm:$0xf] %v5456_v40  ;;  %v6142_v52 = vld [vmem:[%s7948_s0 + $0x34] ss:$0 sps:$4 sm:$0xff]   ;;  %v5607_v57 = vunpack.c.l.bf16 %v5615_v51  ;;  %v5608_v58 = vunpack.c.h.bf16 %v5615_v51  ;;  %v5410_v59 = vpack.c.bf16 %v152_v54, %v152_v54  ;;  %5818 = vmatprep.subr.bf16.mxu1 %v6141_v50 }
  0x4f   :  { %231 = vst [vmem:[#allocation3 + $0x1b0] sm:$0xf] %v5456_v40  ;;  %805 = vst [vmem:[#allocation3 + $0x15c] sm:$0xf] %v5408_v38  ;;  %v344_v55 = vld [vmem:[#allocation2 + $0xf2] sm:$0xff]  ;;  %v440_v56 = vld [vmem:[#allocation2 + $0x100] sm:$0xff]  ;;  %2093 = vmatmul.mubr.bf16.gmra.mxu0 %v5117_v46 }
  0x50   :  { %709 = vst [vmem:[#allocation3 + $0x17c] sm:$0xf] %v5440_v39  ;;  %806 = vst [vmem:[#allocation3 + $0x180] sm:$0xf] %v5456_v40  ;;  %v5442_v60 = vpack.c.bf16 %v344_v55, %v344_v55  ;;  %v5458_v61 = vpack.c.bf16 %v440_v56, %v440_v56  ;;  %v6143_v62 = vld [vmem:[%s7948_s0 + $0x38] ss:$0 sps:$4 sm:$0xff]  }
  0x51   :  { %423 = vst [vmem:[#allocation3 + $0x1b8] sm:$0xf] %v5441_v42  ;;  %710 = vst [vmem:[#allocation3 + $0x1a0] sm:$0xf] %v5441_v42  ;;  %v345_v63 = vld [vmem:[#allocation2 + $0x102] sm:$0xff]  ;;  %v6148_v5 = vld [vmem:[%s7947_s1 + $0x190] sm:$0xff]  }
  0x52   :  { %998 = vst [vmem:[#allocation3 + $0x188] sm:$0xf] %v5441_v42  ;;  %329 = vst [vmem:[#allocation3 + $0x1fc] sm:$0xf] %v6142_v52  ;;  %v6118_v2 = vld [vmem:[#allocation3 + $0x16c] ss:$36 sps:$4 sm:$0xff]   ;;  %v5443_v3 = vpack.c.bf16 %v345_v63, %v345_v63  ;;  %2190 = vmatmul.mubr.bf16.gmra.mxu1 %v6110_v47 }
  0x53   :  { %616 = vst [vmem:[#allocation3 + $0x1e4] sm:$0xf] %v6142_v52  ;;  %904 = vst [vmem:[#allocation3 + $0x1cc] sm:$0xf] %v6142_v52  ;;  %2100 = vmatprep.mubr.bf16.mxu0 %v6118_v2  ;;  %5819 = vmatpush3.bf16.msra.mxu1 %v6148_v5  ;;  %v6151_v9 = vld [vmem:[%s7947_s1 + $0x100] sm:$0xff]   ;;  %v6153_v12 = vld [vmem:[%s7947_s1 + $0x188] sm:$0xff]  }
  0x54   :  { %v1059_v0 = vld [vmem:[#allocation3 + $0x18c] sm:$0xff]  ;;  %88 = vst [vmem:[#allocation2 + $0x111] sm:$0xff] %v5607_v57  ;;  %89 = vst [vmem:[#allocation2 + $0x121] sm:$0xff] %v5608_v58  ;;  %5759 = vmatpush3.bf16.msra.mxu0 %v6151_v9  ;;  %5820 = vmatprep.subr.bf16.mxu1 %v6152_v10  ;;  %v6131_v17 = vld [vmem:[#allocation3 + $0x1b4] ss:$36 sps:$4 sm:$0xff]  }
  0x55   :  { %v6120_v4 = vld [vmem:[#allocation3 + $0x174] ss:$36 sps:$4 sm:$0xff]   ;;  %232 = vst [vmem:[#allocation3 + $0x1d4] sm:$0xf] %v5410_v59  ;;  %424 = vst [vmem:[#allocation3 + $0x1dc] sm:$0xf] %v5442_v60  ;;  %v5126_v6 = vcombine.low %v1054_v53, %v1059_v0 }
  0x56   :  { %519 = vst [vmem:[#allocation3 + $0x1bc] sm:$0xf] %v5410_v59  ;;  %520 = vst [vmem:[#allocation3 + $0x1e0] sm:$0xf] %v5458_v61  ;;  %2197 = vmatprep.mubr.bf16.mxu1 %v6120_v4  ;;  %v6123_v7 = vld [vmem:[#allocation3 + $0x170] ss:$36 sps:$4 sm:$0xff]  }
  0x57   :  { %233 = vst [vmem:[#allocation3 + $0x1f8] sm:$0xf] %v5458_v61  ;;  %330 = vst [vmem:[#allocation3 + $0x220] sm:$0xf] %v6143_v62  ;;  %v1064_v11 = vld [vmem:[#allocation3 + $0x1b0] sm:$0xff]  ;;  %2101 = vmatmul.mubr.bf16.gmra.mxu0 %v5126_v6  ;;  %5821 = vmatpush3.bf16.msra.mxu1 %v6153_v12  ;;  %v6154_v23 = vld [vmem:[%s7947_s1 + $0x1c0] sm:$0xff]  }
  0x58   :  { %807 = vst [vmem:[#allocation3 + $0x1a4] sm:$0xf] %v5410_v59  ;;  %711 = vst [vmem:[#allocation3 + $0x1c4] sm:$0xf] %v5442_v60  ;;  %2108 = vmatprep.mubr.bf16.mxu0 %v6131_v17  ;;  %5822 = vmatprep.subr.bf16.mxu1 %v6154_v23  ;;  %v6158_v25 = vld [vmem:[%s7947_s1 + $0x180] sm:$0xff]   ;;  %v6159_v26 = vld [vmem:[%s7947_s1 + $0x238] sm:$0xff]  }
  0x59   :  { %808 = vst [vmem:[#allocation3 + $0x1c8] sm:$0xf] %v5458_v61  ;;  %905 = vst [vmem:[#allocation3 + $0x1f0] sm:$0xf] %v6143_v62  ;;  %5985 = vmatprep.subr.bf16.mxu0 %v6159_v26  ;;  %v6157_v32 = vld [vmem:[#allocation3 + $0x14] ss:$36 sps:$4 sm:$0xff]  }
  0x5a   :  { %617 = vst [vmem:[#allocation3 + $0x208] sm:$0xf] %v6143_v62  ;;  %999 = vst [vmem:[#allocation3 + $0x1ac] sm:$0xf] %v5442_v60  ;;  %2198 = vmatmul.mubr.bf16.gmra.mxu1 %v6123_v7  ;;  %v6162_v34 = vld [vmem:[#allocation3 + $0x1c] ss:$36 sps:$4 sm:$0xff]  }
  0x5b   :  { %425 = vst [vmem:[#allocation3 + $0x200] sm:$0xf] %v5443_v3  ;;  %712 = vst [vmem:[#allocation3 + $0x1e8] sm:$0xf] %v5443_v3  ;;  %v154_v13 = vld [vmem:[#allocation2 + $0x110] sm:$0xff]  ;;  %v442_v15 = vld [vmem:[#allocation2 + $0x120] sm:$0xff]  ;;  %5823 = vmatpush3.bf16.msra.mxu1 %v6158_v25 }
  0x5c   :  { %1000 = vst [vmem:[#allocation3 + $0x1d0] sm:$0xf] %v5443_v3  ;;  %v346_v14 = vld [vmem:[#allocation2 + $0x112] sm:$0xff]  ;;  %v5412_v18 = vpack.c.bf16 %v154_v13, %v154_v13  ;;  %v5460_v20 = vpack.c.bf16 %v442_v15, %v442_v15  ;;  %v6177_v36 = vld [vmem:[%s7948_s0 + $0x1c] ss:$0 sps:$4 sm:$0xff]   ;;  %v626_v37 = vld [vmem:[#allocation2 + $0x82] sm:$0xff] }
  0x5d   :  { %v1069_v16 = vld [vmem:[#allocation3 + $0x1d4] sm:$0xff]  ;;  %v5444_v19 = vpack.c.bf16 %v346_v14, %v346_v14  ;;  %v6133_v21 = vld [vmem:[#allocation3 + $0x1bc] ss:$36 sps:$4 sm:$0xff]   ;;  %v5484_v38 = vpack.c.bf16 %v626_v37, %v626_v37  ;;  %610 = vst [vmem:[#allocation3 + $0x10c] sm:$0xf] %v6177_v36  ;;  %v6173_v47 = vld [vmem:[%s7947_s1 + $0x228] sm:$0xff]  }
  0x5e   :  { %234 = vst [vmem:[#allocation3 + $0x21c] sm:$0xf] %v5412_v18  ;;  %521 = vst [vmem:[#allocation3 + $0x204] sm:$0xf] %v5412_v18  ;;  %2205 = vmatprep.mubr.bf16.mxu1 %v6133_v21  ;;  %v5135_v22 = vcombine.low %v1064_v11, %v1069_v16  ;;  %v6136_v24 = vld [vmem:[#allocation3 + $0x1b8] ss:$36 sps:$4 sm:$0xff]  }
  0x5f   :  { %426 = vst [vmem:[#allocation3 + $0x224] sm:$0xf] %v5444_v19  ;;  %522 = vst [vmem:[#allocation3 + $0x228] sm:$0xf] %v5460_v20  ;;  %v1074_v27 = vld [vmem:[#allocation3 + $0x1f8] sm:$0xff]  ;;  %v723_v40 = vld [vmem:[#allocation2 + $0x90] sm:$0xff] }
  0x60   :  { %809 = vst [vmem:[#allocation3 + $0x1ec] sm:$0xf] %v5412_v18  ;;  %713 = vst [vmem:[#allocation3 + $0x20c] sm:$0xf] %v5444_v19  ;;  %2109 = vmatmul.mubr.bf16.gmra.mxu0 %v5135_v22  ;;  %v6144_v29 = vld [vmem:[#allocation3 + $0x1fc] ss:$36 sps:$4 sm:$0xff]   ;;  %v5500_v43 = vpack.c.bf16 %v723_v40, %v723_v40 }
  0x61   :  { %810 = vst [vmem:[#allocation3 + $0x210] sm:$0xf] %v5460_v20  ;;  %1001 = vst [vmem:[#allocation3 + $0x1f4] sm:$0xf] %v5444_v19  ;;  %2116 = vmatprep.mubr.bf16.mxu0 %v6144_v29  ;;  %v6155_v35 = vld [vmem:[#allocation3 + $0x10] ss:$36 sps:$4 sm:$0xff]  }
  0x62   :  { %2206 = vmatmul.mubr.bf16.gmra.mxu1 %v6136_v24  ;;  %v6160_v39 = vld [vmem:[#allocation3 + $0x18] ss:$36 sps:$4 sm:$0xff]   ;;  %898 = vst [vmem:[#allocation3 + $0xf4] sm:$0xf] %v6177_v36  ;;  %706 = vst [vmem:[#allocation3 + $0x110] sm:$0xf] %v5484_v38 }
  0x63   :  { %v819_v41 = vld [vmem:[#allocation2 + $0x91] sm:$0xff]  ;;  %v6163_v42 = vld [vmem:[#allocation3 + $0x5c] ss:$36 sps:$4 sm:$0xff]   ;;  %994 = vst [vmem:[#allocation3 + $0xf8] sm:$0xf] %v5484_v38  ;;  %v6202_v21 = vld [vmem:[%s7947_s1 + $0x208] sm:$0xff]  }
  0x64   :  { %v5516_v44 = vpack.c.bf16 %v819_v41, %v819_v41  ;;  %v6166_v45 = vld [vmem:[%s7947_s1 + $0x230] sm:$0xff]   ;;  %v6167_v46 = vld [vmem:[#allocation3 + $0x64] ss:$36 sps:$4 sm:$0xff]   ;;  %803 = vst [vmem:[#allocation3 + $0x114] sm:$0xf] %v5500_v43  ;;  %v6188_v54 = vld [vmem:[%s7947_s1 + $0x218] sm:$0xff]  }
  0x65   :  { %v1079_v28 = vld [vmem:[#allocation3 + $0x21c] sm:$0xff]  ;;  %v6170_v49 = vld [vmem:[#allocation3 + $0xa4] ss:$36 sps:$4 sm:$0xff]   ;;  %v6174_v52 = vld [vmem:[#allocation3 + $0xac] ss:$36 sps:$4 sm:$0xff]  }
  0x66   :  { %v6146_v30 = vld [vmem:[#allocation3 + $0x204] ss:$36 sps:$4 sm:$0xff]   ;;  %v5144_v31 = vcombine.low %v1074_v27, %v1079_v28  ;;  %899 = vst [vmem:[#allocation3 + $0x118] sm:$0xf] %v5516_v44  ;;  %v6165_v48 = vld [vmem:[#allocation3 + $0x58] ss:$36 sps:$4 sm:$0xff]  }
  0x67   :  { %2213 = vmatprep.mubr.bf16.mxu1 %v6146_v30  ;;  %v6149_v33 = vld [vmem:[#allocation3 + $0x200] ss:$36 sps:$4 sm:$0xff]   ;;  %v6206_v55 = vld [vmem:[%s7948_s0 + $0x3c] ss:$0 sps:$4 sm:$0xff]   ;;  %v6176_v58 = vld [vmem:[#allocation3 + $0xa8] ss:$36 sps:$4 sm:$0xff]  }
  0x68   :  { %2117 = vmatmul.mubr.bf16.gmra.mxu0 %v5144_v31  ;;  %v6169_v50 = vld [vmem:[#allocation3 + $0x60] ss:$36 sps:$4 sm:$0xff]   ;;  %v6195_v60 = vld [vmem:[%s7947_s1 + $0x210] sm:$0xff]   ;;  %618 = vst [vmem:[#allocation3 + $0x22c] sm:$0xf] %v6206_v55 }
  0x69   :  { %2254 = vmatprep.mubr.bf16.mxu0 %v6157_v32  ;;  %v6181_v51 = vld [vmem:[%s7947_s1 + $0x220] sm:$0xff]   ;;  %v6178_v59 = vld [vmem:[#allocation3 + $0xec] ss:$36 sps:$4 sm:$0xff]   ;;  %906 = vst [vmem:[#allocation3 + $0x214] sm:$0xf] %v6206_v55 }
  0x6a   :  { %2214 = vmatmul.mubr.bf16.gmra.mxu1 %v6149_v33  ;;  %v6172_v53 = vld [vmem:[#allocation3 + $0xa0] ss:$36 sps:$4 sm:$0xff]   ;;  %v731_v61 = vld [vmem:[#allocation2 + $0x130] sm:$0xff]  ;;  %v6180_v24 = vld [vmem:[#allocation3 + $0xe8] ss:$36 sps:$4 sm:$0xff]  }
  0x6b   :  { %2351 = vmatprep.mubr.bf16.mxu1 %v6162_v34  ;;  %v634_v56 = vld [vmem:[#allocation2 + $0x122] sm:$0xff]  ;;  %v827_v62 = vld [vmem:[#allocation2 + $0x131] sm:$0xff]  ;;  %v5508_v0 = vpack.c.bf16 %v731_v61, %v731_v61 }
  0x6c   :  { %v5492_v57 = vpack.c.bf16 %v634_v56, %v634_v56  ;;  %v5524_v2 = vpack.c.bf16 %v827_v62, %v827_v62  ;;  %v908_v3 = vld [vmem:[#allocation2 + $0x22] sm:$0xff]  ;;  %v909_v4 = vld [vmem:[#allocation2 + $0x32] sm:$0xff] }
  0x6d   :  { %v6182_v63 = vld [vmem:[#allocation3 + $0xf4] ss:$36 sps:$4 sm:$0xff]   ;;  %v910_v5 = vld [vmem:[#allocation2 + $0x42] sm:$0xff]  ;;  %v5525_v6 = vpack.c.bf16 %v908_v3, %v908_v3  ;;  %v5526_v7 = vpack.c.bf16 %v909_v4, %v909_v4  ;;  %811 = vst [vmem:[#allocation3 + $0x234] sm:$0xf] %v5508_v0 }
  0x6e   :  { %714 = vst [vmem:[#allocation3 + $0x230] sm:$0xf] %v5492_v57  ;;  %1002 = vst [vmem:[#allocation3 + $0x218] sm:$0xf] %v5492_v57  ;;  %v911_v8 = vld [vmem:[#allocation2 + $0x52] sm:$0xff]  ;;  %v5527_v9 = vpack.c.bf16 %v910_v5, %v910_v5  ;;  %v912_v10 = vld [vmem:[#allocation2 + $0x62] sm:$0xff] }
  0x6f   :  { %v913_v11 = vld [vmem:[#allocation2 + $0x72] sm:$0xff]  ;;  %907 = vst [vmem:[#allocation3 + $0x238] sm:$0xf] %v5524_v2  ;;  %v5528_v12 = vpack.c.bf16 %v911_v8, %v911_v8  ;;  %v5529_v13 = vpack.c.bf16 %v912_v10, %v912_v10  ;;  %v916_v16 = vld [vmem:[#allocation2 + $0xc2] sm:$0xff]  ;;  %988 = vst [vmem:[#allocation3 + $0x20] sm:$0xf] %v5525_v6 }
  0x70   :  { %2255 = vmatmul.mubr.bf16.vlgmr.msra.gmra.mxu0 %v6155_v35  ;;  %v5530_v14 = vpack.c.bf16 %v913_v11, %v913_v11  ;;  %v915_v15 = vld [vmem:[#allocation2 + $0x92] sm:$0xff]  ;;  %989 = vst [vmem:[#allocation3 + $0x44] sm:$0xf] %v5526_v7  ;;  %990 = vst [vmem:[#allocation3 + $0x68] sm:$0xf] %v5527_v9  ;;  %v5533_v19 = vpack.c.bf16 %v916_v16, %v916_v16  ;;  %v6210_v27 = vld [vmem:[%s7947_s1 + $0x200] sm:$0xff]  }
  0x71   :  { %5986 = vmatpush3.bf16.msra.mxu0 %v6159_v26  ;;  %2262 = vmatprep.mubr.bf16.mxu0 %v6163_v42  ;;  %v5532_v17 = vpack.c.bf16 %v915_v15, %v915_v15  ;;  %v917_v18 = vld [vmem:[#allocation2 + $0xd2] sm:$0xff]  ;;  %991 = vst [vmem:[#allocation3 + $0x8c] sm:$0xf] %v5528_v12  ;;  %992 = vst [vmem:[#allocation3 + $0xb0] sm:$0xf] %v5529_v13 }
  0x72   :  { %2352 = vmatmul.mubr.bf16.vlgmr.msra.gmra.mxu1 %v6160_v39  ;;  %5987 = vmatprep.subr.bf16.mxu0 %v6166_v45  ;;  %993 = vst [vmem:[#allocation3 + $0xd4] sm:$0xf] %v5530_v14  ;;  %v5534_v20 = vpack.c.bf16 %v917_v18, %v917_v18  ;;  %996 = vst [vmem:[#allocation3 + $0x140] sm:$0xf] %v5533_v19  ;;  %v923_v22 = vld [vmem:[#allocation2 + $0x132] sm:$0xff] }
  0x73   :  { %2359 = vmatprep.mubr.bf16.mxu1 %v6167_v46  ;;  %995 = vst [vmem:[#allocation3 + $0x11c] sm:$0xf] %v5532_v17  ;;  %v5540_v23 = vpack.c.bf16 %v923_v22, %v923_v22  ;;  %v6185_v25 = vld [vmem:[#allocation3 + $0x134] ss:$36 sps:$4 sm:$0xff]   ;;  %v6189_v28 = vld [vmem:[#allocation3 + $0x13c] ss:$36 sps:$4 sm:$0xff]  }
  0x74   :  { %997 = vst [vmem:[#allocation3 + $0x164] sm:$0xf] %v5534_v20  ;;  %v6184_v26 = vld [vmem:[#allocation3 + $0xf0] ss:$36 sps:$4 sm:$0xff]   ;;  %v6192_v30 = vld [vmem:[#allocation3 + $0x17c] ss:$36 sps:$4 sm:$0xff]  }
  0x75   :  { %5988 = vmatpush3.bf16.msra.mxu0 %v6166_v45  ;;  %1003 = vst [vmem:[#allocation3 + $0x23c] sm:$0xf] %v5540_v23  ;;  %v6187_v29 = vld [vmem:[#allocation3 + $0x130] ss:$36 sps:$4 sm:$0xff]   ;;  %v6191_v31 = vld [vmem:[#allocation3 + $0x138] ss:$36 sps:$4 sm:$0xff]  }
  0x76   :  { %5989 = vmatprep.subr.bf16.mxu0 %v6173_v47  ;;  %v6196_v32 = vld [vmem:[#allocation3 + $0x184] ss:$36 sps:$4 sm:$0xff]   ;;  %v6194_v33 = vld [vmem:[#allocation3 + $0x178] ss:$36 sps:$4 sm:$0xff]   ;;  %v6203_v36 = vld [vmem:[#allocation3 + $0x1cc] ss:$36 sps:$4 sm:$0xff]  }
  0x77   :  { %v6199_v34 = vld [vmem:[#allocation3 + $0x1c4] ss:$36 sps:$4 sm:$0xff]   ;;  %v6207_v38 = vld [vmem:[#allocation3 + $0x20c] ss:$36 sps:$4 sm:$0xff]   ;;  %v6211_v40 = vld [vmem:[#allocation3 + $0x214] ss:$36 sps:$4 sm:$0xff]  }
  0x78   :  { %2263 = vmatmul.mubr.bf16.gmra.mxu0 %v6165_v48  ;;  %v6198_v35 = vld [vmem:[#allocation3 + $0x180] ss:$36 sps:$4 sm:$0xff]   ;;  %v6205_v39 = vld [vmem:[#allocation3 + $0x1c8] ss:$36 sps:$4 sm:$0xff]   ;;  %v6213_v43 = vld [vmem:[#allocation3 + $0x210] ss:$36 sps:$4 sm:$0xff]  }
  0x79   :  { %2270 = vmatprep.mubr.bf16.mxu0 %v6170_v49  ;;  %5990 = vmatpush3.bf16.msra.mxu0 %v6173_v47  ;;  %v6201_v37 = vld [vmem:[#allocation3 + $0x1c0] ss:$36 sps:$4 sm:$0xff]   ;;  %v6209_v41 = vld [vmem:[#allocation3 + $0x208] ss:$36 sps:$4 sm:$0xff]   ;;  %v6216_v45 = vld [vmem:[#allocation3 + $0xb0] ss:$36 sps:$4 sm:$0xff]  }
  0x7a   :  { %2360 = vmatmul.mubr.bf16.gmra.mxu1 %v6169_v50  ;;  %5991 = vmatprep.subr.bf16.mxu0 %v6181_v51  ;;  %v6214_v42 = vld [vmem:[#allocation3 + $0x20] ss:$36 sps:$4 sm:$0xff]   ;;  %v6215_v44 = vld [vmem:[#allocation3 + $0x68] ss:$36 sps:$4 sm:$0xff]   ;;  %v6217_v46 = vld [vmem:[#allocation3 + $0xf8] ss:$36 sps:$4 sm:$0xff]  }
  0x7b   :  { %2367 = vmatprep.mubr.bf16.mxu1 %v6174_v52  ;;  %v6218_v47 = vld [vmem:[#allocation3 + $0x140] ss:$36 sps:$4 sm:$0xff]   ;;  %v6219_v48 = vld [vmem:[#allocation3 + $0x188] ss:$36 sps:$4 sm:$0xff]   ;;  %v6220_v49 = vld [vmem:[#allocation3 + $0x1d0] ss:$36 sps:$4 sm:$0xff]  }
  0x7c   :  { %v6221_v50 = vld [vmem:[#allocation3 + $0x218] ss:$36 sps:$4 sm:$0xff]  }
  0x7d   :  { %5992 = vmatpush3.bf16.msra.mxu0 %v6181_v51 }
  0x7e   :  { %5993 = vmatprep.subr.bf16.mxu0 %v6188_v54 }
  0x80   :  { %2271 = vmatmul.mubr.bf16.gmra.mxu0 %v6172_v53 }
  0x81   :  { %2278 = vmatprep.mubr.bf16.mxu0 %v6178_v59  ;;  %5994 = vmatpush3.bf16.msra.mxu0 %v6188_v54 }
  0x82   :  { %2368 = vmatmul.mubr.bf16.gmra.mxu1 %v6176_v58  ;;  %5995 = vmatprep.subr.bf16.mxu0 %v6195_v60 }
  0x83   :  { %2375 = vmatprep.mubr.bf16.mxu1 %v6182_v63 }
  0x85   :  { %5996 = vmatpush3.bf16.msra.mxu0 %v6195_v60 }
  0x86   :  { %5997 = vmatprep.subr.bf16.mxu0 %v6202_v21 }
  0x88   :  { %2279 = vmatmul.mubr.bf16.gmra.mxu0 %v6180_v24 }
  0x89   :  { %2286 = vmatprep.mubr.bf16.mxu0 %v6185_v25  ;;  %5998 = vmatpush3.bf16.msra.mxu0 %v6202_v21 }
  0x8a   :  { %2376 = vmatmul.mubr.bf16.gmra.mxu1 %v6184_v26  ;;  %5999 = vmatprep.subr.bf16.mxu0 %v6210_v27 }
  0x8b   :  { %2383 = vmatprep.mubr.bf16.mxu1 %v6189_v28 }
  0x8d   :  { %6000 = vmatpush3.bf16.msra.mxu0 %v6210_v27 }
  0x90   :  { %2287 = vmatmul.mubr.bf16.gmra.mxu0 %v6187_v29 }
  0x91   :  { %2294 = vmatprep.mubr.bf16.mxu0 %v6192_v30 }
  0x92   :  { %2384 = vmatmul.mubr.bf16.gmra.mxu1 %v6191_v31 }
  0x93   :  { %2391 = vmatprep.mubr.bf16.mxu1 %v6196_v32 }
  0x98   :  { %2295 = vmatmul.mubr.bf16.gmra.mxu0 %v6194_v33 }
  0x99   :  { %2302 = vmatprep.mubr.bf16.mxu0 %v6199_v34 }
  0x9a   :  { %2392 = vmatmul.mubr.bf16.gmra.mxu1 %v6198_v35 }
  0x9b   :  { %2399 = vmatprep.mubr.bf16.mxu1 %v6203_v36 }
  0xa0   :  { %2303 = vmatmul.mubr.bf16.gmra.mxu0 %v6201_v37 }
  0xa1   :  { %2310 = vmatprep.mubr.bf16.mxu0 %v6207_v38 }
  0xa2   :  { %2400 = vmatmul.mubr.bf16.gmra.mxu1 %v6205_v39 }
  0xa3   :  { %2407 = vmatprep.mubr.bf16.mxu1 %v6211_v40 }
  0xa8   :  { %2311 = vmatmul.mubr.bf16.gmra.mxu0 %v6209_v41 }
  0xa9   :  { %6001 = vmatprep.mubr.bf16.mxu0 %v6214_v42 }
  0xaa   :  { %2408 = vmatmul.mubr.bf16.gmra.mxu1 %v6213_v43 }
  0xb0   :  { %6002 = vmatmul.mubr.bf16.vlgmr.msra.gmra.mxu0 %v6215_v44 }
  0xb1   :  { %6005 = vmatprep.mubr.bf16.mxu0 %v6216_v45 }
  0xb8   :  { %6006 = vmatmul.mubr.bf16.gmra.mxu0 %v6217_v46 }
  0xb9   :  { %6009 = vmatprep.mubr.bf16.mxu0 %v6218_v47 }
  0xc0   :  { %6010 = vmatmul.mubr.bf16.gmra.mxu0 %v6219_v48 }
  0xc1   :  { %6013 = vmatprep.mubr.bf16.mxu0 %v6220_v49 }
  0xc8   :  { %6014 = vmatmul.mubr.bf16.gmra.mxu0 %v6221_v50 }
  0xee   :  { %v5632_v51 = vpop.f32.mrf.mxu0 }
  0xf0   :  { %v5633_v53 = vpop.f32.mrf.mxu0 }
  0xf1   :  { %v5634_v54 = vadd.f32 %v5633_v53, %v5632_v51 }
  0xf2   :  { %v5696_v52 = vpop.f32.mrf.mxu1  ;;  %v5635_v56 = vpop.f32.mrf.mxu0 }
  0xf4   :  { %v5697_v55 = vpop.f32.mrf.mxu1  ;;  %v5636_v59 = vpop.f32.mrf.mxu0 }
  0xf5   :  { %v5698_v57 = vadd.f32 %v5697_v55, %v5696_v52  ;;  %v5637_v61 = vadd.f32 %v5636_v59, %v5635_v56 }
  0xf6   :  { %v5699_v58 = vpop.f32.mrf.mxu1 }
  0xf7   :  { %v6714_v60 = vadd.f32 %v5698_v57, %v5634_v54  ;;  %v5638_v63 = vpop.f32.mrf.mxu0 }
  0xf8   :  { %v5700_v62 = vpop.f32.mrf.mxu1 }
  0xf9   :  { %v5701_v0 = vadd.f32 %v5700_v62, %v5699_v58  ;;  %v5639_v3 = vpop.f32.mrf.mxu0 }
  0xfa   :  { %v5702_v2 = vpop.f32.mrf.mxu1  ;;  %v5640_v5 = vadd.f32 %v5639_v3, %v5638_v63 }
  0xfb   :  { %v6716_v4 = vadd.f32 %v5701_v0, %v5637_v61  ;;  %v5641_v7 = vpop.f32.mrf.mxu0 }
  0xfc   :  { %v5703_v6 = vpop.f32.mrf.mxu1 }
  0xfd   :  { %v5704_v8 = vadd.f32 %v5703_v6, %v5702_v2  ;;  %v5642_v10 = vpop.f32.mrf.mxu0 }
  0xfe   :  { %v5705_v9 = vpop.f32.mrf.mxu1  ;;  %v5643_v12 = vadd.f32 %v5642_v10, %v5641_v7 }
  0xff   :  { %v6718_v11 = vadd.f32 %v5704_v8, %v5640_v5  ;;  %v5644_v14 = vpop.f32.mrf.mxu0 }
 0x100   :  { %v5706_v13 = vpop.f32.mrf.mxu1 }
 0x101   :  { %v5707_v15 = vadd.f32 %v5706_v13, %v5705_v9  ;;  %v5645_v17 = vpop.f32.mrf.mxu0 }
 0x102   :  { %v5708_v16 = vpop.f32.mrf.mxu1  ;;  %v5646_v19 = vadd.f32 %v5645_v17, %v5644_v14 }
 0x103   :  { %v6720_v18 = vadd.f32 %v5707_v15, %v5643_v12  ;;  %v5647_v21 = vpop.f32.mrf.mxu0 }
 0x104   :  { %v5709_v20 = vpop.f32.mrf.mxu1 }
 0x105   :  { %v5710_v22 = vadd.f32 %v5709_v20, %v5708_v16  ;;  %v5648_v24 = vpop.f32.mrf.mxu0 }
 0x106   :  { %v5711_v23 = vpop.f32.mrf.mxu1  ;;  %v5649_v26 = vadd.f32 %v5648_v24, %v5647_v21 }
 0x107   :  { %v6722_v25 = vadd.f32 %v5710_v22, %v5646_v19  ;;  %v5650_v28 = vpop.f32.mrf.mxu0 }
 0x108   :  { %v5712_v27 = vpop.f32.mrf.mxu1 }
 0x109   :  { %v5713_v29 = vadd.f32 %v5712_v27, %v5711_v23  ;;  %v5651_v31 = vpop.f32.mrf.mxu0 }
 0x10a   :  { %v5714_v30 = vpop.f32.mrf.mxu1  ;;  %v5652_v33 = vadd.f32 %v5651_v31, %v5650_v28 }
 0x10b   :  { %v6724_v32 = vadd.f32 %v5713_v29, %v5649_v26  ;;  %v5653_v35 = vpop.f32.mrf.mxu0 }
 0x10c   :  { %v5715_v34 = vpop.f32.mrf.mxu1 }
 0x10d   :  { %v5716_v36 = vadd.f32 %v5715_v34, %v5714_v30  ;;  %v5654_v38 = vpop.f32.mrf.mxu0 }
 0x10e   :  { %v5717_v37 = vpop.f32.mrf.mxu1  ;;  %v5655_v40 = vadd.f32 %v5654_v38, %v5653_v35 }
 0x10f   :  { %v6726_v39 = vadd.f32 %v5716_v36, %v5652_v33  ;;  %v5656_v42 = vpop.f32.mrf.mxu0 }
 0x110   :  { %v5718_v41 = vpop.f32.mrf.mxu1 }
 0x111   :  { %v5719_v43 = vadd.f32 %v5718_v41, %v5717_v37  ;;  %v5657_v45 = vpop.f32.mrf.mxu0 }
 0x112   :  { %v5720_v44 = vpop.f32.mrf.mxu1  ;;  %v5658_v47 = vadd.f32 %v5657_v45, %v5656_v42 }
 0x113   :  { %v6728_v46 = vadd.f32 %v5719_v43, %v5655_v40  ;;  %v5659_v49 = vpop.f32.mrf.mxu0 }
 0x114   :  { %v5721_v48 = vpop.f32.mrf.mxu1 }
 0x115   :  { %v5722_v50 = vadd.f32 %v5721_v48, %v5720_v44  ;;  %v5660_v52 = vpop.f32.mrf.mxu0 }
 0x116   :  { %v5723_v51 = vpop.f32.mrf.mxu1  ;;  %v5661_v54 = vadd.f32 %v5660_v52, %v5659_v49 }
 0x117   :  { %v6730_v53 = vadd.f32 %v5722_v50, %v5658_v47  ;;  %v5662_v56 = vpop.f32.mrf.mxu0 }
 0x118   :  { %v5724_v55 = vpop.f32.mrf.mxu1 }
 0x119   :  { %v5725_v57 = vadd.f32 %v5724_v55, %v5723_v51  ;;  %v5663_v59 = vpop.f32.mrf.mxu0 }
 0x11a   :  { %v5726_v58 = vpop.f32.mrf.mxu1  ;;  %v5664_v62 = vadd.f32 %v5663_v59, %v5662_v56 }
 0x11b   :  { %v6732_v61 = vadd.f32 %v5725_v57, %v5661_v54  ;;  %v5665_v0 = vpop.f32.mrf.mxu0 }
 0x11c   :  { %v5727_v63 = vpop.f32.mrf.mxu1 }
 0x11d   :  { %8026 = vst [vmem:[#allocation7_spill] sm:$0xff] %v6732_v61  ;;  %v5728_v2 = vadd.f32 %v5727_v63, %v5726_v58  ;;  %v5666_v5 = vpop.f32.mrf.mxu0 }
 0x11e   :  { %v5729_v3 = vpop.f32.mrf.mxu1  ;;  %v5667_v7 = vadd.f32 %v5666_v5, %v5665_v0 }
 0x11f   :  { %v6734_v6 = vadd.f32 %v5728_v2, %v5664_v62 }
 0x120   :  { %v5730_v8 = vpop.f32.mrf.mxu1  ;;  %v5668_v9 = vpop.f32.mrf.mxu0 }
 0x121   :  { %8027 = vst [vmem:[#allocation8_spill] sm:$0xff] %v6734_v6  ;;  %v5731_v10 = vadd.f32 %v5730_v8, %v5729_v3 }
 0x122   :  { %v5732_v12 = vpop.f32.mrf.mxu1  ;;  %v5669_v13 = vpop.f32.mrf.mxu0 }
 0x123   :  { %v6736_v14 = vadd.f32 %v5731_v10, %v5667_v7  ;;  %v5670_v15 = vadd.f32 %v5669_v13, %v5668_v9 }
 0x124   :  { %v5733_v16 = vpop.f32.mrf.mxu1  ;;  %v5671_v17 = vpop.f32.mrf.mxu0 }
 0x125   :  { %8028 = vst [vmem:[#allocation9_spill] sm:$0xff] %v6736_v14  ;;  %v5734_v19 = vadd.f32 %v5733_v16, %v5732_v12 }
 0x126   :  { %v5735_v20 = vpop.f32.mrf.mxu1  ;;  %v5672_v21 = vpop.f32.mrf.mxu0 }
 0x127   :  { %v6738_v22 = vadd.f32 %v5734_v19, %v5670_v15  ;;  %v5673_v23 = vadd.f32 %v5672_v21, %v5671_v17 }
 0x128   :  { %v5736_v24 = vpop.f32.mrf.mxu1  ;;  %v5674_v26 = vpop.f32.mrf.mxu0 }
 0x129   :  { %8029 = vst [vmem:[#allocation10_spill] sm:$0xff] %v6738_v22  ;;  %v5737_v27 = vadd.f32 %v5736_v24, %v5735_v20 }
 0x12a   :  { %v5738_v28 = vpop.f32.mrf.mxu1  ;;  %v5675_v29 = vpop.f32.mrf.mxu0 }
 0x12b   :  { %v6740_v30 = vadd.f32 %v5737_v27, %v5673_v23  ;;  %v5676_v31 = vadd.f32 %v5675_v29, %v5674_v26 }
 0x12c   :  { %v5739_v33 = vpop.f32.mrf.mxu1  ;;  %v5677_v34 = vpop.f32.mrf.mxu0 }
 0x12d   :  { %8030 = vst [vmem:[#allocation11_spill] sm:$0xff] %v6740_v30  ;;  %v5740_v35 = vadd.f32 %v5739_v33, %v5738_v28 }
 0x12e   :  { %v6742_v36 = vpop.f32.mrf.mxu1  ;;  %v5678_v37 = vpop.f32.mrf.mxu0 }
 0x12f   :  { %8031 = vst [vmem:[#allocation12_spill] sm:$0xff] %v6742_v36  ;;  %v6744_v38 = vadd.f32 %v5740_v35, %v5676_v31  ;;  %v6746_v40 = vadd.f32 %v5678_v37, %v5677_v34 }
 0x130   :  { %v6748_v41 = vpop.f32.mrf.mxu1  ;;  %v5760_v42 = vpop.f32.mrf.mxu0 }
 0x131   :  { %8032 = vst [vmem:[#allocation13_spill] sm:$0xff] %v6744_v38  ;;  %8033 = vst [vmem:[#allocation14_spill] sm:$0xff] %v6746_v40 }
 0x132   :  { %8034 = vst [vmem:[#allocation15_spill] sm:$0xff] %v6748_v41  ;;  %v5761_v43 = vpop.f32.mrf.mxu0  ;;  %v5824_v44 = vpop.f32.mrf.mxu1 }
 0x133   :  { %v5762_v45 = vadd.f32 %v5761_v43, %v5760_v42 }
 0x134   :  { %v5763_v47 = vpop.f32.mrf.mxu0  ;;  %v5825_v48 = vpop.f32.mrf.mxu1 }
 0x135   :  { %v6751_v49 = vadd.f32 %v5762_v45, %v6714_v60 }
 0x136   :  { %v5764_v50 = vpop.f32.mrf.mxu0  ;;  %v5827_v51 = vpop.f32.mrf.mxu1 }
 0x138   :  { %v5766_v52 = vpop.f32.mrf.mxu0  ;;  %v5828_v54 = vpop.f32.mrf.mxu1 }
 0x13a   :  { %v5767_v55 = vpop.f32.mrf.mxu0  ;;  %v5830_v56 = vpop.f32.mrf.mxu1 }
 0x13b   :  { %v5768_v6 = vadd.f32 %v5767_v55, %v5766_v52 }
 0x13c   :  { %v5769_v57 = vpop.f32.mrf.mxu0  ;;  %v5831_v58 = vpop.f32.mrf.mxu1 }
 0x13e   :  { %v5770_v59 = vpop.f32.mrf.mxu0  ;;  %v5833_v62 = vpop.f32.mrf.mxu1 }
 0x140   :  { %v5772_v63 = vpop.f32.mrf.mxu0  ;;  %v5834_v0 = vpop.f32.mrf.mxu1 }
 0x142   :  { %v5773_v2 = vpop.f32.mrf.mxu0  ;;  %v5836_v3 = vpop.f32.mrf.mxu1 }
 0x144   :  { %v5775_v5 = vpop.f32.mrf.mxu0  ;;  %v5837_v7 = vpop.f32.mrf.mxu1 }
 0x146   :  { %v5776_v8 = vpop.f32.mrf.mxu0  ;;  %v6753_v9 = vpop.f32.mrf.mxu1 }
 0x148   :  { %v5778_v60 = vpop.f32.mrf.mxu0  ;;  %v6755_v10 = vpop.f32.mrf.mxu1 }
 0x14a   :  { %v5779_v12 = vpop.f32.mrf.mxu0  ;;  %v6757_v13 = vpop.f32.mrf.mxu1 }
 0x14b   :  { %v5780_v52 = vadd.f32 %v5779_v12, %v5778_v60 }
 0x14c   :  { %v5781_v15 = vpop.f32.mrf.mxu0  ;;  %v6759_v16 = vpop.f32.mrf.mxu1 }
 0x14e   :  { %v5782_v17 = vpop.f32.mrf.mxu0  ;;  %v6761_v19 = vpop.f32.mrf.mxu1 }
 0x150   :  { %v5784_v20 = vpop.f32.mrf.mxu0  ;;  %v6763_v21 = vpop.f32.mrf.mxu1 }
 0x152   :  { %v5785_v23 = vpop.f32.mrf.mxu0  ;;  %v6765_v24 = vpop.f32.mrf.mxu1 }
 0x154   :  { %v6767_v26 = vpop.f32.mrf.mxu0  ;;  %v6769_v27 = vpop.f32.mrf.mxu1 }
 0x156   :  { %v6771_v28 = vpop.f32.mrf.mxu0  ;;  %v6773_v29 = vpop.f32.mrf.mxu1 }
 0x157   :  { %8035 = vst [vmem:[#allocation16_spill] sm:$0xff] %v6773_v29  ;;  %v5829_v29 = vadd.f32 %v5828_v54, %v5827_v51  ;;  %v5786_v54 = vadd.f32 %v5785_v23, %v5784_v20 }
 0x158   :  { %v6775_v31 = vpop.f32.mrf.mxu0  ;;  %v6777_v33 = vpop.f32.mrf.mxu1 }
 0x159   :  { %8036 = vst [vmem:[#allocation17_spill] sm:$0xff] %v6777_v33  ;;  %v5774_v33 = vadd.f32 %v5773_v2, %v5772_v63  ;;  %v5850_v2 = vadd.f32 %v6769_v27, %v6765_v24  ;;  %v8049_v24 = vld [vmem:[#allocation7_spill] sm:$0xff] }
 0x15a   :  { %v6779_v34 = vpop.f32.mrf.mxu0  ;;  %v6781_v35 = vpop.f32.mrf.mxu1 }
 0x15b   :  { %8037 = vst [vmem:[#allocation18_spill] sm:$0xff] %v6781_v35  ;;  %v5792_v60 = vadd.f32 %v6779_v34, %v6775_v31 }
 0x15c   :  { %v6783_v37 = vpop.f32.mrf.mxu0  ;;  %v6787_v43 = vpop.f32.mrf.mxu1 }
 0x15d   :  { %8038 = vst [vmem:[#allocation19_spill] sm:$0xff] %v6787_v43  ;;  %v5765_v43 = vadd.f32 %v5764_v50, %v5763_v47  ;;  %v2273_v50 = vadd.f32 %v5774_v33, %v6722_v25 }
 0x15e   :  { %v6785_v42 = vpop.f32.mrf.mxu0  ;;  %v6793_v38 = vpop.f32.mrf.mxu1  ;;  %v8050_v27 = vld [vmem:[#allocation16_spill] sm:$0xff] }
 0x15f   :  { %8041 = vst [vmem:[#allocation22_spill] sm:$0xff] %v6793_v38  ;;  %v5771_v38 = vadd.f32 %v5770_v59, %v5769_v57 }
 0x160   :  { %v6789_v45 = vpop.f32.mrf.mxu0  ;;  %v6799_v22 = vpop.f32.mrf.mxu1 }
 0x161   :  { %8039 = vst [vmem:[#allocation20_spill] sm:$0xff] %v6789_v45  ;;  %8044 = vst [vmem:[#allocation25_spill] sm:$0xff] %v6799_v22  ;;  %v2260_v22 = vadd.f32 %v5765_v43, %v6716_v4  ;;  %v8054_v43 = vld [vmem:[#allocation8_spill] sm:$0xff] }
 0x162   :  { %v6791_v1 = vpop.f32.mrf.mxu0  ;;  %v6805_v36 = vpop.f32.mrf.mxu1 }
 0x163   :  { %8040 = vst [vmem:[#allocation21_spill] sm:$0xff] %v6791_v1  ;;  %8047 = vst [vmem:[#allocation28_spill] sm:$0xff] %v6805_v36  ;;  %v5826_v1 = vadd.f32 %v5825_v48, %v5824_v44  ;;  %v2268_v36 = vadd.f32 %v5771_v38, %v6720_v18  ;;  %v5838_v44 = vadd.f32 %v5837_v7, %v5836_v3 }
 0x164   :  { %v6795_v30 = vpop.f32.mrf.mxu0  ;;  %v5777_v48 = vadd.f32 %v5776_v8, %v5775_v5  ;;  %v2357_v51 = vadd.f32 %v5829_v29, %v2260_v22  ;;  %v5789_v7 = vadd.f32 %v6771_v28, %v6767_v26  ;;  %v8051_v28 = vld [vmem:[#allocation17_spill] sm:$0xff] }
 0x165   :  { %8042 = vst [vmem:[#allocation23_spill] sm:$0xff] %v6795_v30  ;;  %v6811_v30 = vpop.f32.mrf.mxu1  ;;  %v2354_v47 = vadd.f32 %v5826_v1, %v6751_v49  ;;  %v5841_v49 = vadd.f32 %v6755_v10, %v6753_v9  ;;  %v2370_v22 = vadd.f32 %v5838_v44, %v2273_v50  ;;  %v5853_v29 = vadd.f32 %v8051_v28, %v8050_v27  ;;  %v8055_v50 = vld [vmem:[#allocation18_spill] sm:$0xff]  ;;  %v8056_v44 = vld [vmem:[#allocation19_spill] sm:$0xff] }
 0x166   :  { %v6797_v40 = vpop.f32.mrf.mxu0  ;;  %v2276_v25 = vadd.f32 %v5777_v48, %v6724_v32  ;;  %v2292_v26 = vadd.f32 %v5789_v7, %v8049_v24  ;;  %v5856_v48 = vadd.f32 %v8056_v44, %v8055_v50 }
 0x167   :  { %8043 = vst [vmem:[#allocation24_spill] sm:$0xff] %v6797_v40  ;;  %v6818_v55 = vpop.f32.mrf.mxu1 }
 0x168   :  { %v6801_v14 = vpop.f32.mrf.mxu0  ;;  %v2373_v12 = vadd.f32 %v5841_v49, %v2276_v25  ;;  %v8052_v31 = vld [vmem:[#allocation20_spill] sm:$0xff]  ;;  %v8061_v25 = vld [vmem:[#allocation25_spill] sm:$0xff] }
 0x169   :  { %8045 = vst [vmem:[#allocation26_spill] sm:$0xff] %v6801_v14  ;;  %v2265_v14 = vadd.f32 %v5768_v6, %v6718_v11  ;;  %v5783_v11 = vadd.f32 %v5782_v17, %v5781_v15 }
 0x16a   :  { %v6803_v41 = vpop.f32.mrf.mxu0  ;;  %v8053_v33 = vld [vmem:[#allocation21_spill] sm:$0xff] }
 0x16b   :  { %8046 = vst [vmem:[#allocation27_spill] sm:$0xff] %v6803_v41  ;;  %v5832_v41 = vadd.f32 %v5831_v58, %v5830_v56  ;;  %v2281_v56 = vadd.f32 %v5780_v52, %v6726_v39  ;;  %v2284_v58 = vadd.f32 %v5783_v11, %v6728_v46  ;;  %v5847_v39 = vadd.f32 %v6763_v21, %v6761_v19 }
 0x16c   :  { %v6807_v35 = vpop.f32.mrf.mxu0  ;;  %v5798_v34 = vadd.f32 %v8053_v33, %v8052_v31  ;;  %v8070_v31 = vld [vmem:[#allocation11_spill] sm:$0xff] }
 0x16d   :  { %8048 = vst [vmem:[#allocation29_spill] sm:$0xff] %v6807_v35  ;;  %v5835_v35 = vadd.f32 %v5834_v0, %v5833_v62  ;;  %v2362_v59 = vadd.f32 %v5832_v41, %v2265_v14  ;;  %v6830_v14 = vpop.f32.mrf.mxu1  ;;  %v5844_v41 = vadd.f32 %v6759_v16, %v6757_v13  ;;  %v2289_v0 = vadd.f32 %v5786_v54, %v6730_v53 }
 0x16e   :  { %v6809_v45 = vpop.f32.mrf.mxu0  ;;  %v5795_v13 = vadd.f32 %v6785_v42, %v6783_v37  ;;  %v2381_v16 = vadd.f32 %v5847_v39, %v2284_v58  ;;  %v8063_v58 = vld [vmem:[#allocation28_spill] sm:$0xff] }
 0x16f   :  { %v2365_v38 = vadd.f32 %v5835_v35, %v2268_v36  ;;  %v5866_v8 = vpop.f32.mrf.mxu1  ;;  %v2378_v10 = vadd.f32 %v5844_v41, %v2281_v56  ;;  %v2386_v23 = vadd.f32 %v5850_v2, %v2289_v0  ;;  %v5862_v39 = vadd.f32 %v6811_v30, %v8063_v58 }
 0x170   :  { %v6003_v40 = vpop.f32.mrf.mxu0 }
 0x171   :  { %v6822_v18 = vadd.f32 %v6003_v40, %v2362_v59  ;;  %v5867_v35 = vpop.f32.mrf.mxu1  ;;  %v8057_v59 = vld [vmem:[#allocation12_spill] sm:$0xff] }
 0x172   :  { %v2450_v61 = vpop.f32.mrf.mxu0  ;;  %v5868_v44 = vadd.f32 %v5867_v35, %v5866_v8 }
 0x173   :  { %v6820_v4 = vadd.f32 %v2450_v61, %v2354_v47  ;;  %v2519_v3 = vsel %vm2515_vm0, %v6822_v18, 0.0  ;;  %v2297_v47 = vadd.f32 %v5792_v60, %v8054_v43  ;;  %v5869_v2 = vpop.f32.mrf.mxu1 }
 0x174   :  { %v6004_v57 = vpop.f32.mrf.mxu0  ;;  %v8069_v30 = vld [vmem:[#allocation29_spill] sm:$0xff] }
 0x175   :  { %v2516_v40 = vsel %vm2515_vm0, %v6820_v4, 0.0  ;;  %v6836_v36 = vadd.f32 %v6004_v57, %v2365_v38  ;;  %v8060_v38 = vld [vmem:[#allocation22_spill] sm:$0xff] }
 0x176   :  { %v2453_v6 = vpop.f32.mrf.mxu0  ;;  %v5859_v49 = vadd.f32 %v8061_v25, %v8060_v38 }
 0x177   :  { %v6824_v1 = vadd.f32 %v2453_v6, %v2357_v51  ;;  %v2521_v53 = vsel %vm2515_vm0, %v6836_v36, 0.0  ;;  %v8058_v51 = vld [vmem:[#allocation15_spill] sm:$0xff]  ;;  %v8059_v6 = vld [vmem:[#allocation9_spill] sm:$0xff] }
 0x178   :  { %v6007_v61 = vpop.f32.mrf.mxu0  ;;  %v5743_v11 = vadd.f32 %v8058_v51, %v8057_v59  ;;  %v2300_v54 = vadd.f32 %v5795_v13, %v8059_v6  ;;  %v8068_v13 = vld [vmem:[#allocation14_spill] sm:$0xff] }
 0x179   :  { %v2517_v32 = vsel %vm2515_vm0, %v6824_v1, 0.0  ;;  %v6858_v19 = vadd.f32 %v6007_v61, %v2378_v10  ;;  %v2394_v10 = vadd.f32 %v5856_v48, %v2297_v47  ;;  %v8071_v47 = vld [vmem:[#allocation13_spill] sm:$0xff] }
 0x17a   :  { %v2518_v62 = vadd.f32 %v2517_v32, %v2516_v40  ;;  %v2466_v63 = vpop.f32.mrf.mxu0  ;;  %v8062_v40 = vld [vmem:[#allocation10_spill] sm:$0xff] }
 0x17b   :  { %v6848_v5 = vadd.f32 %v2466_v63, %v2370_v22  ;;  %v2527_v22 = vsel %vm2515_vm0, %v6858_v19, 0.0  ;;  %v2305_v32 = vadd.f32 %v5798_v34, %v8062_v40  ;;  %v8065_v63 = vld [vmem:[#allocation24_spill] sm:$0xff]  ;;  %v5865_v34 = vadd.f32 %v6830_v14, %v6818_v55 }
 0x17c   :  { %v2520_v46 = vadd.f32 %v2519_v3, %v2518_v62  ;;  %v6008_v9 = vpop.f32.mrf.mxu0  ;;  %v8064_v62 = vld [vmem:[#allocation23_spill] sm:$0xff] }
 0x17d   :  { %v2523_v20 = vsel %vm2515_vm0, %v6848_v5, 0.0  ;;  %v6872_v52 = vadd.f32 %v6008_v9, %v2381_v16  ;;  %v5801_v0 = vadd.f32 %v8065_v63, %v8064_v62  ;;  %v8067_v9 = vld [vmem:[#allocation27_spill] sm:$0xff]  ;;  %v2402_v43 = vadd.f32 %v5862_v39, %v2305_v32 }
 0x17e   :  { %v2522_v15 = vadd.f32 %v2521_v53, %v2520_v46  ;;  %v2469_v17 = vpop.f32.mrf.mxu0  ;;  %v8066_v46 = vld [vmem:[#allocation26_spill] sm:$0xff] }
 0x17f   :  { %v6862_v21 = vadd.f32 %v2469_v17, %v2373_v12  ;;  %v5804_v60 = vadd.f32 %v8067_v9, %v8066_v46  ;;  %v2529_v53 = vsel %vm2515_vm0, %v6872_v52, 0.0  ;;  %v2389_v12 = vadd.f32 %v5853_v29, %v2292_v26 }
 0x180   :  { %v2524_v37 = vadd.f32 %v2523_v20, %v2522_v15  ;;  %v6011_v42 = vpop.f32.mrf.mxu0  ;;  %v2219_v15 = vadd.f32 %v5743_v11, %v8068_v13  ;;  %v2397_v17 = vadd.f32 %v5859_v49, %v2300_v54  ;;  %v2308_v33 = vadd.f32 %v5801_v0, %v8070_v31 }
 0x181   :  { %v2525_v57 = vsel %vm2515_vm0, %v6862_v21, 0.0  ;;  %v2491_v24 = vadd.f32 %v6011_v42, %v2394_v10  ;;  %v2313_v50 = vadd.f32 %v5804_v60, %v8071_v47 }
 0x182   :  { %v2526_v56 = vadd.f32 %v2525_v57, %v2524_v37  ;;  %v2482_v61 = vpop.f32.mrf.mxu0  ;;  %v5870_v37 = vpop.f32.mrf.mxu1  ;;  %v2405_v25 = vadd.f32 %v5865_v34, %v2308_v33 }
 0x183   :  { %v6883_v41 = vadd.f32 %v2482_v61, %v2386_v23  ;;  %v5807_v23 = vadd.f32 %v6809_v45, %v8069_v30  ;;  %v5871_v51 = vadd.f32 %v5870_v37, %v5869_v2  ;;  %v2535_v11 = vsel %vm2515_vm0, %v2491_v24, 0.0 }
 0x184   :  { %v2528_v3 = vadd.f32 %v2527_v22, %v2526_v56  ;;  %v6012_v7 = vpop.f32.mrf.mxu0  ;;  %v2410_v14 = vadd.f32 %v5868_v44, %v2313_v50 }
 0x185   :  { %v2531_v27 = vsel %vm2515_vm0, %v6883_v41, 0.0  ;;  %v2494_v48 = vadd.f32 %v6012_v7, %v2397_v17  ;;  %v2316_v59 = vadd.f32 %v5807_v23, %v2219_v15 }
 0x186   :  { %v2530_v16 = vadd.f32 %v2529_v53, %v2528_v3  ;;  %v2485_v20 = vpop.f32.mrf.mxu0 }
 0x187   :  { %v2486_v28 = vadd.f32 %v2485_v20, %v2389_v12  ;;  %v2537_v55 = vsel %vm2515_vm0, %v2494_v48, 0.0  ;;  %v2413_v35 = vadd.f32 %v5871_v51, %v2316_v59 }
 0x188   :  { %v2532_v26 = vadd.f32 %v2531_v27, %v2530_v16  ;;  %v6015_v29 = vpop.f32.mrf.mxu0 }
 0x189   :  { %v2533_v45 = vsel %vm2515_vm0, %v2486_v28, 0.0  ;;  %v2507_v61 = vadd.f32 %v6015_v29, %v2410_v14 }
 0x18a   :  { %v2534_v42 = vadd.f32 %v2533_v45, %v2532_v26  ;;  %v2498_v57 = vpop.f32.mrf.mxu0 }
 0x18b   :  { %v2499_v6 = vadd.f32 %v2498_v57, %v2402_v43  ;;  %v2543_v62 = vsel %vm2515_vm0, %v2507_v61, 0.0 }
 0x18c   :  { %v2536_v54 = vadd.f32 %v2535_v11, %v2534_v42  ;;  %v6016_v38 = vpop.f32.mrf.mxu0 }
 0x18d   :  { %v2539_v8 = vsel %vm2515_vm0, %v2499_v6, 0.0  ;;  %v2510_v32 = vadd.f32 %v6016_v38, %v2413_v35 }
 0x18e   :  { %v2538_v49 = vadd.f32 %v2537_v55, %v2536_v54  ;;  %v2501_v56 = vpop.f32.mrf.mxu0 }
 0x18f   :  { %v2502_v22 = vadd.f32 %v2501_v56, %v2405_v25  ;;  %v2545_v0 = vsel %vm2515_vm0, %v2510_v32, 0.0 }
 0x190   :  { %v2540_v40 = vadd.f32 %v2539_v8, %v2538_v49 }
 0x191   :  { %v2541_v58 = vsel %vm2515_vm0, %v2502_v22, 0.0 }
 0x192   :  { %v2542_v39 = vadd.f32 %v2541_v58, %v2540_v40 }
 0x194   :  { %v2544_v63 = vadd.f32 %v2543_v62, %v2542_v39 }
 0x196   :  { %v2546_v2 = vadd.f32 %v2545_v0, %v2544_v63  ;;  %v8072_v0 = vmov 0.0  }
 0x197   :  { %3556 = vst.msk [vmem:[#allocation4 + $0x8] sm:$0x1] %vm3554_vm1, %v8072_v0  ;;  %3557 = vst.msk [vmem:[#allocation4 + $0x10] sm:$0x1] %vm3554_vm1, %v8072_v0 }
 0x198   :  { %v2547_v3 = vrot.slane %v2546_v2, 4  ;;  %3558 = vst.msk [vmem:[#allocation4 + $0x18] sm:$0x1] %vm3554_vm1, %v8072_v0  ;;  %3559 = vst.msk [vmem:[#allocation4 + $0x20] sm:$0x1] %vm3554_vm1, %v8072_v0 }
 0x199   :  { %3562 = vst.msk [vmem:[#allocation4 + $0x38] sm:$0x1] %vm3554_vm1, %v8072_v0  ;;  %3563 = vst.msk [vmem:[#allocation4 + $0x40] sm:$0x1] %vm3554_vm1, %v8072_v0 }
 0x19a   :  { %v2548_v7 = vadd.f32 %v2547_v3, %v2546_v2  ;;  %3564 = vst.msk [vmem:[#allocation4 + $0x48] sm:$0x1] %vm3554_vm1, %v8072_v0  ;;  %3565 = vst.msk [vmem:[#allocation4 + $0x50] sm:$0x1] %vm3554_vm1, %v8072_v0 }
 0x19b   :  { %3568 = vst.msk [vmem:[#allocation4 + $0xd] sm:$0x1] %vm3554_vm1, %v8072_v0  ;;  %3569 = vst.msk [vmem:[#allocation4 + $0x15] sm:$0x1] %vm3554_vm1, %v8072_v0 }
 0x19c   :  { %v2549_v46 = vrot.slane %v2548_v7, 2  ;;  %3570 = vst.msk [vmem:[#allocation4 + $0x1d] sm:$0x1] %vm3554_vm1, %v8072_v0  ;;  %3571 = vst.msk [vmem:[#allocation4 + $0x25] sm:$0x1] %vm3554_vm1, %v8072_v0 }
 0x19d   :  { %3574 = vst.msk [vmem:[#allocation4 + $0x3d] sm:$0x1] %vm3554_vm1, %v8072_v0  ;;  %3575 = vst.msk [vmem:[#allocation4 + $0x45] sm:$0x1] %vm3554_vm1, %v8072_v0 }
 0x19e   :  { %v2550_v9 = vadd.f32 %v2549_v46, %v2548_v7  ;;  %3576 = vst.msk [vmem:[#allocation4 + $0x4d] sm:$0x1] %vm3554_vm1, %v8072_v0  ;;  %3577 = vst.msk [vmem:[#allocation4 + $0x55] sm:$0x1] %vm3554_vm1, %v8072_v0 }
 0x19f   :  { %3549 = vst.msk [vmem:[#allocation4] sm:$0x3f] %vm3548_vm2, %v8072_v0  ;;  %3550 = vst.msk [vmem:[#allocation4 + $0x30] sm:$0x3f] %vm3548_vm2, %v8072_v0 }
 0x1a0   :  { %v2551_v60 = vrot.slane %v2550_v9, 1  ;;  %3552 = vst.msk [vmem:[#allocation4 + $0x28] sm:$0x3f] %vm3548_vm2, %v8072_v0  ;;  %3553 = vst.msk [vmem:[#allocation4 + $0x58] sm:$0x3f] %vm3548_vm2, %v8072_v0 }
 0x1a1   :  { %3555 = vst.msk [vmem:[#allocation4] sm:$0x1] %vm3554_vm1, %v8072_v0  ;;  %3567 = vst.msk [vmem:[#allocation4 + $0x5] sm:$0x1] %vm3554_vm1, %v8072_v0 }
 0x1a2   :  { %v2552_v53 = vadd.f32 %v2551_v60, %v2550_v9  ;;  %3560 = vst.msk [vmem:[#allocation4 + $0x28] sm:$0x1] %vm3554_vm1, %v8072_v0  ;;  %3561 = vst.msk [vmem:[#allocation4 + $0x30] sm:$0x1] %vm3554_vm1, %v8072_v0 }
 0x1a3   :  { %3566 = vst.msk [vmem:[#allocation4 + $0x58] sm:$0x1] %vm3554_vm1, %v8072_v0  ;;  %3572 = vst.msk [vmem:[#allocation4 + $0x2d] sm:$0x1] %vm3554_vm1, %v8072_v0 }
 0x1a4   :  { %v2554_v10 = vmul.f32 0.0078125, %v2552_v53  ;;  %3573 = vst.msk [vmem:[#allocation4 + $0x35] sm:$0x1] %vm3554_vm1, %v8072_v0  ;;  %3578 = vst.msk [vmem:[#allocation4 + $0x5d] sm:$0x1] %vm3554_vm1, %v8072_v0  ;;  %v6243_v0 = vld [vmem:[%s7950_s4 + $0x28] sm:$0xff]  }
 0x1a6   :  { %v6911_v12 = vsub.f32 %v6820_v4, %v2554_v10  ;;  %v6914_v13 = vsub.f32 %v6824_v1, %v2554_v10  ;;  %v6917_v15 = vsub.f32 %v6822_v18, %v2554_v10  ;;  %v6920_v16 = vsub.f32 %v6836_v36, %v2554_v10 }
 0x1a7   :  { %v6923_v17 = vsub.f32 %v6848_v5, %v2554_v10  ;;  %v6926_v20 = vsub.f32 %v6862_v21, %v2554_v10  ;;  %v6929_v30 = vsub.f32 %v6858_v19, %v2554_v10  ;;  %v6932_v4 = vsub.f32 %v6872_v52, %v2554_v10 }
 0x1a8   :  { %v6935_v1 = vsub.f32 %v6883_v41, %v2554_v10  ;;  %v6937_v18 = vsub.f32 %v2486_v28, %v2554_v10  ;;  %v6939_v23 = vsub.f32 %v2491_v24, %v2554_v10  ;;  %v6941_v36 = vsub.f32 %v2494_v48, %v2554_v10 }
 0x1a9   :  { %v6943_v5 = vsub.f32 %v2499_v6, %v2554_v10  ;;  %v6945_v27 = vsub.f32 %v2502_v22, %v2554_v10  ;;  %v6947_v21 = vsub.f32 %v2507_v61, %v2554_v10  ;;  %v6949_v19 = vsub.f32 %v2510_v32, %v2554_v10 }
 0x1aa   :  { %v2571_v52 = vmul.f32 %v6911_v12, %v6911_v12  ;;  %v2572_v41 = vmul.f32 %v6914_v13, %v6914_v13  ;;  %v2573_v24 = vmul.f32 %v6917_v15, %v6917_v15  ;;  %v2574_v28 = vmul.f32 %v6920_v16, %v6920_v16 }
 0x1ab   :  { %v2575_v37 = vmul.f32 %v6923_v17, %v6923_v17  ;;  %v2576_v43 = vmul.f32 %v6926_v20, %v6926_v20  ;;  %v2577_v44 = vmul.f32 %v6929_v30, %v6929_v30  ;;  %v2578_v42 = vmul.f32 %v6932_v4, %v6932_v4 }
 0x1ac   :  { %v2587_v31 = vsel %vm2515_vm0, %v2571_v52, 0.0  ;;  %v2588_v33 = vsel %vm2515_vm0, %v2572_v41, 0.0  ;;  %v2590_v26 = vsel %vm2515_vm0, %v2573_v24, 0.0  ;;  %v2592_v47 = vsel %vm2515_vm0, %v2574_v28, 0.0 }
 0x1ad   :  { %v2589_v34 = vadd.f32 %v2588_v33, %v2587_v31  ;;  %v2594_v48 = vsel %vm2515_vm0, %v2575_v37, 0.0  ;;  %v2596_v57 = vsel %vm2515_vm0, %v2576_v43, 0.0  ;;  %v2579_v51 = vmul.f32 %v6935_v1, %v6935_v1 }
 0x1ae   :  { %v2598_v11 = vsel %vm2515_vm0, %v2577_v44, 0.0  ;;  %v2580_v54 = vmul.f32 %v6937_v18, %v6937_v18  ;;  %v2600_v38 = vsel %vm2515_vm0, %v2578_v42, 0.0  ;;  %v2581_v14 = vmul.f32 %v6939_v23, %v6939_v23 }
 0x1af   :  { %v2591_v29 = vadd.f32 %v2590_v26, %v2589_v34  ;;  %v2602_v25 = vsel %vm2515_vm0, %v2579_v51, 0.0  ;;  %v2582_v56 = vmul.f32 %v6941_v36, %v6941_v36  ;;  %v2583_v35 = vmul.f32 %v6943_v5, %v6943_v5 }
 0x1b0   :  { %v2604_v61 = vsel %vm2515_vm0, %v2580_v54, 0.0  ;;  %v2606_v22 = vsel %vm2515_vm0, %v2581_v14, 0.0  ;;  %v2584_v32 = vmul.f32 %v6945_v27, %v6945_v27  ;;  %v2585_v62 = vmul.f32 %v6947_v21, %v6947_v21 }
 0x1b1   :  { %v2593_v50 = vadd.f32 %v2592_v47, %v2591_v29  ;;  %v2608_v58 = vsel %vm2515_vm0, %v2582_v56, 0.0  ;;  %v2610_v63 = vsel %vm2515_vm0, %v2583_v35, 0.0  ;;  %v2586_v3 = vmul.f32 %v6949_v19, %v6949_v19 }
 0x1b2   :  { %v2612_v7 = vsel %vm2515_vm0, %v2584_v32, 0.0  ;;  %v2614_v9 = vsel %vm2515_vm0, %v2585_v62, 0.0  ;;  %v6316_v26 = vmov 1983009808   ;;  %v2723_v43 = vlaneseq }
 0x1b3   :  { %v2595_v45 = vadd.f32 %v2594_v48, %v2593_v50  ;;  %v2616_v53 = vsel %vm2515_vm0, %v2586_v3, 0.0  ;;  %v2721_v29 = vunpack.c.l.s4 %v6316_v26  ;;  %v5225_v48 = vld [vmem:[%s7949_s2] ss:$0 sm:$0xff] }
 0x1b4   :  { %v2724_v50 = vshrl.u32 %v2723_v43, 7 }
 0x1b5   :  { %v2597_v59 = vadd.f32 %v2596_v57, %v2595_v45  ;;  %v2722_v47 = vunpack.c.0.s8 %v2721_v29 }
 0x1b6   :  { %v7060_v42 = vsub.s32 0, %v2724_v50 }
 0x1b7   :  { %v2599_v6 = vadd.f32 %v2598_v11, %v2597_v59  ;;  %v7058_v45 = vsub.s32 %v2722_v47, %v2724_v50  ;;  %v6249_v47 = vld [vmem:[%s7950_s4 + $0xf8] sm:$0xff]  }
 0x1b8   :  { %8074 = vst [vmem:[#allocation16_spill] sm:$0xff] %v7060_v42  ;;  %5916 = vmatprep.subr.bf16.mxu0 %v6249_v47 }
 0x1b9   :  { %v2601_v55 = vadd.f32 %v2600_v38, %v2599_v6  ;;  %8073 = vst [vmem:[#allocation7_spill] sm:$0xff] %v7058_v45  ;;  %v6238_v6 = vld [vmem:[%s7950_s4 + $0x78] sm:$0xff]  }
 0x1ba   :  { %5888 = vmatprep.subr.bf16.mxu1 %v6238_v6 }
 0x1bb   :  { %v2603_v49 = vadd.f32 %v2602_v25, %v2601_v55 }
 0x1bd   :  { %v2605_v8 = vadd.f32 %v2604_v61, %v2603_v49 }
 0x1bf   :  { %v2607_v40 = vadd.f32 %v2606_v22, %v2605_v8 }
 0x1c1   :  { %v2609_v39 = vadd.f32 %v2608_v58, %v2607_v40 }
 0x1c3   :  { %v2611_v2 = vadd.f32 %v2610_v63, %v2609_v39 }
 0x1c5   :  { %v2613_v46 = vadd.f32 %v2612_v7, %v2611_v2 }
 0x1c7   :  { %v2615_v60 = vadd.f32 %v2614_v9, %v2613_v46  ;;  %v6244_v9 = vld [vmem:[%s7950_s4 + $0x60] sm:$0xff]  }
 0x1c9   :  { %v2617_v10 = vadd.f32 %v2616_v53, %v2615_v60 }
 0x1cb   :  { %v2618_v52 = vrot.slane %v2617_v10, 4 }
 0x1cd   :  { %v2619_v41 = vadd.f32 %v2618_v52, %v2617_v10 }
 0x1cf   :  { %v2620_v24 = vrot.slane %v2619_v41, 2 }
 0x1d1   :  { %v2621_v28 = vadd.f32 %v2620_v24, %v2619_v41  ;;  %v6245_v41 = vld [vmem:[%s7950_s4 + $0x20] sm:$0xff]  }
 0x1d3   :  { %v2622_v31 = vrot.slane %v2621_v28, 1 }
 0x1d5   :  { %v2623_v33 = vadd.f32 %v2622_v31, %v2621_v28 }
 0x1d7   :  { %v2624_v34 = vmul.f32 0.0078125, %v2623_v33 }
 0x1d9   :  { %v2625_v37 = vadd.f32 1e-05, %v2624_v34  ;;  %v6246_v34 = vld [vmem:[%s7950_s4 + $0x58] sm:$0xff]  }
 0x1db   :  { %6307 = vrsqrt.f32 %v2625_v37 }
 0x1e8   :  { %v6308_v44 = vpop.eup %6307 }
 0x1e9   :  { %v2627_v57 = vmul.f32 %v6308_v44, %v6911_v12  ;;  %v2628_v59 = vmul.f32 %v6308_v44, %v6914_v13  ;;  %v2629_v51 = vmul.f32 %v6308_v44, %v6917_v15  ;;  %v2630_v11 = vmul.f32 %v6308_v44, %v6920_v16  ;;  %v6239_v12 = vld [vmem:[%s7950_s4 + $0x38] sm:$0xff]  }
 0x1ea   :  { %v2631_v54 = vmul.f32 %v6308_v44, %v6923_v17  ;;  %v2632_v38 = vmul.f32 %v6308_v44, %v6926_v20  ;;  %v2633_v55 = vmul.f32 %v6308_v44, %v6929_v30  ;;  %v2634_v14 = vmul.f32 %v6308_v44, %v6932_v4  ;;  %v6240_v17 = vld [vmem:[%s7950_s4 + $0x70] sm:$0xff]   ;;  %5889 = vmatpush3.bf16.msra.mxu1 %v6239_v12 }
 0x1eb   :  { %v2635_v13 = vmul.f32 %v6308_v44, %v6935_v1  ;;  %v2636_v15 = vmul.f32 %v6308_v44, %v6937_v18  ;;  %v2637_v16 = vmul.f32 %v6308_v44, %v6939_v23  ;;  %v2638_v25 = vmul.f32 %v6308_v44, %v6941_v36  ;;  %v6241_v1 = vld [vmem:[%s7950_s4 + $0x30] sm:$0xff]   ;;  %5890 = vmatprep.subr.bf16.mxu1 %v6240_v17 }
 0x1ec   :  { %v2639_v20 = vmul.f32 %v6308_v44, %v6943_v5  ;;  %v2640_v30 = vmul.f32 %v6308_v44, %v6945_v27  ;;  %v2641_v4 = vmul.f32 %v6308_v44, %v6947_v21  ;;  %v2642_v49 = vmul.f32 %v6308_v44, %v6949_v19  ;;  %v6242_v5 = vld [vmem:[%s7950_s4 + $0x68] sm:$0xff]   ;;  %v5226_v27 = vld [vmem:[%s7951_s3] ss:$0 sm:$0xff] }
 0x1ed   :  { %v2649_v18 = vmul.f32 %v5225_v48, %v2627_v57  ;;  %v2650_v23 = vmul.f32 %v5225_v48, %v2628_v59  ;;  %v2651_v36 = vmul.f32 %v5225_v48, %v2629_v51  ;;  %v2652_v56 = vmul.f32 %v5225_v48, %v2630_v11 }
 0x1ee   :  { %v2653_v21 = vmul.f32 %v5225_v48, %v2631_v54  ;;  %v2654_v19 = vmul.f32 %v5225_v48, %v2632_v38  ;;  %v2655_v61 = vmul.f32 %v5225_v48, %v2633_v55  ;;  %v2656_v8 = vmul.f32 %v5225_v48, %v2634_v14  ;;  %5891 = vmatpush3.bf16.msra.mxu1 %v6241_v1  ;;  %v6247_v54 = vld [vmem:[%s7950_s4 + $0x18] sm:$0xff]  }
 0x1ef   :  { %v2657_v35 = vmul.f32 %v5225_v48, %v2635_v13  ;;  %v2658_v22 = vmul.f32 %v5225_v48, %v2636_v15  ;;  %v2659_v40 = vmul.f32 %v5225_v48, %v2637_v16  ;;  %v2660_v32 = vmul.f32 %v5225_v48, %v2638_v25  ;;  %5892 = vmatprep.subr.bf16.mxu1 %v6242_v5  ;;  %v6248_v13 = vld [vmem:[%s7950_s4 + $0x50] sm:$0xff]  }
 0x1f0   :  { %v2661_v58 = vmul.f32 %v5225_v48, %v2639_v20  ;;  %v2662_v39 = vmul.f32 %v5225_v48, %v2640_v30  ;;  %v2663_v62 = vmul.f32 %v5225_v48, %v2641_v4  ;;  %v2664_v63 = vmul.f32 %v5225_v48, %v2642_v49 }
 0x1f1   :  { %v2671_v2 = vadd.f32 %v5226_v27, %v2649_v18  ;;  %v2672_v3 = vadd.f32 %v5226_v27, %v2650_v23  ;;  %v2673_v7 = vadd.f32 %v5226_v27, %v2651_v36  ;;  %v2674_v46 = vadd.f32 %v5226_v27, %v2652_v56 }
 0x1f2   :  { %v2675_v60 = vadd.f32 %v5226_v27, %v2653_v21  ;;  %v2676_v53 = vadd.f32 %v5226_v27, %v2654_v19  ;;  %v2677_v10 = vadd.f32 %v5226_v27, %v2655_v61  ;;  %v2678_v52 = vadd.f32 %v5226_v27, %v2656_v8  ;;  %5893 = vmatpush3.bf16.msra.mxu1 %v6243_v0 }
 0x1f3   :  { %v2679_v24 = vadd.f32 %v5226_v27, %v2657_v35  ;;  %v2680_v28 = vadd.f32 %v5226_v27, %v2658_v22  ;;  %v2681_v31 = vadd.f32 %v5226_v27, %v2659_v40  ;;  %v2682_v33 = vadd.f32 %v5226_v27, %v2660_v32  ;;  %5894 = vmatprep.subr.bf16.mxu1 %v6244_v9 }
 0x1f4   :  { %v2683_v37 = vadd.f32 %v5226_v27, %v2661_v58  ;;  %v2684_v26 = vadd.f32 %v5226_v27, %v2662_v39  ;;  %v2685_v29 = vadd.f32 %v5226_v27, %v2663_v62  ;;  %v2686_v43 = vadd.f32 %v5226_v27, %v2664_v63 }
 0x1f5   :  { %v2687_v50 = vmax.f32 %v2671_v2, 0.0  ;;  %v2688_v44 = vmax.f32 %v2672_v3, 0.0  ;;  %v2689_v48 = vmax.f32 %v2673_v7, 0.0  ;;  %v2690_v57 = vmax.f32 %v2674_v46, 0.0 }
 0x1f6   :  { %v2691_v59 = vmax.f32 %v2675_v60, 0.0  ;;  %v2692_v51 = vmax.f32 %v2676_v53, 0.0  ;;  %v2693_v11 = vmax.f32 %v2677_v10, 0.0  ;;  %v2694_v6 = vmax.f32 %v2678_v52, 0.0  ;;  %5895 = vmatpush3.bf16.msra.mxu1 %v6245_v41 }
 0x1f7   :  { %v2695_v38 = vmax.f32 %v2679_v24, 0.0  ;;  %v2696_v55 = vmax.f32 %v2680_v28, 0.0  ;;  %v2697_v14 = vmax.f32 %v2681_v31, 0.0  ;;  %v7114_v12 = vmax.f32 %v2682_v33, 0.0  ;;  %5896 = vmatprep.subr.bf16.mxu1 %v6246_v34 }
 0x1f8   :  { %v7119_v15 = vmax.f32 %v2683_v37, 0.0  ;;  %v7121_v16 = vmax.f32 %v2684_v26, 0.0  ;;  %v7123_v25 = vmax.f32 %v2685_v29, 0.0  ;;  %v7125_v17 = vmax.f32 %v2686_v43, 0.0 }
 0x1f9   :  { %v2719_v20 = vcombine.high %v2687_v50, %v2687_v50  ;;  %v7128_v30 = vrot.slane %v2687_v50, %v7058_v45  ;;  %v2736_v4 = vcombine.high %v2688_v44, %v2688_v44  ;;  %v7131_v49 = vrot.slane %v2688_v44, %v7058_v45 }
 0x1fa   :  { %v2753_v1 = vcombine.high %v2689_v48, %v2689_v48  ;;  %v7134_v18 = vrot.slane %v2689_v48, %v7058_v45  ;;  %v2770_v23 = vcombine.high %v2690_v57, %v2690_v57  ;;  %v7137_v36 = vrot.slane %v2690_v57, %v7058_v45  ;;  %5897 = vmatpush3.bf16.msra.mxu1 %v6247_v54 }
 0x1fb   :  { %8075 = vst [vmem:[#allocation17_spill] sm:$0xff] %v7128_v30  ;;  %8076 = vst [vmem:[#allocation20_spill] sm:$0xff] %v7131_v49  ;;  %v7140_v56 = vrot.slane %v2719_v20, %v7058_v45  ;;  %v7144_v5 = vcombine.high %v7128_v30, %v7128_v30  ;;  %v7147_v27 = vrot.slane %v2736_v4, %v7058_v45  ;;  %5898 = vmatprep.subr.bf16.mxu1 %v6248_v13 }
 0x1fc   :  { %v7151_v21 = vcombine.high %v7131_v49, %v7131_v49  ;;  %v7154_v19 = vrot.slane %v2753_v1, %v7058_v45  ;;  %v7158_v61 = vcombine.high %v7134_v18, %v7134_v18  ;;  %v7161_v8 = vrot.slane %v2770_v23, %v7058_v45 }
 0x1fd   :  { %8077 = vst [vmem:[#allocation21_spill] sm:$0xff] %v7140_v56  ;;  %8078 = vst [vmem:[#allocation8_spill] sm:$0xff] %v7144_v5  ;;  %v7165_v35 = vcombine.high %v7137_v36, %v7137_v36  ;;  %v2787_v22 = vcombine.high %v2691_v59, %v2691_v59  ;;  %v7168_v40 = vrot.slane %v2691_v59, %v7058_v45  ;;  %v5239_v30 = vrot.slane %v7137_v36, 9 }
 0x1fe   :  { %8079 = vst [vmem:[#allocation18_spill] sm:$0xff] %v7147_v27  ;;  %8080 = vst [vmem:[#allocation19_spill] sm:$0xff] %v7151_v21  ;;  %v2804_v32 = vcombine.high %v2692_v51, %v2692_v51  ;;  %v7171_v58 = vrot.slane %v2692_v51, %v7058_v45  ;;  %v2821_v39 = vcombine.high %v2693_v11, %v2693_v11 }
 0x1ff   :  { %8081 = vst [vmem:[#allocation12_spill] sm:$0xff] %v7154_v19  ;;  %8082 = vst [vmem:[#allocation15_spill] sm:$0xff] %v7158_v61  ;;  %v7174_v62 = vrot.slane %v2693_v11, %v7058_v45  ;;  %v2838_v63 = vcombine.high %v2694_v6, %v2694_v6  ;;  %v7177_v0 = vrot.slane %v2694_v6, %v7058_v45  ;;  %v5243_v49 = vrot.slane %v7168_v40, 9 }
 0x200   :  { %8083 = vst [vmem:[#allocation9_spill] sm:$0xff] %v7161_v8  ;;  %8084 = vst [vmem:[#allocation22_spill] sm:$0xff] %v7165_v35  ;;  %v7180_v2 = vrot.slane %v2787_v22, %v7058_v45  ;;  %v7184_v3 = vcombine.high %v7168_v40, %v7168_v40  ;;  %v7187_v7 = vrot.slane %v2804_v32, %v7058_v45 }
 0x201   :  { %8085 = vst [vmem:[#allocation25_spill] sm:$0xff] %v7171_v58  ;;  %8086 = vst [vmem:[#allocation10_spill] sm:$0xff] %v7174_v62  ;;  %v7191_v46 = vcombine.high %v7171_v58, %v7171_v58  ;;  %v7194_v9 = vrot.slane %v2821_v39, %v7058_v45  ;;  %v7198_v60 = vcombine.high %v7174_v62, %v7174_v62 }
 0x202   :  { %8087 = vst [vmem:[#allocation28_spill] sm:$0xff] %v7177_v0  ;;  %8088 = vst [vmem:[#allocation23_spill] sm:$0xff] %v7180_v2  ;;  %v7201_v53 = vrot.slane %v2838_v63, %v7058_v45  ;;  %v7205_v10 = vcombine.high %v7177_v0, %v7177_v0  ;;  %v7209_v52 = vcombine.high %v7180_v2, %v7180_v2  ;;  %v5244_v5 = vrot.slane %v7184_v3, 9 }
 0x203   :  { %8089 = vst [vmem:[#allocation24_spill] sm:$0xff] %v7184_v3  ;;  %8090 = vst [vmem:[#allocation26_spill] sm:$0xff] %v7187_v7  ;;  %v7213_v41 = vcombine.high %v7187_v7, %v7187_v7  ;;  %v2855_v24 = vcombine.high %v2695_v38, %v2695_v38  ;;  %v7216_v28 = vrot.slane %v2695_v38, %v7058_v45  ;;  %v5245_v19 = vrot.slane %v7180_v2, 9 }
 0x204   :  { %8091 = vst [vmem:[#allocation27_spill] sm:$0xff] %v7191_v46  ;;  %8092 = vst [vmem:[#allocation14_spill] sm:$0xff] %v7194_v9  ;;  %v7220_v31 = vcombine.high %v7194_v9, %v7194_v9  ;;  %v7224_v33 = vcombine.high %v7201_v53, %v7201_v53  ;;  %v2872_v34 = vcombine.high %v2696_v55, %v2696_v55  ;;  %v5248_v61 = vrot.slane %v7191_v46, 9 }
 0x205   :  { %8093 = vst [vmem:[#allocation29_spill] sm:$0xff] %v7198_v60  ;;  %8094 = vst [vmem:[#allocation11_spill] sm:$0xff] %v7201_v53  ;;  %v7227_v37 = vrot.slane %v2696_v55, %v7058_v45  ;;  %v7230_v26 = vrot.slane %v2855_v24, %v7058_v45  ;;  %v7234_v29 = vcombine.high %v7216_v28, %v7216_v28  ;;  %v5249_v56 = vrot.slane %v7187_v7, 9 }
 0x206   :  { %8095 = vst [vmem:[#allocation13_spill] sm:$0xff] %v7205_v10  ;;  %8096 = vst [vmem:[#allocation30_spill] sm:$0xff] %v7209_v52  ;;  %v2889_v43 = vcombine.high %v2697_v14, %v2697_v14  ;;  %v7237_v47 = vrot.slane %v2697_v14, %v7058_v45  ;;  %v7240_v50 = vrot.slane %v2872_v34, %v7058_v45  ;;  %v5250_v42 = vrot.slane %v7213_v41, 9 }
 0x207   :  { %8097 = vst [vmem:[#allocation31_spill] sm:$0xff] %v7213_v41  ;;  %8098 = vst [vmem:[#allocation32_spill] sm:$0xff] %v7216_v28  ;;  %v7244_v44 = vcombine.high %v7227_v37, %v7227_v37  ;;  %v2906_v48 = vcombine.high %v7114_v12, %v7114_v12  ;;  %v7250_v57 = vrot.slane %v7114_v12, %v7058_v45  ;;  %v5253_v8 = vrot.slane %v7194_v9, 9 }
 0x208   :  { %8099 = vst [vmem:[#allocation33_spill] sm:$0xff] %v7220_v31  ;;  %8100 = vst [vmem:[#allocation34_spill] sm:$0xff] %v7224_v33  ;;  %v7254_v59 = vcombine.high %v7230_v26, %v7230_v26  ;;  %v7257_v51 = vrot.slane %v2889_v43, %v7058_v45  ;;  %v7261_v11 = vcombine.high %v7237_v47, %v7237_v47  ;;  %v5247_v43 = vrot.slane %v7171_v58, 9 }
 0x209   :  { %8101 = vst [vmem:[#allocation35_spill] sm:$0xff] %v7227_v37  ;;  %8102 = vst [vmem:[#allocation36_spill] sm:$0xff] %v7230_v26  ;;  %v2923_v6 = vcombine.high %v7119_v15, %v7119_v15  ;;  %v7267_v54 = vcombine.high %v7240_v50, %v7240_v50  ;;  %v7270_v38 = vrot.slane %v2906_v48, %v7058_v45  ;;  %v5254_v3 = vrot.slane %v7220_v31, 9 }
 0x20a   :  { %8103 = vst [vmem:[#allocation37_spill] sm:$0xff] %v7234_v29  ;;  %8104 = vst [vmem:[#allocation38_spill] sm:$0xff] %v7237_v47  ;;  %v7274_v55 = vcombine.high %v7250_v57, %v7250_v57  ;;  %v7278_v14 = vrot.slane %v7119_v15, %v7058_v45  ;;  %v7282_v12 = vcombine.high %v7257_v51, %v7257_v51  ;;  %v5255_v2 = vrot.slane %v7177_v0, 9 }
 0x20b   :  { %8105 = vst [vmem:[#allocation39_spill] sm:$0xff] %v7240_v50  ;;  %8106 = vst [vmem:[#allocation40_spill] sm:$0xff] %v7244_v44  ;;  %v7285_v13 = vrot.slane %v2923_v6, %v7058_v45  ;;  %v2940_v20 = vcombine.high %v7121_v16, %v7121_v16  ;;  %v7291_v4 = vrot.slane %v7121_v16, %v7058_v45  ;;  %v5256_v27 = vrot.slane %v7205_v10, 9 }
 0x20c   :  { %8107 = vst [vmem:[#allocation41_spill] sm:$0xff] %v7250_v57  ;;  %8108 = vst [vmem:[#allocation42_spill] sm:$0xff] %v7254_v59  ;;  %v7295_v1 = vcombine.high %v7270_v38, %v7270_v38  ;;  %v7299_v15 = vcombine.high %v7278_v14, %v7278_v14  ;;  %v2957_v23 = vcombine.high %v7123_v25, %v7123_v25  ;;  %v5257_v52 = vrot.slane %v7201_v53, 9 }
 0x20d   :  { %8109 = vst [vmem:[#allocation43_spill] sm:$0xff] %v7257_v51  ;;  %8110 = vst [vmem:[#allocation44_spill] sm:$0xff] %v7261_v11  ;;  %v7305_v22 = vrot.slane %v7123_v25, %v7058_v45  ;;  %v7309_v32 = vcombine.high %v7285_v13, %v7285_v13  ;;  %v7312_v16 = vrot.slane %v2940_v20, %v7058_v45  ;;  %v5240_v20 = vrot.slane %v7165_v35, 9 }
 0x20e   :  { %8111 = vst [vmem:[#allocation45_spill] sm:$0xff] %v7267_v54  ;;  %8112 = vst [vmem:[#allocation46_spill] sm:$0xff] %v7270_v38  ;;  %v7316_v39 = vcombine.high %v7291_v4, %v7291_v4  ;;  %v2974_v63 = vcombine.high %v7125_v17, %v7125_v17  ;;  %v7321_v24 = vrot.slane %v2957_v23, %v7058_v45  ;;  %v5235_v23 = vrot.slane %v7134_v18, 9 }
 0x20f   :  { %8113 = vst [vmem:[#allocation47_spill] sm:$0xff] %v7274_v55  ;;  %8114 = vst [vmem:[#allocation48_spill] sm:$0xff] %v7278_v14  ;;  %v7325_v25 = vcombine.high %v7305_v22, %v7305_v22  ;;  %v7329_v34 = vrot.slane %v7125_v17, %v7058_v45  ;;  %v7334_v48 = vcombine.high %v7312_v16, %v7312_v16  ;;  %v5251_v35 = vrot.slane %v7174_v62, 9 }
 0x210   :  { %8115 = vst [vmem:[#allocation49_spill] sm:$0xff] %v7282_v12  ;;  %8116 = vst [vmem:[#allocation50_spill] sm:$0xff] %v7285_v13  ;;  %v7337_v6 = vrot.slane %v2974_v63, %v7058_v45  ;;  %v7343_v21 = vcombine.high %v7321_v24, %v7321_v24  ;;  %v5252_v45 = vrot.slane %v7198_v60, 9  ;;  %v5258_v46 = vrot.slane %v7224_v33, 9 }
 0x211   :  { %8117 = vst [vmem:[#allocation51_spill] sm:$0xff] %v7291_v4  ;;  %8118 = vst [vmem:[#allocation52_spill] sm:$0xff] %v7295_v1  ;;  %v7347_v17 = vcombine.high %v7329_v34, %v7329_v34  ;;  %v5259_v7 = vrot.slane %v7216_v28, 9  ;;  %v5260_v41 = vrot.slane %v7234_v29, 9  ;;  %v5261_v62 = vrot.slane %v7230_v26, 9 }
 0x212   :  { %8119 = vst [vmem:[#allocation53_spill] sm:$0xff] %v7299_v15  ;;  %8120 = vst [vmem:[#allocation54_spill] sm:$0xff] %v7305_v22  ;;  %v7353_v63 = vcombine.high %v7337_v6, %v7337_v6  ;;  %v5262_v60 = vrot.slane %v7254_v59, 9  ;;  %v5263_v9 = vrot.slane %v7227_v37, 9  ;;  %v5264_v31 = vrot.slane %v7244_v44, 9 }
 0x213   :  { %8121 = vst [vmem:[#allocation55_spill] sm:$0xff] %v7309_v32  ;;  %8122 = vst [vmem:[#allocation56_spill] sm:$0xff] %v7312_v16  ;;  %v5265_v0 = vrot.slane %v7240_v50, 9  ;;  %v5266_v10 = vrot.slane %v7267_v54, 9  ;;  %v5267_v53 = vrot.slane %v7237_v47, 9  ;;  %v5268_v33 = vrot.slane %v7261_v11, 9 }
 0x214   :  { %8123 = vst [vmem:[#allocation57_spill] sm:$0xff] %v7316_v39  ;;  %8124 = vst [vmem:[#allocation58_spill] sm:$0xff] %v7321_v24  ;;  %v5269_v28 = vrot.slane %v7257_v51, 9  ;;  %v5270_v29 = vrot.slane %v7282_v12, 9  ;;  %v5271_v26 = vrot.slane %v7250_v57, 9  ;;  %v5272_v59 = vrot.slane %v7274_v55, 9 }
 0x215   :  { %8125 = vst [vmem:[#allocation59_spill] sm:$0xff] %v7325_v25  ;;  %8126 = vst [vmem:[#allocation60_spill] sm:$0xff] %v7329_v34  ;;  %v5273_v37 = vrot.slane %v7270_v38, 9  ;;  %v5274_v44 = vrot.slane %v7295_v1, 9  ;;  %v5275_v50 = vrot.slane %v7278_v14, 9  ;;  %v5276_v54 = vrot.slane %v7299_v15, 9 }
 0x216   :  { %8127 = vst [vmem:[#allocation61_spill] sm:$0xff] %v7334_v48  ;;  %8128 = vst [vmem:[#allocation62_spill] sm:$0xff] %v7337_v6  ;;  %v5277_v47 = vrot.slane %v7285_v13, 9  ;;  %v5278_v11 = vrot.slane %v7309_v32, 9  ;;  %v5279_v51 = vrot.slane %v7291_v4, 9  ;;  %v5280_v12 = vrot.slane %v7316_v39, 9 }
 0x217   :  { %8129 = vst [vmem:[#allocation63_spill] sm:$0xff] %v7343_v21  ;;  %8130 = vst [vmem:[#allocation64_spill] sm:$0xff] %v7347_v17  ;;  %v5281_v57 = vrot.slane %v7312_v16, 9  ;;  %v5282_v55 = vrot.slane %v7334_v48, 9  ;;  %v5283_v38 = vrot.slane %v7305_v22, 9  ;;  %v5284_v1 = vrot.slane %v7325_v25, 9 }
 0x218   :  { %8131 = vst [vmem:[#allocation65_spill] sm:$0xff] %v7353_v63  ;;  %v5285_v14 = vrot.slane %v7321_v24, 9  ;;  %v5286_v15 = vrot.slane %v7343_v21, 9  ;;  %v5287_v13 = vrot.slane %v7329_v34, 9  ;;  %v5288_v32 = vrot.slane %v7347_v17, 9  ;;  %v8134_v22 = vld [vmem:[#allocation22_spill] sm:$0xff] }
 0x219   :  { %v5289_v4 = vrot.slane %v7337_v6, 9  ;;  %v5290_v39 = vrot.slane %v7353_v63, 9  ;;  %v7406_v16 = vmax.f32 %v7134_v18, %v5235_v23  ;;  %v7409_v48 = vmax.f32 %v7137_v36, %v5239_v30  ;;  %v8136_v21 = vld [vmem:[#allocation24_spill] sm:$0xff]  ;;  %v8137_v17 = vld [vmem:[#allocation23_spill] sm:$0xff]  ;;  %v8138_v6 = vld [vmem:[#allocation25_spill] sm:$0xff] }
 0x21a   :  { %v7412_v25 = vmax.f32 %v8134_v22, %v5240_v20  ;;  %v7415_v24 = vmax.f32 %v7168_v40, %v5243_v49  ;;  %v7418_v34 = vmax.f32 %v8136_v21, %v5244_v5  ;;  %v7421_v58 = vmax.f32 %v8137_v17, %v5245_v19  ;;  %v8139_v18 = vld [vmem:[#allocation27_spill] sm:$0xff]  ;;  %v8140_v30 = vld [vmem:[#allocation26_spill] sm:$0xff]  ;;  %v8144_v5 = vld [vmem:[#allocation29_spill] sm:$0xff] }
 0x21b   :  { %8132 = vst [vmem:[#allocation66_spill] sm:$0xff] %v7406_v16  ;;  %8133 = vst [vmem:[#allocation67_spill] sm:$0xff] %v7409_v48  ;;  %v7424_v63 = vmax.f32 %v8138_v6, %v5247_v43  ;;  %v7427_v23 = vmax.f32 %v8139_v18, %v5248_v61  ;;  %v7430_v36 = vmax.f32 %v8140_v30, %v5249_v56  ;;  %v8141_v22 = vld [vmem:[#allocation31_spill] sm:$0xff]  ;;  %v8143_v49 = vld [vmem:[#allocation10_spill] sm:$0xff] }
 0x21c   :  { %8135 = vst [vmem:[#allocation22_spill] sm:$0xff] %v7412_v25  ;;  %v7433_v20 = vmax.f32 %v8141_v22, %v5250_v42  ;;  %v7436_v40 = vmax.f32 %v8143_v49, %v5251_v35  ;;  %v7439_v21 = vmax.f32 %v8144_v5, %v5252_v45  ;;  %v8145_v19 = vld [vmem:[#allocation14_spill] sm:$0xff]  ;;  %v8146_v43 = vld [vmem:[#allocation33_spill] sm:$0xff]  ;;  %v8147_v61 = vld [vmem:[#allocation28_spill] sm:$0xff] }
 0x21d   :  { %v7442_v17 = vmax.f32 %v8145_v19, %v5253_v8  ;;  %v7445_v6 = vmax.f32 %v8146_v43, %v5254_v3  ;;  %v7448_v18 = vmax.f32 %v8147_v61, %v5255_v2  ;;  %v8148_v56 = vld [vmem:[#allocation13_spill] sm:$0xff]  ;;  %v8149_v42 = vld [vmem:[#allocation11_spill] sm:$0xff]  ;;  %v8150_v35 = vld [vmem:[#allocation34_spill] sm:$0xff] }
 0x21e   :  { %8142 = vst [vmem:[#allocation24_spill] sm:$0xff] %v7433_v20  ;;  %v7451_v30 = vmax.f32 %v8148_v56, %v5256_v27  ;;  %v7454_v22 = vmax.f32 %v8149_v42, %v5257_v52  ;;  %v7457_v49 = vmax.f32 %v8150_v35, %v5258_v46  ;;  %v8151_v45 = vld [vmem:[#allocation32_spill] sm:$0xff]  ;;  %v8152_v8 = vld [vmem:[#allocation37_spill] sm:$0xff]  ;;  %v8156_v2 = vld [vmem:[#allocation42_spill] sm:$0xff] }
 0x21f   :  { %v7460_v5 = vmax.f32 %v8151_v45, %v5259_v7  ;;  %v7463_v19 = vmax.f32 %v8152_v8, %v5260_v41  ;;  %v8154_v3 = vld [vmem:[#allocation36_spill] sm:$0xff]  ;;  %v7469_v61 = vmax.f32 %v8156_v2, %v5262_v60  ;;  %v8158_v27 = vld [vmem:[#allocation35_spill] sm:$0xff]  ;;  %v8161_v46 = vld [vmem:[#allocation45_spill] sm:$0xff] }
 0x220   :  { %v7466_v43 = vmax.f32 %v8154_v3, %v5261_v62  ;;  %v3283_v56 = vmax.f32 %v8158_v27, %v5263_v9  ;;  %v8159_v20 = vld [vmem:[#allocation40_spill] sm:$0xff]  ;;  %v8160_v42 = vld [vmem:[#allocation39_spill] sm:$0xff]  ;;  %v3286_v35 = vmax.f32 %v8161_v46, %v5266_v10  ;;  %v8162_v16 = vld [vmem:[#allocation38_spill] sm:$0xff] }
 0x221   :  { %8153 = vst [vmem:[#allocation23_spill] sm:$0xff] %v7463_v19  ;;  %8157 = vst [vmem:[#allocation27_spill] sm:$0xff] %v7469_v61  ;;  %v3284_v52 = vmax.f32 %v8159_v20, %v5264_v31  ;;  %v3285_v25 = vmax.f32 %v8160_v42, %v5265_v0  ;;  %v3287_v7 = vmax.f32 %v8162_v16, %v5267_v53  ;;  %v8163_v45 = vld [vmem:[#allocation44_spill] sm:$0xff]  ;;  %v8164_v41 = vld [vmem:[#allocation43_spill] sm:$0xff] }
 0x222   :  { %8155 = vst [vmem:[#allocation25_spill] sm:$0xff] %v7466_v43  ;;  %v3288_v48 = vmax.f32 %v8163_v45, %v5268_v33  ;;  %v3289_v8 = vmax.f32 %v8164_v41, %v5269_v28  ;;  %v8165_v19 = vld [vmem:[#allocation49_spill] sm:$0xff]  ;;  %v8167_v60 = vld [vmem:[#allocation47_spill] sm:$0xff]  ;;  %v8168_v61 = vld [vmem:[#allocation46_spill] sm:$0xff] }
 0x223   :  { %v3290_v62 = vmax.f32 %v8165_v19, %v5270_v29  ;;  %v8166_v3 = vld [vmem:[#allocation41_spill] sm:$0xff]  ;;  %v3292_v2 = vmax.f32 %v8167_v60, %v5272_v59  ;;  %v3293_v9 = vmax.f32 %v8168_v61, %v5273_v37  ;;  %v8169_v27 = vld [vmem:[#allocation52_spill] sm:$0xff]  ;;  %v8172_v46 = vld [vmem:[#allocation50_spill] sm:$0xff] }
 0x224   :  { %v3291_v43 = vmax.f32 %v8166_v3, %v5271_v26  ;;  %v3294_v31 = vmax.f32 %v8169_v27, %v5274_v44  ;;  %v8170_v20 = vld [vmem:[#allocation48_spill] sm:$0xff]  ;;  %v8171_v42 = vld [vmem:[#allocation53_spill] sm:$0xff]  ;;  %v3297_v53 = vmax.f32 %v8172_v46, %v5277_v47  ;;  %v8173_v16 = vld [vmem:[#allocation55_spill] sm:$0xff] }
 0x225   :  { %v3295_v0 = vmax.f32 %v8170_v20, %v5275_v50  ;;  %v3296_v10 = vmax.f32 %v8171_v42, %v5276_v54  ;;  %v3298_v33 = vmax.f32 %v8173_v16, %v5278_v11  ;;  %v8174_v45 = vld [vmem:[#allocation51_spill] sm:$0xff]  ;;  %v8175_v41 = vld [vmem:[#allocation57_spill] sm:$0xff]  ;;  %v8176_v19 = vld [vmem:[#allocation56_spill] sm:$0xff] }
 0x226   :  { %v3299_v28 = vmax.f32 %v8174_v45, %v5279_v51  ;;  %v3300_v29 = vmax.f32 %v8175_v41, %v5280_v12  ;;  %v3301_v26 = vmax.f32 %v8176_v19, %v5281_v57  ;;  %v8177_v3 = vld [vmem:[#allocation61_spill] sm:$0xff]  ;;  %v8178_v60 = vld [vmem:[#allocation54_spill] sm:$0xff]  ;;  %v8179_v61 = vld [vmem:[#allocation59_spill] sm:$0xff]  ;;  %v3319_v57 = vmax.f32 %v7415_v24, %v7424_v63 }
 0x227   :  { %v3302_v59 = vmax.f32 %v8177_v3, %v5282_v55  ;;  %v3303_v37 = vmax.f32 %v8178_v60, %v5283_v38  ;;  %v3304_v44 = vmax.f32 %v8179_v61, %v5284_v1  ;;  %v8180_v27 = vld [vmem:[#allocation58_spill] sm:$0xff]  ;;  %v8181_v20 = vld [vmem:[#allocation63_spill] sm:$0xff]  ;;  %v8182_v42 = vld [vmem:[#allocation60_spill] sm:$0xff]  ;;  %v3320_v38 = vmax.f32 %v7418_v34, %v7427_v23 }
 0x228   :  { %v3305_v50 = vmax.f32 %v8180_v27, %v5285_v14  ;;  %v3306_v54 = vmax.f32 %v8181_v20, %v5286_v15  ;;  %v3307_v47 = vmax.f32 %v8182_v42, %v5287_v13  ;;  %v8183_v46 = vld [vmem:[#allocation64_spill] sm:$0xff]  ;;  %v8184_v16 = vld [vmem:[#allocation62_spill] sm:$0xff]  ;;  %v8185_v45 = vld [vmem:[#allocation65_spill] sm:$0xff]  ;;  %v3321_v55 = vmax.f32 %v7421_v58, %v7430_v36 }
 0x229   :  { %v3308_v11 = vmax.f32 %v8183_v46, %v5288_v32  ;;  %v3309_v51 = vmax.f32 %v8184_v16, %v5289_v4  ;;  %v3310_v12 = vmax.f32 %v8185_v45, %v5290_v39  ;;  %v3323_v14 = vmax.f32 %v7436_v40, %v7448_v18  ;;  %v8186_v32 = vld [vmem:[#allocation23_spill] sm:$0xff]  ;;  %v8187_v24 = vld [vmem:[#allocation25_spill] sm:$0xff] }
 0x22a   :  { %v3324_v13 = vmax.f32 %v7439_v21, %v7451_v30  ;;  %v3325_v4 = vmax.f32 %v7442_v17, %v7454_v22  ;;  %v3326_v1 = vmax.f32 %v7445_v6, %v7457_v49  ;;  %v3327_v15 = vmax.f32 %v7460_v5, %v3283_v56  ;;  %v8188_v41 = vld [vmem:[#allocation27_spill] sm:$0xff]  ;;  %v8189_v56 = vld [vmem:[#allocation16_spill] sm:$0xff]  ;;  %v8190_v42 = vld [vmem:[#allocation21_spill] sm:$0xff] }
 0x22b   :  { %v3328_v39 = vmax.f32 %v8186_v32, %v3284_v52  ;;  %v3329_v63 = vmax.f32 %v8187_v24, %v3285_v25  ;;  %v3330_v19 = vmax.f32 %v8188_v41, %v3286_v35  ;;  %v3331_v40 = vmax.f32 %v3287_v7, %v3291_v43  ;;  %v8194_v32 = vld [vmem:[#allocation8_spill] sm:$0xff]  ;;  %v8195_v41 = vld [vmem:[#allocation19_spill] sm:$0xff] }
 0x22c   :  { %v3332_v18 = vmax.f32 %v3288_v48, %v3292_v2  ;;  %v3333_v3 = vmax.f32 %v3289_v8, %v3293_v9  ;;  %v3334_v21 = vmax.f32 %v3290_v62, %v3294_v31  ;;  %v3335_v30 = vmax.f32 %v3295_v0, %v3299_v28  ;;  %v6252_v34 = vld [vmem:[%s7950_s4 + $0x10] sm:$0xff]   ;;  %v6253_v58 = vld [vmem:[%s7950_s4 + $0xb8] sm:$0xff]  }
 0x22d   :  { %v3336_v17 = vmax.f32 %v3296_v10, %v3300_v29  ;;  %v3337_v22 = vmax.f32 %v3297_v53, %v3301_v26  ;;  %v3338_v60 = vmax.f32 %v3298_v33, %v3302_v59  ;;  %v3339_v61 = vmax.f32 %v3303_v37, %v3307_v47  ;;  %v6254_v23 = vld [vmem:[%s7950_s4 + $0xf0] sm:$0xff]   ;;  %5899 = vmatpush3.bf16.msra.mxu1 %v6252_v34  ;;  %v6273_v34 = vld [vmem:[%s7950_s4 + $0xd8] sm:$0xff]  }
 0x22e   :  { %v3340_v27 = vmax.f32 %v3304_v44, %v3308_v11  ;;  %v3341_v20 = vmax.f32 %v3305_v50, %v3309_v51  ;;  %v3342_v5 = vmax.f32 %v3306_v54, %v3310_v12  ;;  %v7518_v52 = vrot.slane %v3319_v57, %v8189_v56  ;;  %v8191_v51 = vld [vmem:[#allocation18_spill] sm:$0xff]  ;;  %5917 = vmatpush3.bf16.msra.mxu0 %v6253_v58 }
 0x22f   :  { %v7521_v25 = vrot.slane %v3323_v14, %v8189_v56  ;;  %v7524_v43 = vrot.slane %v3324_v13, %v8189_v56  ;;  %v7527_v48 = vrot.slane %v3325_v4, %v8189_v56  ;;  %v3442_v35 = vrot.slane %v3327_v15, %v8189_v56  ;;  %v8192_v14 = vld [vmem:[#allocation12_spill] sm:$0xff]  ;;  %v8193_v4 = vld [vmem:[#allocation9_spill] sm:$0xff]  ;;  %5918 = vmatprep.subr.bf16.mxu0 %v6254_v23 }
 0x230   :  { %v3446_v7 = vrot.slane %v3328_v39, %v8189_v56  ;;  %v7532_v8 = vrot.slane %v3329_v63, %v8189_v56  ;;  %v7535_v62 = vrot.slane %v3330_v19, %v8189_v56  ;;  %v3458_v2 = vrot.slane %v3331_v40, %v8189_v56  ;;  %v7718_v23 = vld [vmem:[%s7950_s4 + $0x118] sm:$0xff]  }
 0x231   :  { %v3462_v9 = vrot.slane %v3332_v18, %v8189_v56  ;;  %v3466_v31 = vrot.slane %v3333_v3, %v8189_v56  ;;  %v7541_v0 = vrot.slane %v3334_v21, %v8189_v56  ;;  %v3474_v10 = vrot.slane %v3335_v30, %v8189_v56 }
 0x232   :  { %v3478_v53 = vrot.slane %v3336_v17, %v8189_v56  ;;  %v3482_v33 = vrot.slane %v3337_v22, %v8189_v56  ;;  %v3486_v28 = vrot.slane %v3338_v60, %v8189_v56  ;;  %v3490_v29 = vrot.slane %v3339_v61, %v8189_v56  ;;  %v8196_v17 = vld [vmem:[#allocation17_spill] sm:$0xff] }
 0x233   :  { %v3494_v26 = vrot.slane %v3340_v27, %v8189_v56  ;;  %v3498_v59 = vrot.slane %v3341_v20, %v8189_v56  ;;  %v7551_v37 = vrot.slane %v3342_v5, %v8189_v56  ;;  %v7554_v44 = vsel %vm3503_vm3, %v3446_v7, %v3442_v35  ;;  %v8198_v5 = vld [vmem:[#allocation20_spill] sm:$0xff] }
 0x234   :  { %v3521_v50 = vsel %vm3503_vm3, %v3462_v9, %v3458_v2  ;;  %v3524_v54 = vsel %vm3503_vm3, %v3478_v53, %v3474_v10  ;;  %v2735_v47 = vcombine.high %v8190_v42, %v8190_v42  ;;  %v2752_v45 = vcombine.high %v8191_v51, %v8191_v51  ;;  %v8200_v10 = vld [vmem:[#allocation15_spill] sm:$0xff] }
 0x235   :  { %v7561_v46 = vsel %vm3505_vm4, %v3466_v31, %v3521_v50  ;;  %v3525_v11 = vsel %vm3505_vm4, %v3482_v33, %v3524_v54  ;;  %v3527_v16 = vsel %vm3503_vm3, %v3494_v26, %v3490_v29  ;;  %v2769_v13 = vcombine.high %v8192_v14, %v8192_v14 }
 0x236   :  { %v3526_v12 = vsel %vm3507_vm5, %v3486_v28, %v3525_v11  ;;  %v7569_v57 = vsel %vm3505_vm4, %v3498_v59, %v3527_v16  ;;  %v2786_v15 = vcombine.high %v8193_v4, %v8193_v4  ;;  %v5228_v39 = vrot.slane %v8194_v32, 9  ;;  %v8203_v16 = vld [vmem:[#allocation67_spill] sm:$0xff] }
 0x237   :  { %3546 = vst.msk [vmem:[#allocation4 + $0x49] sm:$0xf] %vm3539_vm6, %v3526_v12  ;;  %v5229_v24 = vrot.slane %v8190_v42, 9  ;;  %v5230_v63 = vrot.slane %v2735_v47, 9  ;;  %v5232_v19 = vrot.slane %v8195_v41, 9  ;;  %v5233_v40 = vrot.slane %v8191_v51, 9 }
 0x238   :  { %v5234_v18 = vrot.slane %v2752_v45, 9  ;;  %v5237_v3 = vrot.slane %v8192_v14, 9  ;;  %v5238_v21 = vrot.slane %v2769_v13, 9  ;;  %v5242_v30 = vrot.slane %v2786_v15, 9  ;;  %v8204_v12 = vld [vmem:[#allocation66_spill] sm:$0xff] }
 0x239   :  { %v8197_v22 = vrot.slane %v8196_v17, 9  ;;  %v3248_v61 = vmax.f32 %v8194_v32, %v5228_v39  ;;  %v3249_v27 = vmax.f32 %v8190_v42, %v5229_v24  ;;  %v3250_v20 = vmax.f32 %v2735_v47, %v5230_v63 }
 0x23a   :  { %v8199_v35 = vrot.slane %v8198_v5, 9  ;;  %v3252_v2 = vmax.f32 %v8195_v41, %v5232_v19  ;;  %v3253_v9 = vmax.f32 %v8191_v51, %v5233_v40  ;;  %v3254_v31 = vmax.f32 %v2752_v45, %v5234_v18  ;;  %v8205_v45 = vld [vmem:[#allocation22_spill] sm:$0xff] }
 0x23b   :  { %v3247_v60 = vmax.f32 %v8196_v17, %v8197_v22  ;;  %v8201_v53 = vrot.slane %v8200_v10, 9  ;;  %v3257_v28 = vmax.f32 %v8192_v14, %v5237_v3  ;;  %v3258_v29 = vmax.f32 %v2769_v13, %v5238_v21  ;;  %v8206_v3 = vld [vmem:[#allocation30_spill] sm:$0xff] }
 0x23c   :  { %v3251_v7 = vmax.f32 %v8198_v5, %v8199_v35  ;;  %v8202_v26 = vrot.slane %v8193_v4, 9  ;;  %v3262_v50 = vmax.f32 %v2786_v15, %v5242_v30  ;;  %v3312_v42 = vmax.f32 %v3248_v61, %v3252_v2  ;;  %v8208_v5 = vld [vmem:[#allocation24_spill] sm:$0xff] }
 0x23d   :  { %v3256_v33 = vmax.f32 %v8200_v10, %v8201_v53  ;;  %v3313_v47 = vmax.f32 %v3249_v27, %v3253_v9  ;;  %v3314_v11 = vmax.f32 %v3250_v20, %v3254_v31  ;;  %v3315_v51 = vmax.f32 %v8204_v12, %v8203_v16 }
 0x23e   :  { %v3261_v59 = vmax.f32 %v8193_v4, %v8202_v26  ;;  %v3311_v54 = vmax.f32 %v3247_v60, %v3251_v7  ;;  %v3318_v24 = vmax.f32 %v3258_v29, %v3262_v50  ;;  %v3382_v14 = vrot.slane %v3312_v42, %v8189_v56 }
 0x23f   :  { %v3316_v32 = vmax.f32 %v3256_v33, %v8205_v45  ;;  %v3386_v13 = vrot.slane %v3313_v47, %v8189_v56  ;;  %v3390_v4 = vrot.slane %v3314_v11, %v8189_v56  ;;  %v3394_v15 = vrot.slane %v3315_v51, %v8189_v56 }
 0x240   :  { %v3317_v39 = vmax.f32 %v3257_v28, %v3261_v59  ;;  %v3378_v63 = vrot.slane %v3311_v54, %v8189_v56  ;;  %v3406_v40 = vrot.slane %v3318_v24, %v8189_v56  ;;  %v8207_v21 = vrot.slane %v8206_v3, 9 }
 0x241   :  { %v3398_v41 = vrot.slane %v3316_v32, %v8189_v56  ;;  %v3414_v60 = vrot.slane %v3320_v38, %v8189_v56  ;;  %v3418_v61 = vrot.slane %v3321_v55, %v8189_v56  ;;  %v3438_v7 = vrot.slane %v3326_v1, %v8189_v56 }
 0x242   :  { %v3402_v19 = vrot.slane %v3317_v39, %v8189_v56  ;;  %v3504_v18 = vsel %vm3503_vm3, %v3382_v14, %v3378_v63  ;;  %v3266_v30 = vmax.f32 %v8206_v3, %v8207_v21  ;;  %v3515_v49 = vsel %vm3503_vm3, %v7524_v43, %v7521_v25 }
 0x243   :  { %v3506_v17 = vsel %vm3505_vm4, %v3386_v13, %v3504_v18  ;;  %v3509_v22 = vsel %vm3503_vm3, %v3398_v41, %v3394_v15  ;;  %v3512_v6 = vsel %vm3503_vm3, %v3414_v60, %v7518_v52  ;;  %v3523_v38 = vsel %vm3507_vm5, %v7541_v0, %v7561_v46  ;;  %v6264_v18 = vld [vmem:[%s7950_s4 + $0x40] sm:$0xff]  }
 0x244   :  { %v3508_v27 = vsel %vm3507_vm5, %v3390_v4, %v3506_v17  ;;  %v3510_v20 = vsel %vm3505_vm4, %v3402_v19, %v3509_v22  ;;  %v3322_v35 = vmax.f32 %v3266_v30, %v8208_v5  ;;  %v3513_v1 = vsel %vm3505_vm4, %v3418_v61, %v3512_v6  ;;  %3545 = vst.msk [vmem:[#allocation4 + $0x41] sm:$0xf] %vm3539_vm6, %v3523_v38  ;;  %v6262_v19 = vld [vmem:[%s7950_s4 + $0x8] sm:$0xff]   ;;  %v6265_v22 = vld [vmem:[%s7950_s4 + $0xe0] sm:$0xff]  }
 0x245   :  { %v3511_v36 = vsel %vm3507_vm5, %v3406_v40, %v3510_v20  ;;  %3540 = vst.msk [vmem:[#allocation4 + $0x9] sm:$0xf] %vm3539_vm6, %v3508_v27  ;;  %v3516_v2 = vsel %vm3505_vm4, %v7527_v48, %v3515_v49  ;;  %v3519_v52 = vsel %vm3505_vm4, %v7532_v8, %v7554_v44  ;;  %v3529_v0 = vsel %vm3507_vm5, %v7551_v37, %v7569_v57  ;;  %v6257_v48 = vld [vmem:[%s7950_s4 + $0xb0] sm:$0xff]   ;;  %v6258_v8 = vld [vmem:[%s7950_s4 + $0x48] sm:$0xff]   ;;  %v6268_v27 = vld [vmem:[%s7950_s4] sm:$0xff]  }
 0x246   :  { %3541 = vst.msk [vmem:[#allocation4 + $0x11] sm:$0xf] %vm3539_vm6, %v3511_v36  ;;  %v3422_v55 = vrot.slane %v3322_v35, %v8189_v56  ;;  %v3517_v25 = vsel %vm3507_vm5, %v3438_v7, %v3516_v2  ;;  %v3520_v43 = vsel %vm3507_vm5, %v7535_v62, %v3519_v52  ;;  %3547 = vst.msk [vmem:[#allocation4 + $0x51] sm:$0xf] %vm3539_vm6, %v3529_v0  ;;  %v6259_v62 = vld [vmem:[%s7950_s4 + $0xe8] sm:$0xff]   ;;  %5900 = vmatprep.subr.bf16.mxu1 %v6258_v8  ;;  %v6269_v7 = vld [vmem:[%s7950_s4 + $0xa0] sm:$0xff]  }
 0x247   :  { %3543 = vst.msk [vmem:[#allocation4 + $0x21] sm:$0xf] %vm3539_vm6, %v3517_v25  ;;  %3544 = vst.msk [vmem:[#allocation4 + $0x39] sm:$0xf] %vm3539_vm6, %v3520_v43  ;;  %5919 = vmatpush3.bf16.msra.mxu0 %v6257_v48  ;;  %v6263_v40 = vld [vmem:[%s7950_s4 + $0xa8] sm:$0xff]   ;;  %5901 = vmatpush3.bf16.msra.mxu1 %v6262_v19  ;;  %v6278_v0 = vld [vmem:[%s7950_s4 + $0xd0] sm:$0xff]  }
 0x248   :  { %v3514_v46 = vsel %vm3507_vm5, %v3422_v55, %v3513_v1  ;;  %5920 = vmatprep.subr.bf16.mxu0 %v6259_v62  ;;  %5902 = vmatprep.subr.bf16.mxu1 %v6264_v18  ;;  %v6277_v1 = vld [vmem:[%s7950_s4 + $0x98] sm:$0xff]  }
 0x249   :  { %3542 = vst.msk [vmem:[#allocation4 + $0x19] sm:$0xf] %vm3539_vm6, %v3514_v46 }
 0x24b   :  { %v6226_v53 = vld [vmem:[#allocation4 + $0x41] ss:$8 sps:$4 sm:$0xff]   ;;  %5921 = vmatpush3.bf16.msra.mxu0 %v6263_v40  ;;  %5903 = vmatpush3.bf16.msra.mxu1 %v6268_v27 }
 0x24c   :  { %v6223_v37 = vld [vmem:[#allocation4 + $0x1] ss:$8 sps:$4 sm:$0xff]   ;;  %v5548_v59 = vpack.c.bf16 %v6226_v53, %v6226_v53  ;;  %5922 = vmatprep.subr.bf16.mxu0 %v6265_v22  ;;  %6017 = vmatprep.subr.bf16.mxu1 %v7718_v23 }
 0x24d   :  { %v6222_v44 = vld [vmem:[#allocation4 + $0x8] ss:$8 sps:$4 sm:$0xff]   ;;  %v5545_v57 = vpack.c.bf16 %v6223_v37, %v6223_v37 }
 0x24e   :  { %v5553_v9 = vpack.c.bf16 %v6222_v44, %v6222_v44  ;;  %v6227_v29 = vld [vmem:[#allocation4 + $0x31] ss:$8 sps:$4 sm:$0xff]   ;;  %v6250_v11 = vld [vmem:[#allocation4 + $0x2] ss:$8 sps:$4 sm:$0xff]  }
 0x24f   :  { %3659 = vrot.lane.b32.xlu0 %v5545_v57, %s6317_s13  ;;  %v6228_v26 = vld [vmem:[#allocation4 + $0x48] ss:$8 sps:$4 sm:$0xff]   ;;  %v5547_v50 = vpack.c.bf16 %v6227_v29, %v6227_v29  ;;  %v6229_v54 = vld [vmem:[#allocation4 + $0x38] ss:$8 sps:$4 sm:$0xff]   ;;  %v5549_v45 = vpack.c.bf16 %v6250_v11, %v6250_v11  ;;  %5923 = vmatpush3.bf16.msra.mxu0 %v6269_v7 }
 0x250   :  { %v6224_v31 = vld [vmem:[#allocation4 + $0x18] ss:$8 sps:$4 sm:$0xff]   ;;  %3756 = vrot.lane.b32.xlu1 %v5553_v9, %s6317_s13  ;;  %v6231_v47 = vld [vmem:[#allocation4 + $0xa] ss:$8 sps:$4 sm:$0xff]   ;;  %v5556_v12 = vpack.c.bf16 %v6228_v26, %v6228_v26  ;;  %v5555_v51 = vpack.c.bf16 %v6229_v54, %v6229_v54  ;;  %5924 = vmatprep.subr.bf16.mxu0 %v6273_v34 }
 0x251   :  { %v6225_v10 = vld [vmem:[#allocation4 + $0x11] ss:$8 sps:$4 sm:$0xff]   ;;  %v5554_v33 = vpack.c.bf16 %v6224_v31, %v6224_v31  ;;  %v6251_v16 = vld [vmem:[#allocation4] ss:$8 sps:$4 sm:$0xff]   ;;  %3716 = vst.msk [vmem:[#allocation5 + $0x4] sm:$0xf] %vm3539_vm6, %v5549_v45  ;;  %v5561_v21 = vpack.c.bf16 %v6231_v47, %v6231_v47 }
 0x252   :  { %v5546_v28 = vpack.c.bf16 %v6225_v10, %v6225_v10  ;;  %v6230_v42 = vld [vmem:[#allocation4 + $0x1a] ss:$8 sps:$4 sm:$0xff]   ;;  %v5541_v39 = vpack.c.bf16 %v6251_v16, %v6251_v16  ;;  %v6234_v20 = vld [vmem:[#allocation4 + $0x4a] ss:$8 sps:$4 sm:$0xff]  }
 0x253   :  { %v6255_v32 = vld [vmem:[#allocation4 + $0x12] ss:$8 sps:$4 sm:$0xff]   ;;  %v6232_v63 = vld [vmem:[#allocation4 + $0x21] ss:$8 sps:$4 sm:$0xff]   ;;  %v5562_v3 = vpack.c.bf16 %v6230_v42, %v6230_v42  ;;  %v5564_v48 = vpack.c.bf16 %v6234_v20, %v6234_v20  ;;  %5925 = vmatpush3.bf16.msra.mxu0 %v6277_v1 }
 0x254   :  { %3758 = vrot.lane.b32.xlu1 %v5554_v33, %s6317_s13  ;;  %3661 = vrot.lane.b32.xlu0 %v5546_v28, %s6317_s13  ;;  %v6256_v24 = vld [vmem:[#allocation4 + $0x10] ss:$8 sps:$4 sm:$0xff]   ;;  %v5550_v13 = vpack.c.bf16 %v6255_v32, %v6255_v32  ;;  %v6260_v4 = vld [vmem:[#allocation4 + $0x40] ss:$8 sps:$4 sm:$0xff]   ;;  %3619 = vst.msk [vmem:[#allocation5] sm:$0xf] %vm3539_vm6, %v5541_v39  ;;  %v5570_v6 = vpack.c.bf16 %v6232_v63, %v6232_v63 }
 0x255   :  { %v6233_v14 = vld [vmem:[#allocation4 + $0x11] ss:$8 sps:$4 sm:$0xff]   ;;  %v5542_v41 = vpack.c.bf16 %v6256_v24, %v6256_v24  ;;  %v5544_v30 = vpack.c.bf16 %v6260_v4, %v6260_v4  ;;  %v6266_v60 = vld [vmem:[#allocation4 + $0x42] ss:$8 sps:$4 sm:$0xff]   ;;  %5926 = vmatprep.subr.bf16.mxu0 %v6278_v0 }
 0x256   :  { %v6261_v15 = vld [vmem:[#allocation4 + $0x30] ss:$8 sps:$4 sm:$0xff]   ;;  %3717 = vst.msk [vmem:[#allocation5 + $0x18] sm:$0xf] %vm3539_vm6, %v5550_v13  ;;  %v5552_v35 = vpack.c.bf16 %v6266_v60, %v6266_v60  ;;  %v5569_v49 = vpack.c.bf16 %v6233_v14, %v6233_v14  ;;  %v6279_v25 = vld [vmem:[#allocation4 + $0x20] ss:$8 sps:$4 sm:$0xff]  }
 0x257   :  { %v5543_v17 = vpack.c.bf16 %v6261_v15, %v6261_v15  ;;  %3620 = vst.msk [vmem:[#allocation5 + $0x14] sm:$0xf] %vm3539_vm6, %v5542_v41  ;;  %v6267_v61 = vld [vmem:[#allocation4 + $0x32] ss:$8 sps:$4 sm:$0xff]   ;;  %3622 = vst.msk [vmem:[#allocation5 + $0x3c] sm:$0xf] %vm3539_vm6, %v5544_v30  ;;  %v5566_v62 = vpack.c.bf16 %v6279_v25, %v6279_v25 }
 0x258   :  { %3665 = vrot.lane.b32.xlu1 %v5548_v59, %s6317_s13  ;;  %3663 = vrot.lane.b32.xlu0 %v5547_v50, %s6317_s13  ;;  %v6235_v5 = vld [vmem:[#allocation4 + $0x3a] ss:$8 sps:$4 sm:$0xff]   ;;  %v5551_v58 = vpack.c.bf16 %v6267_v61, %v6267_v61  ;;  %3719 = vst.msk [vmem:[#allocation5 + $0x40] sm:$0xf] %vm3539_vm6, %v5552_v35  ;;  %v6276_v38 = vld [vmem:[#allocation4 + $0x9] ss:$8 sps:$4 sm:$0xff]  }
 0x259   :  { %3621 = vst.msk [vmem:[#allocation5 + $0x28] sm:$0xf] %vm3539_vm6, %v5543_v17  ;;  %v6275_v36 = vld [vmem:[#allocation4 + $0x19] ss:$8 sps:$4 sm:$0xff]   ;;  %v5557_v52 = vpack.c.bf16 %v6276_v38, %v6276_v38  ;;  %v5563_v8 = vpack.c.bf16 %v6235_v5, %v6235_v5  ;;  %v6282_v37 = vld [vmem:[%s7950_s4 + $0x90] sm:$0xff]   ;;  %v6285_v31 = vld [vmem:[%s7950_s4 + $0xc8] sm:$0xff]  }
 0x25a   :  { %3718 = vst.msk [vmem:[#allocation5 + $0x2c] sm:$0xf] %vm3539_vm6, %v5551_v58  ;;  %v5558_v55 = vpack.c.bf16 %v6275_v36, %v6275_v36  ;;  %v6236_v2 = vld [vmem:[#allocation4 + $0x51] ss:$8 sps:$4 sm:$0xff]   ;;  %v6237_v43 = vld [vmem:[#allocation4 + $0x41] ss:$8 sps:$4 sm:$0xff]   ;;  %5927 = vmatpush3.bf16.msra.mxu0 %v6282_v37 }
 0x25b   :  { %v6280_v46 = vld [vmem:[#allocation4 + $0x10] ss:$8 sps:$4 sm:$0xff]   ;;  %3812 = vst.msk [vmem:[#allocation5 + $0x8] sm:$0xf] %vm3539_vm6, %v5557_v52  ;;  %3910 = vst.msk [vmem:[#allocation5 + $0x20] sm:$0xf] %vm3539_vm6, %v5566_v62  ;;  %v5572_v28 = vpack.c.bf16 %v6236_v2, %v6236_v2  ;;  %v5571_v29 = vpack.c.bf16 %v6237_v43, %v6237_v43  ;;  %5928 = vmatprep.subr.bf16.mxu0 %v6285_v31 }
 0x25c   :  { %3762 = vrot.lane.b32.xlu1 %v5556_v12, %s6317_s13  ;;  %3760 = vrot.lane.b32.xlu0 %v5555_v51, %s6317_s13  ;;  %3813 = vst.msk [vmem:[#allocation5 + $0x1c] sm:$0xf] %vm3539_vm6, %v5558_v55  ;;  %v6286_v44 = vld [vmem:[#allocation4 + $0x49] ss:$8 sps:$4 sm:$0xff]   ;;  %v5565_v57 = vpack.c.bf16 %v6280_v46, %v6280_v46  ;;  %v6287_v9 = vld [vmem:[#allocation4 + $0x39] ss:$8 sps:$4 sm:$0xff]  }
 0x25d   :  { %v5560_v10 = vpack.c.bf16 %v6286_v44, %v6286_v44  ;;  %v5559_v53 = vpack.c.bf16 %v6287_v9, %v6287_v9  ;;  %v6290_v33 = vld [vmem:[#allocation4 + $0x12] ss:$8 sps:$4 sm:$0xff]   ;;  %v6289_v26 = vld [vmem:[%s7950_s4 + $0x88] sm:$0xff]   ;;  %v6293_v11 = vld [vmem:[%s7950_s4 + $0xc0] sm:$0xff]  }
 0x25e   :  { %3909 = vst.msk [vmem:[#allocation5 + $0xc] sm:$0xf] %vm3539_vm6, %v5565_v57  ;;  %v6291_v59 = vld [vmem:[#allocation4 + $0x22] ss:$8 sps:$4 sm:$0xff]   ;;  %v5573_v50 = vpack.c.bf16 %v6290_v33, %v6290_v33  ;;  %v6294_v54 = vld [vmem:[#allocation4 + $0x50] ss:$8 sps:$4 sm:$0xff]   ;;  %5929 = vmatpush3.bf16.msra.mxu0 %v6289_v26 }
 0x25f   :  { %3815 = vst.msk [vmem:[#allocation5 + $0x44] sm:$0xf] %vm3539_vm6, %v5560_v10  ;;  %3814 = vst.msk [vmem:[#allocation5 + $0x30] sm:$0xf] %vm3539_vm6, %v5559_v53  ;;  %v6295_v42 = vld [vmem:[#allocation4 + $0x40] ss:$8 sps:$4 sm:$0xff]   ;;  %v5574_v47 = vpack.c.bf16 %v6291_v59, %v6291_v59  ;;  %v5568_v16 = vpack.c.bf16 %v6294_v54, %v6294_v54  ;;  %5930 = vmatprep.subr.bf16.mxu0 %v6293_v11 }
 0x260   :  { %3854 = vrot.lane.b32.xlu1 %v5562_v3, %s6317_s13  ;;  %3852 = vrot.lane.b32.xlu0 %v5561_v21, %s6317_s13  ;;  %4005 = vst.msk [vmem:[#allocation5 + $0x10] sm:$0xf] %vm3539_vm6, %v5573_v50  ;;  %v5567_v12 = vpack.c.bf16 %v6295_v42, %v6295_v42  ;;  %v6301_v51 = vld [vmem:[#allocation4 + $0x42] ss:$8 sps:$4 sm:$0xff]   ;;  %v6302_v45 = vld [vmem:[#allocation4 + $0x52] ss:$8 sps:$4 sm:$0xff]  }
 0x261   :  { %4006 = vst.msk [vmem:[#allocation5 + $0x24] sm:$0xf] %vm3539_vm6, %v5574_v47  ;;  %3912 = vst.msk [vmem:[#allocation5 + $0x48] sm:$0xf] %vm3539_vm6, %v5568_v16  ;;  %v6297_v32 = vld [vmem:[%s7950_s4 + $0x80] sm:$0xff]   ;;  %v5575_v39 = vpack.c.bf16 %v6301_v51, %v6301_v51  ;;  %v5576_v24 = vpack.c.bf16 %v6302_v45, %v6302_v45  ;;  %v6281_v21 = vld [vmem:[%s7950_s4 + $0x110] sm:$0xff]  }
 0x262   :  { %3911 = vst.msk [vmem:[#allocation5 + $0x34] sm:$0xf] %vm3539_vm6, %v5567_v12  ;;  %5931 = vmatpush3.bf16.msra.mxu0 %v6297_v32  ;;  %v6288_v22 = vld [vmem:[%s7950_s4 + $0x108] sm:$0xff]   ;;  %v6296_v7 = vld [vmem:[%s7950_s4 + $0x100] sm:$0xff]   ;;  %v4826_v52 = vld [vmem:[%s7952_s7 + $0xf8] sm:$0xff] }
 0x263   :  { %4007 = vst.msk [vmem:[#allocation5 + $0x38] sm:$0xf] %vm3539_vm6, %v5575_v39  ;;  %4008 = vst.msk [vmem:[#allocation5 + $0x4c] sm:$0xf] %vm3539_vm6, %v5576_v24  ;;  %v4810_v25 = vld [vmem:[%s7952_s7 + $0x78] sm:$0xff]  ;;  %v4825_v43 = vld [vmem:[%s7952_s7 + $0xf0] sm:$0xff] }
 0x264   :  { %3951 = vrot.lane.b32.xlu1 %v5570_v6, %s6317_s13  ;;  %3949 = vrot.lane.b32.xlu0 %v5569_v49, %s6317_s13  ;;  %v4809_v0 = vld [vmem:[%s7952_s7 + $0x70] sm:$0xff]  ;;  %v4824_v46 = vld [vmem:[%s7952_s7 + $0xe8] sm:$0xff] }
 0x265   :  { %v4807_v37 = vld [vmem:[%s7952_s7 + $0x60] sm:$0xff]  ;;  %v4822_v44 = vld [vmem:[%s7952_s7 + $0xd8] sm:$0xff]  ;;  %v4821_v31 = vld [vmem:[%s7952_s7 + $0xd0] sm:$0xff] }
 0x266   :  { %v4806_v9 = vld [vmem:[%s7952_s7 + $0x58] sm:$0xff]  ;;  %v4805_v53 = vld [vmem:[%s7952_s7 + $0x50] sm:$0xff]  ;;  %v4820_v33 = vld [vmem:[%s7952_s7 + $0xc8] sm:$0xff] }
 0x267   :  { %v4819_v26 = vld [vmem:[%s7952_s7 + $0xc0] sm:$0xff]  ;;  %v4818_v54 = vld [vmem:[%s7952_s7 + $0xb8] sm:$0xff]  ;;  %v4817_v11 = vld [vmem:[%s7952_s7 + $0xb0] sm:$0xff] }
 0x268   :  { %3858 = vrot.lane.b32.xlu1 %v5564_v48, %s6317_s13  ;;  %3856 = vrot.lane.b32.xlu0 %v5563_v8, %s6317_s13  ;;  %v6292_v34 = vld [vmem:[#allocation5 + $0x10] ss:$20 sps:$4 sm:$0xff]   ;;  %v4808_v48 = vld [vmem:[%s7952_s7 + $0x68] sm:$0xff]  ;;  %v4802_v47 = vld [vmem:[%s7952_s7 + $0x38] sm:$0xff] }
 0x269   :  { %v4823_v8 = vld [vmem:[%s7952_s7 + $0xe0] sm:$0xff]  ;;  %v4801_v12 = vld [vmem:[%s7952_s7 + $0x30] sm:$0xff]  ;;  %v4816_v51 = vld [vmem:[%s7952_s7 + $0xa8] sm:$0xff] }
 0x26a   :  { %v6303_v55 = vld [vmem:[#allocation5 + $0x38] ss:$20 sps:$4 sm:$0xff]   ;;  %v4803_v50 = vld [vmem:[%s7952_s7 + $0x40] sm:$0xff] }
 0x26b   :  { %v4800_v32 = vld [vmem:[%s7952_s7 + $0x28] sm:$0xff]  ;;  %v4815_v39 = vld [vmem:[%s7952_s7 + $0xa0] sm:$0xff] }
 0x26c   :  { %3955 = vrot.lane.b32.xlu1 %v5572_v28, %s6317_s13  ;;  %3953 = vrot.lane.b32.xlu0 %v5571_v29, %s6317_s13  ;;  %v4804_v29 = vld [vmem:[%s7952_s7 + $0x48] sm:$0xff] }
 0x2c1   :  { %v3660_v63 = vpop.permute.xlu0 %3659 }
 0x2c2   :  { %v3757_v14 = vpop.permute.xlu1 %3756  ;;  %3672 = vst.msk [vmem:[#allocation5] sm:$0xf] %vm3671_vm7, %v3660_v63  ;;  %v4799_v63 = vld [vmem:[%s7952_s7 + $0x20] sm:$0xff] }
 0x2c3   :  { %3768 = vst.msk [vmem:[#allocation5 + $0x4] sm:$0xf] %vm3671_vm7, %v3757_v14 }
 0x2c6   :  { %v3759_v13 = vpop.permute.xlu1 %3758  ;;  %v3662_v4 = vpop.permute.xlu0 %3661 }
 0x2c7   :  { %3769 = vst.msk [vmem:[#allocation5 + $0x18] sm:$0xf] %vm3671_vm7, %v3759_v13  ;;  %3673 = vst.msk [vmem:[#allocation5 + $0x14] sm:$0xf] %vm3671_vm7, %v3662_v4  ;;  %v4814_v13 = vld [vmem:[%s7952_s7 + $0x98] sm:$0xff] }
 0x2c8   :  { %v4798_v4 = vld [vmem:[%s7952_s7 + $0x18] sm:$0xff] }
 0x2ca   :  { %v3666_v15 = vpop.permute.xlu1 %3665  ;;  %v3664_v41 = vpop.permute.xlu0 %3663 }
 0x2cb   :  { %3675 = vst.msk [vmem:[#allocation5 + $0x3c] sm:$0xf] %vm3671_vm7, %v3666_v15  ;;  %3674 = vst.msk [vmem:[#allocation5 + $0x28] sm:$0xf] %vm3671_vm7, %v3664_v41 }
 0x2ce   :  { %v3763_v19 = vpop.permute.xlu1 %3762  ;;  %v3761_v40 = vpop.permute.xlu0 %3760  ;;  %v6270_v18 = vld [vmem:[#allocation5] ss:$20 sps:$4 sm:$0xff]   ;;  %v6272_v3 = vld [vmem:[#allocation5 + $0x4] ss:$20 sps:$4 sm:$0xff]  }
 0x2cf   :  { %3771 = vst.msk [vmem:[#allocation5 + $0x40] sm:$0xf] %vm3671_vm7, %v3763_v19  ;;  %3770 = vst.msk [vmem:[#allocation5 + $0x2c] sm:$0xf] %vm3671_vm7, %v3761_v40  ;;  %4397 = vmatprep.mubr.bf16.mxu1 %v6272_v3  ;;  %v4813_v19 = vld [vmem:[%s7952_s7 + $0x90] sm:$0xff] }
 0x2d0   :  { %4398 = vmatmul.mubr.bf16.vlgmr.msra.gmra.mxu1 %v6270_v18  ;;  %v4797_v40 = vld [vmem:[%s7952_s7 + $0x10] sm:$0xff] }
 0x2d1   :  { %6018 = vmatpush3.bf16.msra.mxu1 %v7718_v23 }
 0x2d2   :  { %v3855_v30 = vpop.permute.xlu1 %3854  ;;  %v3853_v17 = vpop.permute.xlu0 %3852  ;;  %6019 = vmatprep.subr.bf16.mxu1 %v6281_v21 }
 0x2d3   :  { %3865 = vst.msk [vmem:[#allocation5 + $0x1c] sm:$0xf] %vm3671_vm7, %v3855_v30  ;;  %3864 = vst.msk [vmem:[#allocation5 + $0x8] sm:$0xf] %vm3671_vm7, %v3853_v17 }
 0x2d5   :  { %6020 = vmatpush3.bf16.msra.mxu1 %v6281_v21 }
 0x2d6   :  { %v3952_v60 = vpop.permute.xlu1 %3951  ;;  %v3950_v61 = vpop.permute.xlu0 %3949  ;;  %v4015_v27 = vld [vmem:[#allocation5 + $0x28] sm:$0xff]  ;;  %v4018_v20 = vld [vmem:[#allocation5 + $0x3c] sm:$0xff]  ;;  %6021 = vmatprep.subr.bf16.mxu1 %v6288_v22 }
 0x2d7   :  { %v6283_v5 = vld [vmem:[#allocation5 + $0x2c] ss:$20 sps:$4 sm:$0xff]   ;;  %3962 = vst.msk [vmem:[#allocation5 + $0x20] sm:$0xf] %vm3671_vm7, %v3952_v60  ;;  %3961 = vst.msk [vmem:[#allocation5 + $0xc] sm:$0xf] %vm3671_vm7, %v3950_v61  ;;  %v5332_v35 = vcombine.low %v4015_v27, %v4018_v20 }
 0x2d8   :  { %4405 = vmatprep.mubr.bf16.mxu1 %v6283_v5 }
 0x2d9   :  { %4406 = vmatmul.mubr.bf16.gmra.mxu1 %v5332_v35 }
 0x2da   :  { %v3859_v58 = vpop.permute.xlu1 %3858  ;;  %v3857_v23 = vpop.permute.xlu0 %3856  ;;  %6022 = vmatpush3.bf16.msra.mxu1 %v6288_v22  ;;  %6025 = vmatprep.mubr.msk.bf16.mxu1 %vm2515_vm0, %v6292_v34  ;;  %v6298_v49 = vld [vmem:[#allocation5 + $0x8] ss:$20 sps:$4 sm:$0xff]  }
 0x2db   :  { %3867 = vst.msk [vmem:[#allocation5 + $0x44] sm:$0xf] %vm3671_vm7, %v3859_v58  ;;  %3866 = vst.msk [vmem:[#allocation5 + $0x30] sm:$0xf] %vm3671_vm7, %v3857_v23  ;;  %6023 = vmatprep.subr.bf16.mxu1 %v6296_v7 }
 0x2de   :  { %v3956_v36 = vpop.permute.xlu1 %3955  ;;  %v3954_v6 = vpop.permute.xlu0 %3953  ;;  %6024 = vmatpush3.bf16.msra.mxu1 %v6296_v7  ;;  %v6300_v38 = vld [vmem:[#allocation5 + $0xc] ss:$20 sps:$4 sm:$0xff]  }
 0x2df   :  { %3964 = vst.msk [vmem:[#allocation5 + $0x48] sm:$0xf] %vm3671_vm7, %v3956_v36  ;;  %3963 = vst.msk [vmem:[#allocation5 + $0x34] sm:$0xf] %vm3671_vm7, %v3954_v6  ;;  %4446 = vmatprep.mubr.bf16.mxu0 %v6300_v38  ;;  %5950 = vmatprep.subr.mxu1 %v4826_v52 }
 0x2e0   :  { %4447 = vmatmul.mubr.bf16.vlgmr.msra.gmra.mxu0 %v6298_v49 }
 0x2e1   :  { %6026 = vmatmul.mubr.msk.bf16.vlgmr.msra.gmra.mxu1 %vm2515_vm0, %v6303_v55 }
 0x2e2   :  { %v6306_v2 = vld [vmem:[#allocation5 + $0x30] ss:$20 sps:$4 sm:$0xff]   ;;  %5951 = vmatpush3.msra.mxu1 %v4810_v25 }
 0x2e3   :  { %5952 = vmatprep.subr.mxu1 %v4825_v43 }
 0x2e4   :  { %5953 = vmatpush3.msra.mxu1 %v4809_v0 }
 0x2e5   :  { %5954 = vmatprep.subr.mxu1 %v4824_v46 }
 0x2e6   :  { %v6304_v1 = vld [vmem:[#allocation5 + $0x34] ss:$20 sps:$4 sm:$0xff]   ;;  %5955 = vmatpush3.msra.mxu1 %v4808_v48 }
 0x2e7   :  { %4454 = vmatprep.mubr.bf16.mxu0 %v6304_v1  ;;  %5956 = vmatprep.subr.mxu1 %v4823_v8 }
 0x2e8   :  { %4455 = vmatmul.mubr.bf16.gmra.mxu0 %v6306_v2  ;;  %5957 = vmatpush3.msra.mxu1 %v4807_v37 }
 0x2e9   :  { %5958 = vmatprep.subr.mxu1 %v4822_v44 }
 0x2ea   :  { %5959 = vmatpush3.msra.mxu1 %v4806_v9 }
 0x2eb   :  { %5960 = vmatprep.subr.mxu1 %v4821_v31 }
 0x2ec   :  { %5961 = vmatpush3.msra.mxu1 %v4805_v53 }
 0x2ed   :  { %5962 = vmatprep.subr.mxu1 %v4820_v33 }
 0x2ee   :  { %5963 = vmatpush3.msra.mxu1 %v4804_v29 }
 0x2ef   :  { %5964 = vmatprep.subr.mxu1 %v4819_v26 }
 0x2f0   :  { %5965 = vmatpush3.msra.mxu1 %v4803_v50 }
 0x2f1   :  { %5966 = vmatprep.subr.mxu1 %v4818_v54 }
 0x2f2   :  { %5967 = vmatpush3.msra.mxu1 %v4802_v47 }
 0x2f3   :  { %5968 = vmatprep.subr.mxu1 %v4817_v11 }
 0x2f4   :  { %5969 = vmatpush3.msra.mxu1 %v4801_v12 }
 0x2f5   :  { %5970 = vmatprep.subr.mxu1 %v4816_v51 }
 0x2f6   :  { %5971 = vmatpush3.msra.mxu1 %v4800_v32 }
 0x2f7   :  { %5972 = vmatprep.subr.mxu1 %v4815_v39 }
 0x2f8   :  { %5973 = vmatpush3.msra.mxu1 %v4799_v63 }
 0x2f9   :  { %5974 = vmatprep.subr.mxu1 %v4814_v13 }
 0x2fa   :  { %5975 = vmatpush3.msra.mxu1 %v4798_v4 }
 0x2fb   :  { %5976 = vmatprep.subr.mxu1 %v4813_v19 }
 0x2fc   :  { %5977 = vmatpush3.msra.mxu1 %v4797_v40  ;;  %v5375_v40 = vld [vmem:[%s7953_s5] ss:$0 sm:$0xff] }
 0x390   :  { %v5904_v62 = vpop.f32.mrf.mxu1 }
 0x392   :  { %v5905_v57 = vpop.f32.mrf.mxu1 }
 0x393   :  { %v5906_v17 = vadd.f32 %v5905_v57, %v5904_v62 }
 0x394   :  { %v5907_v10 = vpop.f32.mrf.mxu1 }
 0x396   :  { %v5908_v28 = vpop.f32.mrf.mxu1 }
 0x397   :  { %v5909_v22 = vadd.f32 %v5908_v28, %v5907_v10 }
 0x399   :  { %v5910_v59 = vpop.f32.mrf.mxu1 }
 0x39b   :  { %v5911_v42 = vpop.f32.mrf.mxu1 }
 0x39c   :  { %v5912_v7 = vadd.f32 %v5911_v42, %v5910_v59 }
 0x39d   :  { %v5913_v16 = vpop.f32.mrf.mxu1 }
 0x39f   :  { %v5914_v45 = vpop.f32.mrf.mxu1 }
 0x3a0   :  { %v5932_v14 = vpop.f32.mrf.mxu0  ;;  %v5915_v38 = vadd.f32 %v5914_v45, %v5913_v16 }
 0x3a1   :  { %v6027_v24 = vpop.f32.mrf.mxu1 }
 0x3a2   :  { %v5933_v15 = vpop.f32.mrf.mxu0 }
 0x3a3   :  { %v4497_v41 = vpop.f32.mrf.mxu1  ;;  %v5934_v3 = vadd.f32 %v5933_v15, %v5932_v14 }
 0x3a4   :  { %v5935_v18 = vpop.f32.mrf.mxu0 }
 0x3a5   :  { %v6028_v21 = vpop.f32.mrf.mxu1  ;;  %v4449_v27 = vadd.f32 %v5934_v3, %v5906_v17  ;;  %v5376_v17 = vld [vmem:[%s7954_s6] ss:$0 sm:$0xff] }
 0x3a6   :  { %v5936_v30 = vpop.f32.mrf.mxu0 }
 0x3a7   :  { %v5937_v60 = vadd.f32 %v5936_v30, %v5935_v18  ;;  %v4500_v5 = vpop.f32.mrf.mxu1  ;;  %v4498_v36 = vadd.f32 %v4497_v41, %v4449_v27 }
 0x3a8   :  { %v5938_v61 = vpop.f32.mrf.mxu0 }
 0x3a9   :  { %v4452_v20 = vadd.f32 %v5937_v60, %v5909_v22  ;;  %v4514_v52 = vsel %vm2515_vm0, %v4498_v36, 0.0 }
 0x3aa   :  { %v5939_v35 = vpop.f32.mrf.mxu0 }
 0x3ab   :  { %v4501_v34 = vadd.f32 %v4500_v5, %v4452_v20  ;;  %v5940_v58 = vadd.f32 %v5939_v35, %v5938_v61 }
 0x3ac   :  { %v5941_v23 = vpop.f32.mrf.mxu0 }
 0x3ad   :  { %v4457_v6 = vadd.f32 %v5940_v58, %v5912_v7  ;;  %v4515_v55 = vsel %vm2515_vm0, %v4501_v34, 0.0 }
 0x3ae   :  { %v5942_v49 = vpop.f32.mrf.mxu0  ;;  %v4516_v0 = vadd.f32 %v4515_v55, %v4514_v52 }
 0x3af   :  { %v4506_v1 = vadd.f32 %v6027_v24, %v4457_v6  ;;  %v5943_v2 = vadd.f32 %v5942_v49, %v5941_v23  ;;  %v8209_v49 = vld [vmem:[#allocation7_spill] sm:$0xff] }
 0x3b1   :  { %v4517_v25 = vsel %vm2515_vm0, %v4506_v1, 0.0  ;;  %v4460_v43 = vadd.f32 %v5943_v2, %v5915_v38 }
 0x3b2   :  { %v4518_v48 = vadd.f32 %v4517_v25, %v4516_v0 }
 0x3b3   :  { %v4509_v46 = vadd.f32 %v6028_v21, %v4460_v43 }
 0x3b5   :  { %v4519_v8 = vsel %vm2515_vm0, %v4509_v46, 0.0 }
 0x3b6   :  { %v4520_v62 = vadd.f32 %v4519_v8, %v4518_v48 }
 0x3b8   :  { %v4521_v37 = vrot.slane %v4520_v62, 4 }
 0x3ba   :  { %v4522_v44 = vadd.f32 %v4521_v37, %v4520_v62 }
 0x3bc   :  { %v4523_v57 = vrot.slane %v4522_v44, 2 }
 0x3be   :  { %v4524_v9 = vadd.f32 %v4523_v57, %v4522_v44 }
 0x3c0   :  { %v4525_v31 = vrot.slane %v4524_v9, 1 }
 0x3c2   :  { %v4526_v10 = vadd.f32 %v4525_v31, %v4524_v9 }
 0x3c4   :  { %v4528_v53 = vmul.f32 0.03125, %v4526_v10 }
 0x3c6   :  { %v4529_v33 = vsub.f32 %v4498_v36, %v4528_v53  ;;  %v4530_v28 = vsub.f32 %v4501_v34, %v4528_v53  ;;  %v4531_v29 = vsub.f32 %v4506_v1, %v4528_v53  ;;  %v4532_v26 = vsub.f32 %v4509_v46, %v4528_v53 }
 0x3c8   :  { %v4533_v59 = vmul.f32 %v4529_v33, %v4529_v33  ;;  %v4534_v50 = vmul.f32 %v4530_v28, %v4530_v28  ;;  %v4535_v54 = vmul.f32 %v4531_v29, %v4531_v29  ;;  %v4536_v42 = vmul.f32 %v4532_v26, %v4532_v26 }
 0x3ca   :  { %v4537_v47 = vsel %vm2515_vm0, %v4533_v59, 0.0  ;;  %v4538_v11 = vsel %vm2515_vm0, %v4534_v50, 0.0  ;;  %v4540_v12 = vsel %vm2515_vm0, %v4535_v54, 0.0  ;;  %v4542_v45 = vsel %vm2515_vm0, %v4536_v42, 0.0  ;;  %v4812_v59 = vld [vmem:[%s7952_s7 + $0x88] sm:$0xff]  ;;  %v4811_v54 = vld [vmem:[%s7952_s7 + $0x80] sm:$0xff] }
 0x3cb   :  { %v4539_v16 = vadd.f32 %v4538_v11, %v4537_v47  ;;  %v4796_v50 = vld [vmem:[%s7952_s7 + $0x8] sm:$0xff]  ;;  %5978 = vmatprep.subr.mxu1 %v4812_v59  ;;  %v5394_v59 = vld [vmem:[%s7957_s9] ss:$0 sm:$0xff] }
 0x3cc   :  { %5979 = vmatpush3.msra.mxu1 %v4796_v50 }
 0x3cd   :  { %v4541_v51 = vadd.f32 %v4540_v12, %v4539_v16  ;;  %v4795_v12 = vld [vmem:[%s7952_s7] sm:$0xff]  ;;  %5980 = vmatprep.subr.mxu1 %v4811_v54 }
 0x3ce   :  { %5981 = vmatpush3.msra.mxu1 %v4795_v12 }
 0x3cf   :  { %v4543_v32 = vadd.f32 %v4542_v45, %v4541_v51 }
 0x3d1   :  { %v4544_v39 = vrot.slane %v4543_v32, 4 }
 0x3d3   :  { %v4545_v24 = vadd.f32 %v4544_v39, %v4543_v32 }
 0x3d5   :  { %v4546_v63 = vrot.slane %v4545_v24, 2 }
 0x3d7   :  { %v4547_v14 = vadd.f32 %v4546_v63, %v4545_v24 }
 0x3d9   :  { %v4548_v13 = vrot.slane %v4547_v14, 1 }
 0x3db   :  { %v4549_v4 = vadd.f32 %v4548_v13, %v4547_v14 }
 0x3dd   :  { %v4550_v15 = vmul.f32 0.03125, %v4549_v4 }
 0x3df   :  { %v4551_v41 = vadd.f32 1e-05, %v4550_v15 }
 0x3e1   :  { %6309 = vrsqrt.f32 %v4551_v41 }
 0x3ee   :  { %v6310_v19 = vpop.eup %6309 }
 0x3ef   :  { %v4553_v18 = vmul.f32 %v6310_v19, %v4529_v33  ;;  %v4554_v3 = vmul.f32 %v6310_v19, %v4530_v28  ;;  %v4555_v21 = vmul.f32 %v6310_v19, %v4531_v29  ;;  %v4556_v30 = vmul.f32 %v6310_v19, %v4532_v26 }
 0x3f1   :  { %v4563_v22 = vmul.f32 %v5375_v40, %v4553_v18  ;;  %v4564_v60 = vmul.f32 %v5375_v40, %v4554_v3  ;;  %v4565_v61 = vmul.f32 %v5375_v40, %v4555_v21  ;;  %v4566_v27 = vmul.f32 %v5375_v40, %v4556_v30 }
 0x3f3   :  { %v4573_v20 = vadd.f32 %v5376_v17, %v4563_v22  ;;  %v4574_v5 = vadd.f32 %v5376_v17, %v4564_v60  ;;  %v4575_v35 = vadd.f32 %v5376_v17, %v4565_v61  ;;  %v4576_v7 = vadd.f32 %v5376_v17, %v4566_v27 }
 0x3f5   :  { %v4577_v34 = vmax.f32 %v4573_v20, 0.0  ;;  %v4578_v58 = vmax.f32 %v4574_v5, 0.0  ;;  %v4579_v23 = vmax.f32 %v4575_v35, 0.0  ;;  %v4580_v36 = vmax.f32 %v4576_v7, 0.0 }
 0x3f7   :  { %v4636_v6 = vcombine.high %v4580_v36, %v4580_v36  ;;  %v4643_v38 = vrot.slane %v4580_v36, %v8209_v49  ;;  %v4585_v55 = vcombine.high %v4577_v34, %v4577_v34  ;;  %v7890_v1 = vrot.slane %v4577_v34, %v8209_v49 }
 0x3f8   :  { %v4602_v2 = vcombine.high %v4578_v58, %v4578_v58  ;;  %v4609_v52 = vrot.slane %v4578_v58, %v8209_v49  ;;  %v4619_v25 = vcombine.high %v4579_v23, %v4579_v23  ;;  %v7894_v43 = vrot.slane %v4579_v23, %v8209_v49 }
 0x3f9   :  { %v4650_v0 = vrot.slane %v4636_v6, %v8209_v49  ;;  %v4599_v46 = vrot.slane %v4585_v55, %v8209_v49  ;;  %v4600_v48 = vcombine.high %v7890_v1, %v7890_v1  ;;  %v4651_v8 = vcombine.high %v4643_v38, %v4643_v38 }
 0x3fa   :  { %v4616_v62 = vrot.slane %v4602_v2, %v8209_v49  ;;  %v4617_v37 = vcombine.high %v4609_v52, %v4609_v52  ;;  %v4633_v44 = vrot.slane %v4619_v25, %v8209_v49  ;;  %v4634_v57 = vcombine.high %v7894_v43, %v7894_v43 }
 0x3fb   :  { %v4601_v9 = vcombine.high %v4599_v46, %v4599_v46  ;;  %v4652_v31 = vcombine.high %v4650_v0, %v4650_v0  ;;  %v5378_v10 = vrot.slane %v4600_v48, 9  ;;  %v5390_v53 = vrot.slane %v4651_v8, 9 }
 0x3fc   :  { %v4618_v33 = vcombine.high %v4616_v62, %v4616_v62  ;;  %v4635_v28 = vcombine.high %v4633_v44, %v4633_v44  ;;  %v5382_v29 = vrot.slane %v4617_v37, 9  ;;  %v5386_v26 = vrot.slane %v4634_v57, 9 }
 0x3fd   :  { %v5380_v42 = vrot.slane %v4601_v9, 9  ;;  %v5392_v47 = vrot.slane %v4652_v31, 9  ;;  %v4718_v11 = vmax.f32 %v4600_v48, %v5378_v10  ;;  %v4730_v16 = vmax.f32 %v4651_v8, %v5390_v53 }
 0x3fe   :  { %v5384_v51 = vrot.slane %v4618_v33, 9  ;;  %v5388_v45 = vrot.slane %v4635_v28, 9  ;;  %v4722_v32 = vmax.f32 %v4617_v37, %v5382_v29  ;;  %v4726_v39 = vmax.f32 %v4634_v57, %v5386_v26 }
 0x3ff   :  { %v4720_v24 = vmax.f32 %v4601_v9, %v5380_v42  ;;  %v4732_v63 = vmax.f32 %v4652_v31, %v5392_v47  ;;  %v5381_v14 = vrot.slane %v4609_v52, 9  ;;  %v5383_v13 = vrot.slane %v4616_v62, 9 }
 0x400   :  { %v4724_v4 = vmax.f32 %v4618_v33, %v5384_v51  ;;  %v4728_v15 = vmax.f32 %v4635_v28, %v5388_v45  ;;  %v5389_v41 = vrot.slane %v4643_v38, 9  ;;  %v5391_v19 = vrot.slane %v4650_v0, 9 }
 0x401   :  { %v4734_v40 = vmax.f32 %v4718_v11, %v4720_v24  ;;  %v4740_v18 = vmax.f32 %v4730_v16, %v4732_v63  ;;  %v4721_v3 = vmax.f32 %v4609_v52, %v5381_v14  ;;  %v4723_v21 = vmax.f32 %v4616_v62, %v5383_v13 }
 0x402   :  { %v4736_v30 = vmax.f32 %v4722_v32, %v4724_v4  ;;  %v4738_v17 = vmax.f32 %v4726_v39, %v4728_v15  ;;  %v4729_v22 = vmax.f32 %v4643_v38, %v5389_v41  ;;  %v4731_v60 = vmax.f32 %v4650_v0, %v5391_v19 }
 0x403   :  { %v4758_v61 = vrot.slane %v4734_v40, %v8189_v56  ;;  %v4788_v27 = vrot.slane %v4740_v18, %v8189_v56  ;;  %v4735_v20 = vmax.f32 %v4721_v3, %v4723_v21  ;;  %v5377_v5 = vrot.slane %v7890_v1, 9 }
 0x404   :  { %v4762_v35 = vrot.slane %v4738_v17, %v8189_v56  ;;  %v4784_v7 = vrot.slane %v4736_v30, %v8189_v56  ;;  %v4739_v34 = vmax.f32 %v4729_v22, %v4731_v60  ;;  %v5379_v58 = vrot.slane %v4599_v46, 9 }
 0x405   :  { %v4772_v23 = vrot.slane %v4735_v20, %v8189_v56  ;;  %v5385_v36 = vrot.slane %v7894_v43, 9  ;;  %v5387_v6 = vrot.slane %v4633_v44, 9  ;;  %v4717_v49 = vmax.f32 %v7890_v1, %v5377_v5 }
 0x406   :  { %v4763_v38 = vsel %vm3503_vm3, %v4762_v35, %v4758_v61  ;;  %v4789_v55 = vsel %vm3503_vm3, %v4788_v27, %v4784_v7  ;;  %v4776_v2 = vrot.slane %v4739_v34, %v8189_v56  ;;  %v4719_v52 = vmax.f32 %v4599_v46, %v5379_v58 }
 0x407   :  { %v6032_v25 = vpack.i.bf16 %v4763_v38, %v4789_v55  ;;  %v4725_v0 = vmax.f32 %v7894_v43, %v5385_v36  ;;  %v4727_v48 = vmax.f32 %v4633_v44, %v5387_v6  ;;  %v16_v44 = vstv %s7955_s10 }
 0x408   :  { %v4777_v8 = vsel %vm3503_vm3, %v4776_v2, %v4772_v23  ;;  %v4733_v62 = vmax.f32 %v4717_v49, %v4719_v52  ;;  %17 = vst [vmem:[#allocation6] sm:$0x1] %v16_v44 }
 0x409   :  { %6033 = vrot.lane.b32.xlu0 %v6032_v25, %s6317_s13  ;;  %v4737_v37 = vmax.f32 %v4725_v0, %v4727_v48 }
 0x40a   :  { %v4746_v57 = vrot.slane %v4733_v62, %v8189_v56 }
 0x40b   :  { %v4750_v1 = vrot.slane %v4737_v37, %v8189_v56  ;;  %v5393_v56 = vld [vmem:[%s7956_s8] ss:$0 sm:$0xff] }
 0x40d   :  { %v4751_v9 = vsel %vm3503_vm3, %v4750_v1, %v4746_v57 }
 0x40f   :  { %v5395_v47 = vld [vmem:[#allocation6] ss:$0 sm:$0xff] }
 0x47b   :  { %v6034_v31 = vpop.permute.xlu0 %6033 }
 0x47c   :  { %v6036_v10 = vunpack.i.h.bf16 %v6034_v31  ;;  %v6035_v53 = vunpack.i.l.bf16 %v6034_v31 }
 0x47e   :  { %v4794_v46 = vsel %vm2515_vm0, %v4777_v8, %v6035_v53  ;;  %v4793_v43 = vsel %vm2515_vm0, %v4751_v9, %v6036_v10 }
 0x47f   :  { %4898 = vmatprep.mubr.f32.mxu1 %v4794_v46 }
 0x480   :  { %4899 = vmatmul.mubr.f32.vlgmr.msra.gmra.mxu1 %v4793_v43 }
 0x540   :  { %v5982_v33 = vpop.f32.mrf.mxu1 }
 0x542   :  { %v5983_v28 = vpop.f32.mrf.mxu1 }
 0x543   :  { %v5984_v29 = vadd.f32 %v5983_v28, %v5982_v33 }
 0x545   :  { %v4901_v26 = vadd.f32 %v5984_v29, %v5393_v56 }
 0x547   :  { %v4904_v50 = vmax.f32 %v4901_v26, 0.0 }
 0x549   :  { %v4912_v54 = vmul.f32 %v5394_v59, %v4904_v50 }
 0x54b   :  { %v4914_v42 = vsel %vm4913_vm8, %v4912_v54, 0.0 }
 0x54c   :  { %4915 = vadd.xlane.f32.xlu1 %v4914_v42 }
 0x5d5   :  { %v4916_v11 = vpop.xlane.xlu1 %4915 }
 0x5d6   :  { %v4924_v16 = vadd.f32 %v5395_v47, %v4916_v11 }
 0x5d8   :  { %v5396_v12 = vmul.f32 -1.442695, %v4924_v16 }
 0x5da   :  { %6311 = vpow2.f32 %v5396_v12 }
 0x5e7   :  { %v6312_v51 = vpop.eup %6311 }
 0x5e8   :  { %v4928_v45 = vadd.f32 1.0, %v6312_v51 }
 0x5ea   :  { %6313 = vrcp.f32 %v4928_v45 }
 0x5f7   :  { %v6314_v32 = vpop.eup %6313 }
 0x5f8   :  { %4932 = vst.msk [vmem:[%s7958_s11] sm:$0x3] %vm4931_vm9, %v6314_v32 }

</bundles_post_ra>
